<compile_context>
chip_gen: v7x
topology: tpu7x:2x2x1
jax: 0.10.0
libtpu: 0.0.40
codegen_flags: <defaults>
</compile_context>

<pallas_src>
import jax
import jax.numpy as jnp
import numpy as np
from jax import lax
from jax.experimental import pallas as pl
from jax.experimental.pallas import tpu as pltpu

LN_EPS = 1e-5          # PyTorch nn.LayerNorm default
K = 7                  # depthwise kernel size
PAD = 3                # (K - 1) // 2
HIGHEST = lax.Precision.HIGHEST
BF16 = jnp.bfloat16


def _group_layernorm(x, m_bd, gamma, beta):
    """LayerNorm over C for lane-packed rows (.., W*C).

    m_bd is a (W*C, W*C) block-diagonal averaging matrix (1/C inside each
    C-lane group); x @ m_bd returns the per-voxel mean already broadcast back
    to every lane of its group, so no cross-lane reshapes are needed and the
    reduction rides the MXU.  Kept f32 / HIGHEST: the E[(x-mu)^2] formulation
    is accuracy sensitive and these matmuls are a small slice of the MXU work.
    """
    mean = jnp.dot(x, m_bd, preferred_element_type=jnp.float32, precision=HIGHEST)
    xc = x - mean
    var = jnp.dot(xc * xc, m_bd, preferred_element_type=jnp.float32, precision=HIGHEST)
    return xc * lax.rsqrt(var + LN_EPS) * gamma + beta


# -------------------- fused norm1 + dwconv + norm2 + Mlp + residuals --------------------
def _make_fused_kernel(D, H, WC):
    def kernel(x_ref, A_ref, bias_ref, g1_ref, b1_ref, g2_ref, b2_ref,
               m_ref, w1_ref, b1m_ref, w2_ref, b2m_ref, o_ref, pad_ref):
        # Zero the D/H halo scratch every grid step.  A pl.when(pid==0) gate was
        # considered (scratch persists across steps and the interior is fully
        # rewritten), but it is unsafe when the "parallel" batch axis is sharded
        # across TensorCores (per-core scratch may never see step 0); the fill
        # is only ~a dozen vregs of stores, so keep it unconditional.
        pad_ref[...] = jnp.zeros_like(pad_ref)

        # ---- fused norm1 over the whole per-batch block (block-diag MXU stats) ----
        x_all = x_ref[...].astype(jnp.float32).reshape(D * H, WC)
        xn = _group_layernorm(x_all, m_ref[...], g1_ref[...], b1_ref[...])
        xn = xn.reshape(D, H, WC)
        for d in range(D):                      # static, lane-dense interior stores
            pad_ref[d + PAD, pl.ds(PAD, H), :] = xn[d]

        bias = bias_ref[...].astype(jnp.float32)     # (1, WC)  conv bias
        g2 = g2_ref[...]
        b2 = b2_ref[...]
        b1m = b1m_ref[...].astype(jnp.float32)       # (1, W*Hd)
        b2m = b2m_ref[...].astype(jnp.float32)       # (1, WC)

        # ---- per output plane: depthwise conv on the MXU + fused MLP epilogue ----
        @pl.loop(0, D)
        def _(d):
            # branch 1: x + dwconv(norm1(x)); 49 banded (WC,WC) bf16 matmuls.
            acc = x_ref[d].astype(jnp.float32) + bias            # (H, WC) f32
            for kz in range(K):
                plane = pad_ref[d + kz]                          # (H+2*PAD, WC) f32
                for ky in range(K):
                    acc = acc + jnp.dot(plane[ky:ky + H, :].astype(BF16),
                                        A_ref[kz * K + ky],
                                        preferred_element_type=jnp.float32)

            # branch 2: norm2 + fc1 -> GELU -> fc2 + residual (block-diag weights).
            xn2 = _group_layernorm(acc, m_ref[...], g2, b2)
            h = jnp.dot(xn2.astype(BF16), w1_ref[...],
                        preferred_element_type=jnp.float32) + b1m
            # TODO(synk): PyTorch nn.GELU() is the exact erf GELU; tanh-approx GELU
            # is used here for Mosaic-safe transcendental lowering (abs diff ~1e-3).
            h = jax.nn.gelu(h, approximate=True)
            y = jnp.dot(h.astype(BF16), w2_ref[...],
                        preferred_element_type=jnp.float32) + b2m
            o_ref[d] = (acc + y).astype(o_ref.dtype)

    return kernel


def fused_conv_block_pallas(x_p, pk):
    B, D, H, WC = x_p.shape
    WHd = pk["w1_bd"].shape[1]
    kernel = _make_fused_kernel(D, H, WC)

    def const2d(shape):
        return pl.BlockSpec(shape, lambda b: (0, 0))

    # TODO(synk): for realistic UNETR volumes (large D/H/W) add a D-chunk grid
    # axis with +-3 halo planes so the per-step VMEM footprint fits v7x's 64 MiB
    # and the pipeline has >B steps; at the test shape whole-volume-per-batch
    # blocks use only a few MiB.
    return pl.pallas_call(
        kernel,
        out_shape=jax.ShapeDtypeStruct((B, D, H, WC), x_p.dtype),
        grid_spec=pltpu.PrefetchScalarGridSpec(
            num_scalar_prefetch=0,
            grid=(B,),
            in_specs=[
                pl.BlockSpec((None, D, H, WC), lambda b: (b, 0, 0, 0)),   # x
                pl.BlockSpec((K * K, WC, WC), lambda b: (0, 0, 0)),       # banded conv taps (bf16)
                const2d((1, WC)),       # conv bias (tiled)
                const2d((1, WC)),       # gamma1
                const2d((1, WC)),       # beta1
                const2d((1, WC)),       # gamma2
                const2d((1, WC)),       # beta2
                const2d((WC, WC)),      # block-diag 1/C averaging matrix (f32)
                const2d((WC, WHd)),     # block-diag fc1 weight (bf16)
                const2d((1, WHd)),      # fc1 bias (tiled)
                const2d((WHd, WC)),     # block-diag fc2 weight (bf16)
                const2d((1, WC)),       # fc2 bias (tiled)
            ],
            out_specs=pl.BlockSpec((None, D, H, WC), lambda b: (b, 0, 0, 0)),
            scratch_shapes=[
                pltpu.VMEM((D + 2 * PAD, H + 2 * PAD, WC), jnp.float32),  # D/H halo
            ],
        ),
        compiler_params=pltpu.CompilerParams(
            dimension_semantics=("parallel",),
            vmem_limit_bytes=32 * 1024 * 1024,
        ),
    )(x_p, pk["A"], pk["bias"], pk["g1"], pk["b1"], pk["g2"], pk["b2"],
      pk["m_bd"], pk["w1_bd"], pk["b1m"], pk["w2_bd"], pk["b2m"])


# ----------------------------- one-time parameter packing -----------------------------
def pack_params(p, *, W):
    """Pack PyTorch-layout parameters into lane-dense, MXU-friendly operands.

    Done once, outside the jitted forward (review item: hoist the kron/tile
    weight packing out of conv_block_forward).
    """
    f32 = np.float32
    C = np.asarray(p["g1"]).shape[0]
    WC = W * C

    # Depthwise taps folded into 49 banded (WC, WC) matrices:
    #   A[kz*7+ky][(w + kx - 3)*C + c, w*C + c] = w_dw[c, 0, kz, ky, kx]
    # Out-of-range w rows are simply absent -> W zero-padding comes for free and
    # the kernel never needs a W halo or shifted lane windows.
    wd = np.asarray(p["w_dw"], f32).reshape(C, K, K, K)
    A = np.zeros((K * K, WC, WC), f32)
    cidx = np.arange(C)
    for kz in range(K):
        for ky in range(K):
            for kx in range(K):
                off = kx - PAD
                w_out = np.arange(W)
                w_in = w_out + off
                ok = (w_in >= 0) & (w_in < W)
                wo, wi = w_out[ok], w_in[ok]
                rows = (wi[:, None] * C + cidx[None, :]).ravel()
                cols = (wo[:, None] * C + cidx[None, :]).ravel()
                A[kz * K + ky, rows, cols] = np.tile(wd[:, kz, ky, kx], wo.size)

    eye_w = np.eye(W, dtype=f32)
    m_bd = np.kron(eye_w, np.full((C, C), 1.0 / C, f32))            # (WC, WC)
    w1_bd = np.kron(eye_w, np.asarray(p["W1"], f32))                # (WC, W*Hd)
    w2_bd = np.kron(eye_w, np.asarray(p["W2"], f32))                # (W*Hd, WC)

    def tile_row(v):
        return jnp.asarray(np.tile(np.asarray(v, f32), W)[None, :])

    return {
        "A": jnp.asarray(A, BF16),
        "bias": tile_row(p["bias_dw"]),
        "g1": tile_row(p["g1"]),
        "b1": tile_row(p["b1"]),
        "g2": tile_row(p["g2"]),
        "b2": tile_row(p["b2"]),
        "m_bd": jnp.asarray(m_bd),
        "w1_bd": jnp.asarray(w1_bd, BF16),
        "b1m": tile_row(p["b1m"]),
        "w2_bd": jnp.asarray(w2_bd, BF16),
        "b2m": tile_row(p["b2m"]),
    }


# ------------------------------------ full forward ------------------------------------
@jax.jit
def conv_block_forward(x, packed):
    B, D, H, W, C = x.shape
    WC = W * C
    assert WC % 128 == 0, "lane packing requires W*C to be a multiple of 128"
    assert H % 8 == 0
    x_p = x.reshape(B, D, H, WC)
    # x = x + dwconv(norm1(x)); x = x + mlp(norm2(x))   (drop_path = Identity)
    out = fused_conv_block_pallas(x_p, packed)
    return out.reshape(B, D, H, W, C)


# --------------------------------- pure-JAX reference ----------------------------------
def conv_block_reference(x, p):
    B, D, H, W, C = x.shape

    def ln(v, g, b):
        mu = jnp.mean(v, axis=-1, keepdims=True)
        var = jnp.mean(jnp.square(v - mu), axis=-1, keepdims=True)
        return (v - mu) * lax.rsqrt(var + LN_EPS) * g + b

    h = ln(x, p["g1"], p["b1"])
    hc = jnp.transpose(h, (0, 4, 1, 2, 3))
    conv = lax.conv_general_dilated(
        hc, p["w_dw"], window_strides=(1, 1, 1),
        padding=((3, 3), (3, 3), (3, 3)),
        dimension_numbers=("NCDHW", "OIDHW", "NCDHW"),
        feature_group_count=C, precision=HIGHEST)
    conv = conv + p["bias_dw"].reshape(1, C, 1, 1, 1)
    x = x + jnp.transpose(conv, (0, 2, 3, 4, 1))
    h2 = ln(x, p["g2"], p["b2"])
    mid = jax.nn.gelu(jnp.dot(h2, p["W1"], precision=HIGHEST) + p["b1m"],
                      approximate=True)
    return x + (jnp.dot(mid, p["W2"], precision=HIGHEST) + p["b2m"])


if __name__ == "__main__":
    B, D, H, W, C = 2, 8, 8, 8, 16
    mlp_ratio = 4
    Hd = C * mlp_ratio

    keys = jax.random.split(jax.random.PRNGKey(0), 10)
    params = {
        "g1": 1.0 + 0.1 * jax.random.normal(keys[0], (C,), jnp.float32),
        "b1": 0.1 * jax.random.normal(keys[1], (C,), jnp.float32),
        "w_dw": 0.05 * jax.random.normal(keys[2], (C, 1, 7, 7, 7), jnp.float32),
        "bias_dw": 0.05 * jax.random.normal(keys[3], (C,), jnp.float32),
        "g2": 1.0 + 0.1 * jax.random.normal(keys[4], (C,), jnp.float32),
        "b2": 0.1 * jax.random.normal(keys[5], (C,), jnp.float32),
        "W1": 0.1 * jax.random.normal(keys[6], (C, Hd), jnp.float32),
        "b1m": 0.05 * jax.random.normal(keys[7], (Hd,), jnp.float32),
        "W2": 0.1 * jax.random.normal(keys[8], (Hd, C), jnp.float32),
        "b2m": 0.05 * jax.random.normal(keys[9], (C,), jnp.float32),
    }
    x = jax.random.normal(jax.random.PRNGKey(1), (B, D, H, W, C), jnp.float32)

    packed = pack_params(params, W=W)           # one-time weight packing
    out = jax.block_until_ready(conv_block_forward(x, packed))
    ref = jax.block_until_ready(conv_block_reference(x, params))
    np.testing.assert_allclose(np.asarray(out), np.asarray(ref), rtol=2e-2, atol=2e-2)
    print("KERNEL_OK")
</pallas_src>

<mosaic_0001>
module attributes {stable_mosaic.version = 11 : i64} {
  func.func @kernel(%arg0: i32, %arg1: memref<1x8x8x128xf32, #tpu.memory_space<vmem>>, %arg2: memref<49x128x128xbf16, #tpu.memory_space<vmem>>, %arg3: memref<1x128xf32, #tpu.memory_space<vmem>>, %arg4: memref<1x128xf32, #tpu.memory_space<vmem>>, %arg5: memref<1x128xf32, #tpu.memory_space<vmem>>, %arg6: memref<1x128xf32, #tpu.memory_space<vmem>>, %arg7: memref<1x128xf32, #tpu.memory_space<vmem>>, %arg8: memref<128x128xf32, #tpu.memory_space<vmem>>, %arg9: memref<128x512xbf16, #tpu.memory_space<vmem>>, %arg10: memref<1x512xf32, #tpu.memory_space<vmem>>, %arg11: memref<512x128xbf16, #tpu.memory_space<vmem>>, %arg12: memref<1x128xf32, #tpu.memory_space<vmem>>, %arg13: memref<1x8x8x128xf32, #tpu.memory_space<vmem>>, %arg14: memref<14x14x128xf32, #tpu.memory_space<vmem>>) attributes {dimension_semantics = [#tpu.dimension_semantics<parallel>], iteration_bounds = array<i64: 2>, scalar_prefetch = 0 : i64, scratch_operands = 1 : i64, tpu.core_type = #tpu.core_type<tc>, window_params = [{transform_indices = @transform_0, window_bounds = array<i64: 1, 8, 8, 128>}, {pipeline_mode = #tpu.pipeline_mode<synchronous>, transform_indices = @transform_1, window_bounds = array<i64: 49, 128, 128>}, {pipeline_mode = #tpu.pipeline_mode<synchronous>, transform_indices = @transform_2, window_bounds = array<i64: 1, 128>}, {pipeline_mode = #tpu.pipeline_mode<synchronous>, transform_indices = @transform_3, window_bounds = array<i64: 1, 128>}, {pipeline_mode = #tpu.pipeline_mode<synchronous>, transform_indices = @transform_4, window_bounds = array<i64: 1, 128>}, {pipeline_mode = #tpu.pipeline_mode<synchronous>, transform_indices = @transform_5, window_bounds = array<i64: 1, 128>}, {pipeline_mode = #tpu.pipeline_mode<synchronous>, transform_indices = @transform_6, window_bounds = array<i64: 1, 128>}, {pipeline_mode = #tpu.pipeline_mode<synchronous>, transform_indices = @transform_7, window_bounds = array<i64: 128, 128>}, {pipeline_mode = #tpu.pipeline_mode<synchronous>, transform_indices = @transform_8, window_bounds = array<i64: 128, 512>}, {pipeline_mode = #tpu.pipeline_mode<synchronous>, transform_indices = @transform_9, window_bounds = array<i64: 1, 512>}, {pipeline_mode = #tpu.pipeline_mode<synchronous>, transform_indices = @transform_10, window_bounds = array<i64: 512, 128>}, {pipeline_mode = #tpu.pipeline_mode<synchronous>, transform_indices = @transform_11, window_bounds = array<i64: 1, 128>}, {transform_indices = @transform_12, window_bounds = array<i64: 1, 8, 8, 128>}]} {
    %cst = arith.constant 0.000000e+00 : f32
    %0 = vector.broadcast %cst : f32 to vector<14x14x128xf32>
    %c0 = arith.constant 0 : index
    %c0_0 = arith.constant 0 : index
    %c0_1 = arith.constant 0 : index
    %1 = vector.load %arg14[%c0, %c0_0, %c0_1] : memref<14x14x128xf32, #tpu.memory_space<vmem>>, vector<14x14x128xf32>
    tpu.vector_store %arg14[%c0, %c0_0, %c0_1], %0 {strides = array<i32>} : memref<14x14x128xf32, #tpu.memory_space<vmem>>, vector<14x14x128xf32>,
    %c0_2 = arith.constant 0 : index
    %c0_3 = arith.constant 0 : index
    %c0_4 = arith.constant 0 : index
    %c0_5 = arith.constant 0 : index
    %2 = vector.load %arg1[%c0_2, %c0_3, %c0_4, %c0_5] : memref<1x8x8x128xf32, #tpu.memory_space<vmem>>, vector<1x8x8x128xf32>
    %3 = vector.shape_cast %2 : vector<1x8x8x128xf32> to vector<8x8x128xf32>
    %4 = vector.shape_cast %3 : vector<8x8x128xf32> to vector<64x128xf32>
    %c0_6 = arith.constant 0 : index
    %c0_7 = arith.constant 0 : index
    %5 = vector.load %arg8[%c0_6, %c0_7] : memref<128x128xf32, #tpu.memory_space<vmem>>, vector<128x128xf32>
    %c0_8 = arith.constant 0 : index
    %c0_9 = arith.constant 0 : index
    %6 = vector.load %arg4[%c0_8, %c0_9] : memref<1x128xf32, #tpu.memory_space<vmem>>, vector<1x128xf32>
    %c0_10 = arith.constant 0 : index
    %c0_11 = arith.constant 0 : index
    %7 = vector.load %arg5[%c0_10, %c0_11] : memref<1x128xf32, #tpu.memory_space<vmem>>, vector<1x128xf32>
    %cst_12 = arith.constant dense<0.000000e+00> : vector<64x128xf32>
    %8 = tpu.matmul %4, %5, %cst_12 {dimension_numbers = #tpu.dot_dimension_numbers<[1], [0], [0], [1], [0, 0, 1, 1], [], []>, precision = #tpu.contract_precision<fp32>} : vector<64x128xf32>, vector<128x128xf32>, vector<64x128xf32> -> vector<64x128xf32>
    %9 = arith.subf %4, %8 : vector<64x128xf32>
    %10 = arith.mulf %9, %9 : vector<64x128xf32>
    %cst_13 = arith.constant dense<0.000000e+00> : vector<64x128xf32>
    %11 = tpu.matmul %10, %5, %cst_13 {dimension_numbers = #tpu.dot_dimension_numbers<[1], [0], [0], [1], [0, 0, 1, 1], [], []>, precision = #tpu.contract_precision<fp32>} : vector<64x128xf32>, vector<128x128xf32>, vector<64x128xf32> -> vector<64x128xf32>
    %cst_14 = arith.constant 9.99999974E-6 : f32
    %12 = vector.broadcast %cst_14 : f32 to vector<64x128xf32>
    %13 = arith.addf %11, %12 : vector<64x128xf32>
    %14 = math.rsqrt %13 : vector<64x128xf32>
    %15 = arith.mulf %9, %14 : vector<64x128xf32>
    %16 = vector.broadcast %6 : vector<1x128xf32> to vector<64x128xf32>
    %17 = arith.mulf %15, %16 : vector<64x128xf32>
    %18 = vector.broadcast %7 : vector<1x128xf32> to vector<64x128xf32>
    %19 = arith.addf %17, %18 : vector<64x128xf32>
    %20 = vector.shape_cast %19 : vector<64x128xf32> to vector<8x8x128xf32>
    %21 = vector.extract_strided_slice %20 {offsets = [0, 0, 0], sizes = [1, 8, 128], strides = [1, 1, 1]} : vector<8x8x128xf32> to vector<1x8x128xf32>
    %22 = vector.shape_cast %21 : vector<1x8x128xf32> to vector<8x128xf32>
    %c3 = arith.constant 3 : index
    %c3_15 = arith.constant 3 : index
    %c0_16 = arith.constant 0 : index
    %23 = vector.load %arg14[%c3, %c3_15, %c0_16] : memref<14x14x128xf32, #tpu.memory_space<vmem>>, vector<1x8x128xf32>
    %24 = vector.shape_cast %23 : vector<1x8x128xf32> to vector<8x128xf32>
    %25 = vector.shape_cast %22 : vector<8x128xf32> to vector<1x8x128xf32>
    tpu.vector_store %arg14[%c3, %c3_15, %c0_16], %25 {strides = array<i32>} : memref<14x14x128xf32, #tpu.memory_space<vmem>>, vector<1x8x128xf32>,
    %26 = vector.extract_strided_slice %20 {offsets = [1, 0, 0], sizes = [1, 8, 128], strides = [1, 1, 1]} : vector<8x8x128xf32> to vector<1x8x128xf32>
    %27 = vector.shape_cast %26 : vector<1x8x128xf32> to vector<8x128xf32>
    %c4 = arith.constant 4 : index
    %c3_17 = arith.constant 3 : index
    %c0_18 = arith.constant 0 : index
    %28 = vector.load %arg14[%c4, %c3_17, %c0_18] : memref<14x14x128xf32, #tpu.memory_space<vmem>>, vector<1x8x128xf32>
    %29 = vector.shape_cast %28 : vector<1x8x128xf32> to vector<8x128xf32>
    %30 = vector.shape_cast %27 : vector<8x128xf32> to vector<1x8x128xf32>
    tpu.vector_store %arg14[%c4, %c3_17, %c0_18], %30 {strides = array<i32>} : memref<14x14x128xf32, #tpu.memory_space<vmem>>, vector<1x8x128xf32>,
    %31 = vector.extract_strided_slice %20 {offsets = [2, 0, 0], sizes = [1, 8, 128], strides = [1, 1, 1]} : vector<8x8x128xf32> to vector<1x8x128xf32>
    %32 = vector.shape_cast %31 : vector<1x8x128xf32> to vector<8x128xf32>
    %c5 = arith.constant 5 : index
    %c3_19 = arith.constant 3 : index
    %c0_20 = arith.constant 0 : index
    %33 = vector.load %arg14[%c5, %c3_19, %c0_20] : memref<14x14x128xf32, #tpu.memory_space<vmem>>, vector<1x8x128xf32>
    %34 = vector.shape_cast %33 : vector<1x8x128xf32> to vector<8x128xf32>
    %35 = vector.shape_cast %32 : vector<8x128xf32> to vector<1x8x128xf32>
    tpu.vector_store %arg14[%c5, %c3_19, %c0_20], %35 {strides = array<i32>} : memref<14x14x128xf32, #tpu.memory_space<vmem>>, vector<1x8x128xf32>,
    %36 = vector.extract_strided_slice %20 {offsets = [3, 0, 0], sizes = [1, 8, 128], strides = [1, 1, 1]} : vector<8x8x128xf32> to vector<1x8x128xf32>
    %37 = vector.shape_cast %36 : vector<1x8x128xf32> to vector<8x128xf32>
    %c6 = arith.constant 6 : index
    %c3_21 = arith.constant 3 : index
    %c0_22 = arith.constant 0 : index
    %38 = vector.load %arg14[%c6, %c3_21, %c0_22] : memref<14x14x128xf32, #tpu.memory_space<vmem>>, vector<1x8x128xf32>
    %39 = vector.shape_cast %38 : vector<1x8x128xf32> to vector<8x128xf32>
    %40 = vector.shape_cast %37 : vector<8x128xf32> to vector<1x8x128xf32>
    tpu.vector_store %arg14[%c6, %c3_21, %c0_22], %40 {strides = array<i32>} : memref<14x14x128xf32, #tpu.memory_space<vmem>>, vector<1x8x128xf32>,
    %41 = vector.extract_strided_slice %20 {offsets = [4, 0, 0], sizes = [1, 8, 128], strides = [1, 1, 1]} : vector<8x8x128xf32> to vector<1x8x128xf32>
    %42 = vector.shape_cast %41 : vector<1x8x128xf32> to vector<8x128xf32>
    %c7 = arith.constant 7 : index
    %c3_23 = arith.constant 3 : index
    %c0_24 = arith.constant 0 : index
    %43 = vector.load %arg14[%c7, %c3_23, %c0_24] : memref<14x14x128xf32, #tpu.memory_space<vmem>>, vector<1x8x128xf32>
    %44 = vector.shape_cast %43 : vector<1x8x128xf32> to vector<8x128xf32>
    %45 = vector.shape_cast %42 : vector<8x128xf32> to vector<1x8x128xf32>
    tpu.vector_store %arg14[%c7, %c3_23, %c0_24], %45 {strides = array<i32>} : memref<14x14x128xf32, #tpu.memory_space<vmem>>, vector<1x8x128xf32>,
    %46 = vector.extract_strided_slice %20 {offsets = [5, 0, 0], sizes = [1, 8, 128], strides = [1, 1, 1]} : vector<8x8x128xf32> to vector<1x8x128xf32>
    %47 = vector.shape_cast %46 : vector<1x8x128xf32> to vector<8x128xf32>
    %c8 = arith.constant 8 : index
    %c3_25 = arith.constant 3 : index
    %c0_26 = arith.constant 0 : index
    %48 = vector.load %arg14[%c8, %c3_25, %c0_26] : memref<14x14x128xf32, #tpu.memory_space<vmem>>, vector<1x8x128xf32>
    %49 = vector.shape_cast %48 : vector<1x8x128xf32> to vector<8x128xf32>
    %50 = vector.shape_cast %47 : vector<8x128xf32> to vector<1x8x128xf32>
    tpu.vector_store %arg14[%c8, %c3_25, %c0_26], %50 {strides = array<i32>} : memref<14x14x128xf32, #tpu.memory_space<vmem>>, vector<1x8x128xf32>,
    %51 = vector.extract_strided_slice %20 {offsets = [6, 0, 0], sizes = [1, 8, 128], strides = [1, 1, 1]} : vector<8x8x128xf32> to vector<1x8x128xf32>
    %52 = vector.shape_cast %51 : vector<1x8x128xf32> to vector<8x128xf32>
    %c9 = arith.constant 9 : index
    %c3_27 = arith.constant 3 : index
    %c0_28 = arith.constant 0 : index
    %53 = vector.load %arg14[%c9, %c3_27, %c0_28] : memref<14x14x128xf32, #tpu.memory_space<vmem>>, vector<1x8x128xf32>
    %54 = vector.shape_cast %53 : vector<1x8x128xf32> to vector<8x128xf32>
    %55 = vector.shape_cast %52 : vector<8x128xf32> to vector<1x8x128xf32>
    tpu.vector_store %arg14[%c9, %c3_27, %c0_28], %55 {strides = array<i32>} : memref<14x14x128xf32, #tpu.memory_space<vmem>>, vector<1x8x128xf32>,
    %56 = vector.extract_strided_slice %20 {offsets = [7, 0, 0], sizes = [1, 8, 128], strides = [1, 1, 1]} : vector<8x8x128xf32> to vector<1x8x128xf32>
    %57 = vector.shape_cast %56 : vector<1x8x128xf32> to vector<8x128xf32>
    %c10 = arith.constant 10 : index
    %c3_29 = arith.constant 3 : index
    %c0_30 = arith.constant 0 : index
    %58 = vector.load %arg14[%c10, %c3_29, %c0_30] : memref<14x14x128xf32, #tpu.memory_space<vmem>>, vector<1x8x128xf32>
    %59 = vector.shape_cast %58 : vector<1x8x128xf32> to vector<8x128xf32>
    %60 = vector.shape_cast %57 : vector<8x128xf32> to vector<1x8x128xf32>
    tpu.vector_store %arg14[%c10, %c3_29, %c0_30], %60 {strides = array<i32>} : memref<14x14x128xf32, #tpu.memory_space<vmem>>, vector<1x8x128xf32>,
    %c0_31 = arith.constant 0 : index
    %c0_32 = arith.constant 0 : index
    %61 = vector.load %arg3[%c0_31, %c0_32] : memref<1x128xf32, #tpu.memory_space<vmem>>, vector<1x128xf32>
    %c0_33 = arith.constant 0 : index
    %c0_34 = arith.constant 0 : index
    %62 = vector.load %arg6[%c0_33, %c0_34] : memref<1x128xf32, #tpu.memory_space<vmem>>, vector<1x128xf32>
    %c0_35 = arith.constant 0 : index
    %c0_36 = arith.constant 0 : index
    %63 = vector.load %arg7[%c0_35, %c0_36] : memref<1x128xf32, #tpu.memory_space<vmem>>, vector<1x128xf32>
    %c0_37 = arith.constant 0 : index
    %c0_38 = arith.constant 0 : index
    %64 = vector.load %arg10[%c0_37, %c0_38] : memref<1x512xf32, #tpu.memory_space<vmem>>, vector<1x512xf32>
    %c0_39 = arith.constant 0 : index
    %c0_40 = arith.constant 0 : index
    %65 = vector.load %arg12[%c0_39, %c0_40] : memref<1x128xf32, #tpu.memory_space<vmem>>, vector<1x128xf32>
    %c0_i32 = arith.constant 0 : i32
    %c8_i32 = arith.constant 8 : i32
    %66 = arith.addi %c0_i32, %c8_i32 : i32
    %c1_i32 = arith.constant 1 : i32
    scf.for %arg15 = %c0_i32 to %66 step %c1_i32  : i32 {
      %c1_i32_42 = arith.constant 1 : i32
      %67 = arith.muli %arg15, %c1_i32_42 : i32
      %c0_i32_43 = arith.constant 0 : i32
      %68 = arith.addi %c0_i32_43, %67 : i32
      %c0_44 = arith.constant 0 : index
      %69 = arith.index_cast %68 : i32 to index
      %c0_45 = arith.constant 0 : index
      %c0_46 = arith.constant 0 : index
      %70 = vector.load %arg1[%c0_44, %69, %c0_45, %c0_46] : memref<1x8x8x128xf32, #tpu.memory_space<vmem>>, vector<1x1x8x128xf32>
      %71 = vector.shape_cast %70 : vector<1x1x8x128xf32> to vector<8x128xf32>
      %72 = vector.broadcast %61 : vector<1x128xf32> to vector<8x128xf32>
      %73 = arith.addf %71, %72 : vector<8x128xf32>
      %c0_i32_47 = arith.constant 0 : i32
      %74 = arith.addi %68, %c0_i32_47 : i32
      %75 = arith.index_cast %74 : i32 to index
      %c0_48 = arith.constant 0 : index
      %c0_49 = arith.constant 0 : index
      %76 = vector.load %arg14[%75, %c0_48, %c0_49] : memref<14x14x128xf32, #tpu.memory_space<vmem>>, vector<1x14x128xf32>
      %77 = vector.shape_cast %76 : vector<1x14x128xf32> to vector<14x128xf32>
      %78 = vector.extract_strided_slice %77 {offsets = [0, 0], sizes = [8, 128], strides = [1, 1]} : vector<14x128xf32> to vector<8x128xf32>
      %79 = arith.truncf %78 : vector<8x128xf32> to vector<8x128xbf16>
      %c0_50 = arith.constant 0 : index
      %c0_51 = arith.constant 0 : index
      %c0_52 = arith.constant 0 : index
      %80 = vector.load %arg2[%c0_50, %c0_51, %c0_52] : memref<49x128x128xbf16, #tpu.memory_space<vmem>>, vector<1x128x128xbf16>
      %81 = vector.shape_cast %80 : vector<1x128x128xbf16> to vector<128x128xbf16>
      %cst_53 = arith.constant dense<0.000000e+00> : vector<8x128xf32>
      %82 = tpu.matmul %79, %81, %cst_53 {dimension_numbers = #tpu.dot_dimension_numbers<[1], [0], [0], [1], [0, 0, 1, 1], [], []>} : vector<8x128xbf16>, vector<128x128xbf16>, vector<8x128xf32> -> vector<8x128xf32>
      %83 = arith.addf %73, %82 : vector<8x128xf32>
      %84 = vector.extract_strided_slice %77 {offsets = [1, 0], sizes = [8, 128], strides = [1, 1]} : vector<14x128xf32> to vector<8x128xf32>
      %85 = arith.truncf %84 : vector<8x128xf32> to vector<8x128xbf16>
      %c1 = arith.constant 1 : index
      %c0_54 = arith.constant 0 : index
      %c0_55 = arith.constant 0 : index
      %86 = vector.load %arg2[%c1, %c0_54, %c0_55] : memref<49x128x128xbf16, #tpu.memory_space<vmem>>, vector<1x128x128xbf16>
      %87 = vector.shape_cast %86 : vector<1x128x128xbf16> to vector<128x128xbf16>
      %cst_56 = arith.constant dense<0.000000e+00> : vector<8x128xf32>
      %88 = tpu.matmul %85, %87, %cst_56 {dimension_numbers = #tpu.dot_dimension_numbers<[1], [0], [0], [1], [0, 0, 1, 1], [], []>} : vector<8x128xbf16>, vector<128x128xbf16>, vector<8x128xf32> -> vector<8x128xf32>
      %89 = arith.addf %83, %88 : vector<8x128xf32>
      %90 = vector.extract_strided_slice %77 {offsets = [2, 0], sizes = [8, 128], strides = [1, 1]} : vector<14x128xf32> to vector<8x128xf32>
      %91 = arith.truncf %90 : vector<8x128xf32> to vector<8x128xbf16>
      %c2 = arith.constant 2 : index
      %c0_57 = arith.constant 0 : index
      %c0_58 = arith.constant 0 : index
      %92 = vector.load %arg2[%c2, %c0_57, %c0_58] : memref<49x128x128xbf16, #tpu.memory_space<vmem>>, vector<1x128x128xbf16>
      %93 = vector.shape_cast %92 : vector<1x128x128xbf16> to vector<128x128xbf16>
      %cst_59 = arith.constant dense<0.000000e+00> : vector<8x128xf32>
      %94 = tpu.matmul %91, %93, %cst_59 {dimension_numbers = #tpu.dot_dimension_numbers<[1], [0], [0], [1], [0, 0, 1, 1], [], []>} : vector<8x128xbf16>, vector<128x128xbf16>, vector<8x128xf32> -> vector<8x128xf32>
      %95 = arith.addf %89, %94 : vector<8x128xf32>
      %96 = vector.extract_strided_slice %77 {offsets = [3, 0], sizes = [8, 128], strides = [1, 1]} : vector<14x128xf32> to vector<8x128xf32>
      %97 = arith.truncf %96 : vector<8x128xf32> to vector<8x128xbf16>
      %c3_60 = arith.constant 3 : index
      %c0_61 = arith.constant 0 : index
      %c0_62 = arith.constant 0 : index
      %98 = vector.load %arg2[%c3_60, %c0_61, %c0_62] : memref<49x128x128xbf16, #tpu.memory_space<vmem>>, vector<1x128x128xbf16>
      %99 = vector.shape_cast %98 : vector<1x128x128xbf16> to vector<128x128xbf16>
      %cst_63 = arith.constant dense<0.000000e+00> : vector<8x128xf32>
      %100 = tpu.matmul %97, %99, %cst_63 {dimension_numbers = #tpu.dot_dimension_numbers<[1], [0], [0], [1], [0, 0, 1, 1], [], []>} : vector<8x128xbf16>, vector<128x128xbf16>, vector<8x128xf32> -> vector<8x128xf32>
      %101 = arith.addf %95, %100 : vector<8x128xf32>
      %102 = vector.extract_strided_slice %77 {offsets = [4, 0], sizes = [8, 128], strides = [1, 1]} : vector<14x128xf32> to vector<8x128xf32>
      %103 = arith.truncf %102 : vector<8x128xf32> to vector<8x128xbf16>
      %c4_64 = arith.constant 4 : index
      %c0_65 = arith.constant 0 : index
      %c0_66 = arith.constant 0 : index
      %104 = vector.load %arg2[%c4_64, %c0_65, %c0_66] : memref<49x128x128xbf16, #tpu.memory_space<vmem>>, vector<1x128x128xbf16>
      %105 = vector.shape_cast %104 : vector<1x128x128xbf16> to vector<128x128xbf16>
      %cst_67 = arith.constant dense<0.000000e+00> : vector<8x128xf32>
      %106 = tpu.matmul %103, %105, %cst_67 {dimension_numbers = #tpu.dot_dimension_numbers<[1], [0], [0], [1], [0, 0, 1, 1], [], []>} : vector<8x128xbf16>, vector<128x128xbf16>, vector<8x128xf32> -> vector<8x128xf32>
      %107 = arith.addf %101, %106 : vector<8x128xf32>
      %108 = vector.extract_strided_slice %77 {offsets = [5, 0], sizes = [8, 128], strides = [1, 1]} : vector<14x128xf32> to vector<8x128xf32>
      %109 = arith.truncf %108 : vector<8x128xf32> to vector<8x128xbf16>
      %c5_68 = arith.constant 5 : index
      %c0_69 = arith.constant 0 : index
      %c0_70 = arith.constant 0 : index
      %110 = vector.load %arg2[%c5_68, %c0_69, %c0_70] : memref<49x128x128xbf16, #tpu.memory_space<vmem>>, vector<1x128x128xbf16>
      %111 = vector.shape_cast %110 : vector<1x128x128xbf16> to vector<128x128xbf16>
      %cst_71 = arith.constant dense<0.000000e+00> : vector<8x128xf32>
      %112 = tpu.matmul %109, %111, %cst_71 {dimension_numbers = #tpu.dot_dimension_numbers<[1], [0], [0], [1], [0, 0, 1, 1], [], []>} : vector<8x128xbf16>, vector<128x128xbf16>, vector<8x128xf32> -> vector<8x128xf32>
      %113 = arith.addf %107, %112 : vector<8x128xf32>
      %114 = vector.extract_strided_slice %77 {offsets = [6, 0], sizes = [8, 128], strides = [1, 1]} : vector<14x128xf32> to vector<8x128xf32>
      %115 = arith.truncf %114 : vector<8x128xf32> to vector<8x128xbf16>
      %c6_72 = arith.constant 6 : index
      %c0_73 = arith.constant 0 : index
      %c0_74 = arith.constant 0 : index
      %116 = vector.load %arg2[%c6_72, %c0_73, %c0_74] : memref<49x128x128xbf16, #tpu.memory_space<vmem>>, vector<1x128x128xbf16>
      %117 = vector.shape_cast %116 : vector<1x128x128xbf16> to vector<128x128xbf16>
      %cst_75 = arith.constant dense<0.000000e+00> : vector<8x128xf32>
      %118 = tpu.matmul %115, %117, %cst_75 {dimension_numbers = #tpu.dot_dimension_numbers<[1], [0], [0], [1], [0, 0, 1, 1], [], []>} : vector<8x128xbf16>, vector<128x128xbf16>, vector<8x128xf32> -> vector<8x128xf32>
      %119 = arith.addf %113, %118 : vector<8x128xf32>
      %c1_i32_76 = arith.constant 1 : i32
      %120 = arith.addi %68, %c1_i32_76 : i32
      %121 = arith.index_cast %120 : i32 to index
      %c0_77 = arith.constant 0 : index
      %c0_78 = arith.constant 0 : index
      %122 = vector.load %arg14[%121, %c0_77, %c0_78] : memref<14x14x128xf32, #tpu.memory_space<vmem>>, vector<1x14x128xf32>
      %123 = vector.shape_cast %122 : vector<1x14x128xf32> to vector<14x128xf32>
      %124 = vector.extract_strided_slice %123 {offsets = [0, 0], sizes = [8, 128], strides = [1, 1]} : vector<14x128xf32> to vector<8x128xf32>
      %125 = arith.truncf %124 : vector<8x128xf32> to vector<8x128xbf16>
      %c7_79 = arith.constant 7 : index
      %c0_80 = arith.constant 0 : index
      %c0_81 = arith.constant 0 : index
      %126 = vector.load %arg2[%c7_79, %c0_80, %c0_81] : memref<49x128x128xbf16, #tpu.memory_space<vmem>>, vector<1x128x128xbf16>
      %127 = vector.shape_cast %126 : vector<1x128x128xbf16> to vector<128x128xbf16>
      %cst_82 = arith.constant dense<0.000000e+00> : vector<8x128xf32>
      %128 = tpu.matmul %125, %127, %cst_82 {dimension_numbers = #tpu.dot_dimension_numbers<[1], [0], [0], [1], [0, 0, 1, 1], [], []>} : vector<8x128xbf16>, vector<128x128xbf16>, vector<8x128xf32> -> vector<8x128xf32>
      %129 = arith.addf %119, %128 : vector<8x128xf32>
      %130 = vector.extract_strided_slice %123 {offsets = [1, 0], sizes = [8, 128], strides = [1, 1]} : vector<14x128xf32> to vector<8x128xf32>
      %131 = arith.truncf %130 : vector<8x128xf32> to vector<8x128xbf16>
      %c8_83 = arith.constant 8 : index
      %c0_84 = arith.constant 0 : index
      %c0_85 = arith.constant 0 : index
      %132 = vector.load %arg2[%c8_83, %c0_84, %c0_85] : memref<49x128x128xbf16, #tpu.memory_space<vmem>>, vector<1x128x128xbf16>
      %133 = vector.shape_cast %132 : vector<1x128x128xbf16> to vector<128x128xbf16>
      %cst_86 = arith.constant dense<0.000000e+00> : vector<8x128xf32>
      %134 = tpu.matmul %131, %133, %cst_86 {dimension_numbers = #tpu.dot_dimension_numbers<[1], [0], [0], [1], [0, 0, 1, 1], [], []>} : vector<8x128xbf16>, vector<128x128xbf16>, vector<8x128xf32> -> vector<8x128xf32>
      %135 = arith.addf %129, %134 : vector<8x128xf32>
      %136 = vector.extract_strided_slice %123 {offsets = [2, 0], sizes = [8, 128], strides = [1, 1]} : vector<14x128xf32> to vector<8x128xf32>
      %137 = arith.truncf %136 : vector<8x128xf32> to vector<8x128xbf16>
      %c9_87 = arith.constant 9 : index
      %c0_88 = arith.constant 0 : index
      %c0_89 = arith.constant 0 : index
      %138 = vector.load %arg2[%c9_87, %c0_88, %c0_89] : memref<49x128x128xbf16, #tpu.memory_space<vmem>>, vector<1x128x128xbf16>
      %139 = vector.shape_cast %138 : vector<1x128x128xbf16> to vector<128x128xbf16>
      %cst_90 = arith.constant dense<0.000000e+00> : vector<8x128xf32>
      %140 = tpu.matmul %137, %139, %cst_90 {dimension_numbers = #tpu.dot_dimension_numbers<[1], [0], [0], [1], [0, 0, 1, 1], [], []>} : vector<8x128xbf16>, vector<128x128xbf16>, vector<8x128xf32> -> vector<8x128xf32>
      %141 = arith.addf %135, %140 : vector<8x128xf32>
      %142 = vector.extract_strided_slice %123 {offsets = [3, 0], sizes = [8, 128], strides = [1, 1]} : vector<14x128xf32> to vector<8x128xf32>
      %143 = arith.truncf %142 : vector<8x128xf32> to vector<8x128xbf16>
      %c10_91 = arith.constant 10 : index
      %c0_92 = arith.constant 0 : index
      %c0_93 = arith.constant 0 : index
      %144 = vector.load %arg2[%c10_91, %c0_92, %c0_93] : memref<49x128x128xbf16, #tpu.memory_space<vmem>>, vector<1x128x128xbf16>
      %145 = vector.shape_cast %144 : vector<1x128x128xbf16> to vector<128x128xbf16>
      %cst_94 = arith.constant dense<0.000000e+00> : vector<8x128xf32>
      %146 = tpu.matmul %143, %145, %cst_94 {dimension_numbers = #tpu.dot_dimension_numbers<[1], [0], [0], [1], [0, 0, 1, 1], [], []>} : vector<8x128xbf16>, vector<128x128xbf16>, vector<8x128xf32> -> vector<8x128xf32>
      %147 = arith.addf %141, %146 : vector<8x128xf32>
      %148 = vector.extract_strided_slice %123 {offsets = [4, 0], sizes = [8, 128], strides = [1, 1]} : vector<14x128xf32> to vector<8x128xf32>
      %149 = arith.truncf %148 : vector<8x128xf32> to vector<8x128xbf16>
      %c11 = arith.constant 11 : index
      %c0_95 = arith.constant 0 : index
      %c0_96 = arith.constant 0 : index
      %150 = vector.load %arg2[%c11, %c0_95, %c0_96] : memref<49x128x128xbf16, #tpu.memory_space<vmem>>, vector<1x128x128xbf16>
      %151 = vector.shape_cast %150 : vector<1x128x128xbf16> to vector<128x128xbf16>
      %cst_97 = arith.constant dense<0.000000e+00> : vector<8x128xf32>
      %152 = tpu.matmul %149, %151, %cst_97 {dimension_numbers = #tpu.dot_dimension_numbers<[1], [0], [0], [1], [0, 0, 1, 1], [], []>} : vector<8x128xbf16>, vector<128x128xbf16>, vector<8x128xf32> -> vector<8x128xf32>
      %153 = arith.addf %147, %152 : vector<8x128xf32>
      %154 = vector.extract_strided_slice %123 {offsets = [5, 0], sizes = [8, 128], strides = [1, 1]} : vector<14x128xf32> to vector<8x128xf32>
      %155 = arith.truncf %154 : vector<8x128xf32> to vector<8x128xbf16>
      %c12 = arith.constant 12 : index
      %c0_98 = arith.constant 0 : index
      %c0_99 = arith.constant 0 : index
      %156 = vector.load %arg2[%c12, %c0_98, %c0_99] : memref<49x128x128xbf16, #tpu.memory_space<vmem>>, vector<1x128x128xbf16>
      %157 = vector.shape_cast %156 : vector<1x128x128xbf16> to vector<128x128xbf16>
      %cst_100 = arith.constant dense<0.000000e+00> : vector<8x128xf32>
      %158 = tpu.matmul %155, %157, %cst_100 {dimension_numbers = #tpu.dot_dimension_numbers<[1], [0], [0], [1], [0, 0, 1, 1], [], []>} : vector<8x128xbf16>, vector<128x128xbf16>, vector<8x128xf32> -> vector<8x128xf32>
      %159 = arith.addf %153, %158 : vector<8x128xf32>
      %160 = vector.extract_strided_slice %123 {offsets = [6, 0], sizes = [8, 128], strides = [1, 1]} : vector<14x128xf32> to vector<8x128xf32>
      %161 = arith.truncf %160 : vector<8x128xf32> to vector<8x128xbf16>
      %c13 = arith.constant 13 : index
      %c0_101 = arith.constant 0 : index
      %c0_102 = arith.constant 0 : index
      %162 = vector.load %arg2[%c13, %c0_101, %c0_102] : memref<49x128x128xbf16, #tpu.memory_space<vmem>>, vector<1x128x128xbf16>
      %163 = vector.shape_cast %162 : vector<1x128x128xbf16> to vector<128x128xbf16>
      %cst_103 = arith.constant dense<0.000000e+00> : vector<8x128xf32>
      %164 = tpu.matmul %161, %163, %cst_103 {dimension_numbers = #tpu.dot_dimension_numbers<[1], [0], [0], [1], [0, 0, 1, 1], [], []>} : vector<8x128xbf16>, vector<128x128xbf16>, vector<8x128xf32> -> vector<8x128xf32>
      %165 = arith.addf %159, %164 : vector<8x128xf32>
      %c2_i32 = arith.constant 2 : i32
      %166 = arith.addi %68, %c2_i32 : i32
      %167 = arith.index_cast %166 : i32 to index
      %c0_104 = arith.constant 0 : index
      %c0_105 = arith.constant 0 : index
      %168 = vector.load %arg14[%167, %c0_104, %c0_105] : memref<14x14x128xf32, #tpu.memory_space<vmem>>, vector<1x14x128xf32>
      %169 = vector.shape_cast %168 : vector<1x14x128xf32> to vector<14x128xf32>
      %170 = vector.extract_strided_slice %169 {offsets = [0, 0], sizes = [8, 128], strides = [1, 1]} : vector<14x128xf32> to vector<8x128xf32>
      %171 = arith.truncf %170 : vector<8x128xf32> to vector<8x128xbf16>
      %c14 = arith.constant 14 : index
      %c0_106 = arith.constant 0 : index
      %c0_107 = arith.constant 0 : index
      %172 = vector.load %arg2[%c14, %c0_106, %c0_107] : memref<49x128x128xbf16, #tpu.memory_space<vmem>>, vector<1x128x128xbf16>
      %173 = vector.shape_cast %172 : vector<1x128x128xbf16> to vector<128x128xbf16>
      %cst_108 = arith.constant dense<0.000000e+00> : vector<8x128xf32>
      %174 = tpu.matmul %171, %173, %cst_108 {dimension_numbers = #tpu.dot_dimension_numbers<[1], [0], [0], [1], [0, 0, 1, 1], [], []>} : vector<8x128xbf16>, vector<128x128xbf16>, vector<8x128xf32> -> vector<8x128xf32>
      %175 = arith.addf %165, %174 : vector<8x128xf32>
      %176 = vector.extract_strided_slice %169 {offsets = [1, 0], sizes = [8, 128], strides = [1, 1]} : vector<14x128xf32> to vector<8x128xf32>
      %177 = arith.truncf %176 : vector<8x128xf32> to vector<8x128xbf16>
      %c15 = arith.constant 15 : index
      %c0_109 = arith.constant 0 : index
      %c0_110 = arith.constant 0 : index
      %178 = vector.load %arg2[%c15, %c0_109, %c0_110] : memref<49x128x128xbf16, #tpu.memory_space<vmem>>, vector<1x128x128xbf16>
      %179 = vector.shape_cast %178 : vector<1x128x128xbf16> to vector<128x128xbf16>
      %cst_111 = arith.constant dense<0.000000e+00> : vector<8x128xf32>
      %180 = tpu.matmul %177, %179, %cst_111 {dimension_numbers = #tpu.dot_dimension_numbers<[1], [0], [0], [1], [0, 0, 1, 1], [], []>} : vector<8x128xbf16>, vector<128x128xbf16>, vector<8x128xf32> -> vector<8x128xf32>
      %181 = arith.addf %175, %180 : vector<8x128xf32>
      %182 = vector.extract_strided_slice %169 {offsets = [2, 0], sizes = [8, 128], strides = [1, 1]} : vector<14x128xf32> to vector<8x128xf32>
      %183 = arith.truncf %182 : vector<8x128xf32> to vector<8x128xbf16>
      %c16 = arith.constant 16 : index
      %c0_112 = arith.constant 0 : index
      %c0_113 = arith.constant 0 : index
      %184 = vector.load %arg2[%c16, %c0_112, %c0_113] : memref<49x128x128xbf16, #tpu.memory_space<vmem>>, vector<1x128x128xbf16>
      %185 = vector.shape_cast %184 : vector<1x128x128xbf16> to vector<128x128xbf16>
      %cst_114 = arith.constant dense<0.000000e+00> : vector<8x128xf32>
      %186 = tpu.matmul %183, %185, %cst_114 {dimension_numbers = #tpu.dot_dimension_numbers<[1], [0], [0], [1], [0, 0, 1, 1], [], []>} : vector<8x128xbf16>, vector<128x128xbf16>, vector<8x128xf32> -> vector<8x128xf32>
      %187 = arith.addf %181, %186 : vector<8x128xf32>
      %188 = vector.extract_strided_slice %169 {offsets = [3, 0], sizes = [8, 128], strides = [1, 1]} : vector<14x128xf32> to vector<8x128xf32>
      %189 = arith.truncf %188 : vector<8x128xf32> to vector<8x128xbf16>
      %c17 = arith.constant 17 : index
      %c0_115 = arith.constant 0 : index
      %c0_116 = arith.constant 0 : index
      %190 = vector.load %arg2[%c17, %c0_115, %c0_116] : memref<49x128x128xbf16, #tpu.memory_space<vmem>>, vector<1x128x128xbf16>
      %191 = vector.shape_cast %190 : vector<1x128x128xbf16> to vector<128x128xbf16>
      %cst_117 = arith.constant dense<0.000000e+00> : vector<8x128xf32>
      %192 = tpu.matmul %189, %191, %cst_117 {dimension_numbers = #tpu.dot_dimension_numbers<[1], [0], [0], [1], [0, 0, 1, 1], [], []>} : vector<8x128xbf16>, vector<128x128xbf16>, vector<8x128xf32> -> vector<8x128xf32>
      %193 = arith.addf %187, %192 : vector<8x128xf32>
      %194 = vector.extract_strided_slice %169 {offsets = [4, 0], sizes = [8, 128], strides = [1, 1]} : vector<14x128xf32> to vector<8x128xf32>
      %195 = arith.truncf %194 : vector<8x128xf32> to vector<8x128xbf16>
      %c18 = arith.constant 18 : index
      %c0_118 = arith.constant 0 : index
      %c0_119 = arith.constant 0 : index
      %196 = vector.load %arg2[%c18, %c0_118, %c0_119] : memref<49x128x128xbf16, #tpu.memory_space<vmem>>, vector<1x128x128xbf16>
      %197 = vector.shape_cast %196 : vector<1x128x128xbf16> to vector<128x128xbf16>
      %cst_120 = arith.constant dense<0.000000e+00> : vector<8x128xf32>
      %198 = tpu.matmul %195, %197, %cst_120 {dimension_numbers = #tpu.dot_dimension_numbers<[1], [0], [0], [1], [0, 0, 1, 1], [], []>} : vector<8x128xbf16>, vector<128x128xbf16>, vector<8x128xf32> -> vector<8x128xf32>
      %199 = arith.addf %193, %198 : vector<8x128xf32>
      %200 = vector.extract_strided_slice %169 {offsets = [5, 0], sizes = [8, 128], strides = [1, 1]} : vector<14x128xf32> to vector<8x128xf32>
      %201 = arith.truncf %200 : vector<8x128xf32> to vector<8x128xbf16>
      %c19 = arith.constant 19 : index
      %c0_121 = arith.constant 0 : index
      %c0_122 = arith.constant 0 : index
      %202 = vector.load %arg2[%c19, %c0_121, %c0_122] : memref<49x128x128xbf16, #tpu.memory_space<vmem>>, vector<1x128x128xbf16>
      %203 = vector.shape_cast %202 : vector<1x128x128xbf16> to vector<128x128xbf16>
      %cst_123 = arith.constant dense<0.000000e+00> : vector<8x128xf32>
      %204 = tpu.matmul %201, %203, %cst_123 {dimension_numbers = #tpu.dot_dimension_numbers<[1], [0], [0], [1], [0, 0, 1, 1], [], []>} : vector<8x128xbf16>, vector<128x128xbf16>, vector<8x128xf32> -> vector<8x128xf32>
      %205 = arith.addf %199, %204 : vector<8x128xf32>
      %206 = vector.extract_strided_slice %169 {offsets = [6, 0], sizes = [8, 128], strides = [1, 1]} : vector<14x128xf32> to vector<8x128xf32>
      %207 = arith.truncf %206 : vector<8x128xf32> to vector<8x128xbf16>
      %c20 = arith.constant 20 : index
      %c0_124 = arith.constant 0 : index
      %c0_125 = arith.constant 0 : index
      %208 = vector.load %arg2[%c20, %c0_124, %c0_125] : memref<49x128x128xbf16, #tpu.memory_space<vmem>>, vector<1x128x128xbf16>
      %209 = vector.shape_cast %208 : vector<1x128x128xbf16> to vector<128x128xbf16>
      %cst_126 = arith.constant dense<0.000000e+00> : vector<8x128xf32>
      %210 = tpu.matmul %207, %209, %cst_126 {dimension_numbers = #tpu.dot_dimension_numbers<[1], [0], [0], [1], [0, 0, 1, 1], [], []>} : vector<8x128xbf16>, vector<128x128xbf16>, vector<8x128xf32> -> vector<8x128xf32>
      %211 = arith.addf %205, %210 : vector<8x128xf32>
      %c3_i32 = arith.constant 3 : i32
      %212 = arith.addi %68, %c3_i32 : i32
      %213 = arith.index_cast %212 : i32 to index
      %c0_127 = arith.constant 0 : index
      %c0_128 = arith.constant 0 : index
      %214 = vector.load %arg14[%213, %c0_127, %c0_128] : memref<14x14x128xf32, #tpu.memory_space<vmem>>, vector<1x14x128xf32>
      %215 = vector.shape_cast %214 : vector<1x14x128xf32> to vector<14x128xf32>
      %216 = vector.extract_strided_slice %215 {offsets = [0, 0], sizes = [8, 128], strides = [1, 1]} : vector<14x128xf32> to vector<8x128xf32>
      %217 = arith.truncf %216 : vector<8x128xf32> to vector<8x128xbf16>
      %c21 = arith.constant 21 : index
      %c0_129 = arith.constant 0 : index
      %c0_130 = arith.constant 0 : index
      %218 = vector.load %arg2[%c21, %c0_129, %c0_130] : memref<49x128x128xbf16, #tpu.memory_space<vmem>>, vector<1x128x128xbf16>
      %219 = vector.shape_cast %218 : vector<1x128x128xbf16> to vector<128x128xbf16>
      %cst_131 = arith.constant dense<0.000000e+00> : vector<8x128xf32>
      %220 = tpu.matmul %217, %219, %cst_131 {dimension_numbers = #tpu.dot_dimension_numbers<[1], [0], [0], [1], [0, 0, 1, 1], [], []>} : vector<8x128xbf16>, vector<128x128xbf16>, vector<8x128xf32> -> vector<8x128xf32>
      %221 = arith.addf %211, %220 : vector<8x128xf32>
      %222 = vector.extract_strided_slice %215 {offsets = [1, 0], sizes = [8, 128], strides = [1, 1]} : vector<14x128xf32> to vector<8x128xf32>
      %223 = arith.truncf %222 : vector<8x128xf32> to vector<8x128xbf16>
      %c22 = arith.constant 22 : index
      %c0_132 = arith.constant 0 : index
      %c0_133 = arith.constant 0 : index
      %224 = vector.load %arg2[%c22, %c0_132, %c0_133] : memref<49x128x128xbf16, #tpu.memory_space<vmem>>, vector<1x128x128xbf16>
      %225 = vector.shape_cast %224 : vector<1x128x128xbf16> to vector<128x128xbf16>
      %cst_134 = arith.constant dense<0.000000e+00> : vector<8x128xf32>
      %226 = tpu.matmul %223, %225, %cst_134 {dimension_numbers = #tpu.dot_dimension_numbers<[1], [0], [0], [1], [0, 0, 1, 1], [], []>} : vector<8x128xbf16>, vector<128x128xbf16>, vector<8x128xf32> -> vector<8x128xf32>
      %227 = arith.addf %221, %226 : vector<8x128xf32>
      %228 = vector.extract_strided_slice %215 {offsets = [2, 0], sizes = [8, 128], strides = [1, 1]} : vector<14x128xf32> to vector<8x128xf32>
      %229 = arith.truncf %228 : vector<8x128xf32> to vector<8x128xbf16>
      %c23 = arith.constant 23 : index
      %c0_135 = arith.constant 0 : index
      %c0_136 = arith.constant 0 : index
      %230 = vector.load %arg2[%c23, %c0_135, %c0_136] : memref<49x128x128xbf16, #tpu.memory_space<vmem>>, vector<1x128x128xbf16>
      %231 = vector.shape_cast %230 : vector<1x128x128xbf16> to vector<128x128xbf16>
      %cst_137 = arith.constant dense<0.000000e+00> : vector<8x128xf32>
      %232 = tpu.matmul %229, %231, %cst_137 {dimension_numbers = #tpu.dot_dimension_numbers<[1], [0], [0], [1], [0, 0, 1, 1], [], []>} : vector<8x128xbf16>, vector<128x128xbf16>, vector<8x128xf32> -> vector<8x128xf32>
      %233 = arith.addf %227, %232 : vector<8x128xf32>
      %234 = vector.extract_strided_slice %215 {offsets = [3, 0], sizes = [8, 128], strides = [1, 1]} : vector<14x128xf32> to vector<8x128xf32>
      %235 = arith.truncf %234 : vector<8x128xf32> to vector<8x128xbf16>
      %c24 = arith.constant 24 : index
      %c0_138 = arith.constant 0 : index
      %c0_139 = arith.constant 0 : index
      %236 = vector.load %arg2[%c24, %c0_138, %c0_139] : memref<49x128x128xbf16, #tpu.memory_space<vmem>>, vector<1x128x128xbf16>
      %237 = vector.shape_cast %236 : vector<1x128x128xbf16> to vector<128x128xbf16>
      %cst_140 = arith.constant dense<0.000000e+00> : vector<8x128xf32>
      %238 = tpu.matmul %235, %237, %cst_140 {dimension_numbers = #tpu.dot_dimension_numbers<[1], [0], [0], [1], [0, 0, 1, 1], [], []>} : vector<8x128xbf16>, vector<128x128xbf16>, vector<8x128xf32> -> vector<8x128xf32>
      %239 = arith.addf %233, %238 : vector<8x128xf32>
      %240 = vector.extract_strided_slice %215 {offsets = [4, 0], sizes = [8, 128], strides = [1, 1]} : vector<14x128xf32> to vector<8x128xf32>
      %241 = arith.truncf %240 : vector<8x128xf32> to vector<8x128xbf16>
      %c25 = arith.constant 25 : index
      %c0_141 = arith.constant 0 : index
      %c0_142 = arith.constant 0 : index
      %242 = vector.load %arg2[%c25, %c0_141, %c0_142] : memref<49x128x128xbf16, #tpu.memory_space<vmem>>, vector<1x128x128xbf16>
      %243 = vector.shape_cast %242 : vector<1x128x128xbf16> to vector<128x128xbf16>
      %cst_143 = arith.constant dense<0.000000e+00> : vector<8x128xf32>
      %244 = tpu.matmul %241, %243, %cst_143 {dimension_numbers = #tpu.dot_dimension_numbers<[1], [0], [0], [1], [0, 0, 1, 1], [], []>} : vector<8x128xbf16>, vector<128x128xbf16>, vector<8x128xf32> -> vector<8x128xf32>
      %245 = arith.addf %239, %244 : vector<8x128xf32>
      %246 = vector.extract_strided_slice %215 {offsets = [5, 0], sizes = [8, 128], strides = [1, 1]} : vector<14x128xf32> to vector<8x128xf32>
      %247 = arith.truncf %246 : vector<8x128xf32> to vector<8x128xbf16>
      %c26 = arith.constant 26 : index
      %c0_144 = arith.constant 0 : index
      %c0_145 = arith.constant 0 : index
      %248 = vector.load %arg2[%c26, %c0_144, %c0_145] : memref<49x128x128xbf16, #tpu.memory_space<vmem>>, vector<1x128x128xbf16>
      %249 = vector.shape_cast %248 : vector<1x128x128xbf16> to vector<128x128xbf16>
      %cst_146 = arith.constant dense<0.000000e+00> : vector<8x128xf32>
      %250 = tpu.matmul %247, %249, %cst_146 {dimension_numbers = #tpu.dot_dimension_numbers<[1], [0], [0], [1], [0, 0, 1, 1], [], []>} : vector<8x128xbf16>, vector<128x128xbf16>, vector<8x128xf32> -> vector<8x128xf32>
      %251 = arith.addf %245, %250 : vector<8x128xf32>
      %252 = vector.extract_strided_slice %215 {offsets = [6, 0], sizes = [8, 128], strides = [1, 1]} : vector<14x128xf32> to vector<8x128xf32>
      %253 = arith.truncf %252 : vector<8x128xf32> to vector<8x128xbf16>
      %c27 = arith.constant 27 : index
      %c0_147 = arith.constant 0 : index
      %c0_148 = arith.constant 0 : index
      %254 = vector.load %arg2[%c27, %c0_147, %c0_148] : memref<49x128x128xbf16, #tpu.memory_space<vmem>>, vector<1x128x128xbf16>
      %255 = vector.shape_cast %254 : vector<1x128x128xbf16> to vector<128x128xbf16>
      %cst_149 = arith.constant dense<0.000000e+00> : vector<8x128xf32>
      %256 = tpu.matmul %253, %255, %cst_149 {dimension_numbers = #tpu.dot_dimension_numbers<[1], [0], [0], [1], [0, 0, 1, 1], [], []>} : vector<8x128xbf16>, vector<128x128xbf16>, vector<8x128xf32> -> vector<8x128xf32>
      %257 = arith.addf %251, %256 : vector<8x128xf32>
      %c4_i32 = arith.constant 4 : i32
      %258 = arith.addi %68, %c4_i32 : i32
      %259 = arith.index_cast %258 : i32 to index
      %c0_150 = arith.constant 0 : index
      %c0_151 = arith.constant 0 : index
      %260 = vector.load %arg14[%259, %c0_150, %c0_151] : memref<14x14x128xf32, #tpu.memory_space<vmem>>, vector<1x14x128xf32>
      %261 = vector.shape_cast %260 : vector<1x14x128xf32> to vector<14x128xf32>
      %262 = vector.extract_strided_slice %261 {offsets = [0, 0], sizes = [8, 128], strides = [1, 1]} : vector<14x128xf32> to vector<8x128xf32>
      %263 = arith.truncf %262 : vector<8x128xf32> to vector<8x128xbf16>
      %c28 = arith.constant 28 : index
      %c0_152 = arith.constant 0 : index
      %c0_153 = arith.constant 0 : index
      %264 = vector.load %arg2[%c28, %c0_152, %c0_153] : memref<49x128x128xbf16, #tpu.memory_space<vmem>>, vector<1x128x128xbf16>
      %265 = vector.shape_cast %264 : vector<1x128x128xbf16> to vector<128x128xbf16>
      %cst_154 = arith.constant dense<0.000000e+00> : vector<8x128xf32>
      %266 = tpu.matmul %263, %265, %cst_154 {dimension_numbers = #tpu.dot_dimension_numbers<[1], [0], [0], [1], [0, 0, 1, 1], [], []>} : vector<8x128xbf16>, vector<128x128xbf16>, vector<8x128xf32> -> vector<8x128xf32>
      %267 = arith.addf %257, %266 : vector<8x128xf32>
      %268 = vector.extract_strided_slice %261 {offsets = [1, 0], sizes = [8, 128], strides = [1, 1]} : vector<14x128xf32> to vector<8x128xf32>
      %269 = arith.truncf %268 : vector<8x128xf32> to vector<8x128xbf16>
      %c29 = arith.constant 29 : index
      %c0_155 = arith.constant 0 : index
      %c0_156 = arith.constant 0 : index
      %270 = vector.load %arg2[%c29, %c0_155, %c0_156] : memref<49x128x128xbf16, #tpu.memory_space<vmem>>, vector<1x128x128xbf16>
      %271 = vector.shape_cast %270 : vector<1x128x128xbf16> to vector<128x128xbf16>
      %cst_157 = arith.constant dense<0.000000e+00> : vector<8x128xf32>
      %272 = tpu.matmul %269, %271, %cst_157 {dimension_numbers = #tpu.dot_dimension_numbers<[1], [0], [0], [1], [0, 0, 1, 1], [], []>} : vector<8x128xbf16>, vector<128x128xbf16>, vector<8x128xf32> -> vector<8x128xf32>
      %273 = arith.addf %267, %272 : vector<8x128xf32>
      %274 = vector.extract_strided_slice %261 {offsets = [2, 0], sizes = [8, 128], strides = [1, 1]} : vector<14x128xf32> to vector<8x128xf32>
      %275 = arith.truncf %274 : vector<8x128xf32> to vector<8x128xbf16>
      %c30 = arith.constant 30 : index
      %c0_158 = arith.constant 0 : index
      %c0_159 = arith.constant 0 : index
      %276 = vector.load %arg2[%c30, %c0_158, %c0_159] : memref<49x128x128xbf16, #tpu.memory_space<vmem>>, vector<1x128x128xbf16>
      %277 = vector.shape_cast %276 : vector<1x128x128xbf16> to vector<128x128xbf16>
      %cst_160 = arith.constant dense<0.000000e+00> : vector<8x128xf32>
      %278 = tpu.matmul %275, %277, %cst_160 {dimension_numbers = #tpu.dot_dimension_numbers<[1], [0], [0], [1], [0, 0, 1, 1], [], []>} : vector<8x128xbf16>, vector<128x128xbf16>, vector<8x128xf32> -> vector<8x128xf32>
      %279 = arith.addf %273, %278 : vector<8x128xf32>
      %280 = vector.extract_strided_slice %261 {offsets = [3, 0], sizes = [8, 128], strides = [1, 1]} : vector<14x128xf32> to vector<8x128xf32>
      %281 = arith.truncf %280 : vector<8x128xf32> to vector<8x128xbf16>
      %c31 = arith.constant 31 : index
      %c0_161 = arith.constant 0 : index
      %c0_162 = arith.constant 0 : index
      %282 = vector.load %arg2[%c31, %c0_161, %c0_162] : memref<49x128x128xbf16, #tpu.memory_space<vmem>>, vector<1x128x128xbf16>
      %283 = vector.shape_cast %282 : vector<1x128x128xbf16> to vector<128x128xbf16>
      %cst_163 = arith.constant dense<0.000000e+00> : vector<8x128xf32>
      %284 = tpu.matmul %281, %283, %cst_163 {dimension_numbers = #tpu.dot_dimension_numbers<[1], [0], [0], [1], [0, 0, 1, 1], [], []>} : vector<8x128xbf16>, vector<128x128xbf16>, vector<8x128xf32> -> vector<8x128xf32>
      %285 = arith.addf %279, %284 : vector<8x128xf32>
      %286 = vector.extract_strided_slice %261 {offsets = [4, 0], sizes = [8, 128], strides = [1, 1]} : vector<14x128xf32> to vector<8x128xf32>
      %287 = arith.truncf %286 : vector<8x128xf32> to vector<8x128xbf16>
      %c32 = arith.constant 32 : index
      %c0_164 = arith.constant 0 : index
      %c0_165 = arith.constant 0 : index
      %288 = vector.load %arg2[%c32, %c0_164, %c0_165] : memref<49x128x128xbf16, #tpu.memory_space<vmem>>, vector<1x128x128xbf16>
      %289 = vector.shape_cast %288 : vector<1x128x128xbf16> to vector<128x128xbf16>
      %cst_166 = arith.constant dense<0.000000e+00> : vector<8x128xf32>
      %290 = tpu.matmul %287, %289, %cst_166 {dimension_numbers = #tpu.dot_dimension_numbers<[1], [0], [0], [1], [0, 0, 1, 1], [], []>} : vector<8x128xbf16>, vector<128x128xbf16>, vector<8x128xf32> -> vector<8x128xf32>
      %291 = arith.addf %285, %290 : vector<8x128xf32>
      %292 = vector.extract_strided_slice %261 {offsets = [5, 0], sizes = [8, 128], strides = [1, 1]} : vector<14x128xf32> to vector<8x128xf32>
      %293 = arith.truncf %292 : vector<8x128xf32> to vector<8x128xbf16>
      %c33 = arith.constant 33 : index
      %c0_167 = arith.constant 0 : index
      %c0_168 = arith.constant 0 : index
      %294 = vector.load %arg2[%c33, %c0_167, %c0_168] : memref<49x128x128xbf16, #tpu.memory_space<vmem>>, vector<1x128x128xbf16>
      %295 = vector.shape_cast %294 : vector<1x128x128xbf16> to vector<128x128xbf16>
      %cst_169 = arith.constant dense<0.000000e+00> : vector<8x128xf32>
      %296 = tpu.matmul %293, %295, %cst_169 {dimension_numbers = #tpu.dot_dimension_numbers<[1], [0], [0], [1], [0, 0, 1, 1], [], []>} : vector<8x128xbf16>, vector<128x128xbf16>, vector<8x128xf32> -> vector<8x128xf32>
      %297 = arith.addf %291, %296 : vector<8x128xf32>
      %298 = vector.extract_strided_slice %261 {offsets = [6, 0], sizes = [8, 128], strides = [1, 1]} : vector<14x128xf32> to vector<8x128xf32>
      %299 = arith.truncf %298 : vector<8x128xf32> to vector<8x128xbf16>
      %c34 = arith.constant 34 : index
      %c0_170 = arith.constant 0 : index
      %c0_171 = arith.constant 0 : index
      %300 = vector.load %arg2[%c34, %c0_170, %c0_171] : memref<49x128x128xbf16, #tpu.memory_space<vmem>>, vector<1x128x128xbf16>
      %301 = vector.shape_cast %300 : vector<1x128x128xbf16> to vector<128x128xbf16>
      %cst_172 = arith.constant dense<0.000000e+00> : vector<8x128xf32>
      %302 = tpu.matmul %299, %301, %cst_172 {dimension_numbers = #tpu.dot_dimension_numbers<[1], [0], [0], [1], [0, 0, 1, 1], [], []>} : vector<8x128xbf16>, vector<128x128xbf16>, vector<8x128xf32> -> vector<8x128xf32>
      %303 = arith.addf %297, %302 : vector<8x128xf32>
      %c5_i32 = arith.constant 5 : i32
      %304 = arith.addi %68, %c5_i32 : i32
      %305 = arith.index_cast %304 : i32 to index
      %c0_173 = arith.constant 0 : index
      %c0_174 = arith.constant 0 : index
      %306 = vector.load %arg14[%305, %c0_173, %c0_174] : memref<14x14x128xf32, #tpu.memory_space<vmem>>, vector<1x14x128xf32>
      %307 = vector.shape_cast %306 : vector<1x14x128xf32> to vector<14x128xf32>
      %308 = vector.extract_strided_slice %307 {offsets = [0, 0], sizes = [8, 128], strides = [1, 1]} : vector<14x128xf32> to vector<8x128xf32>
      %309 = arith.truncf %308 : vector<8x128xf32> to vector<8x128xbf16>
      %c35 = arith.constant 35 : index
      %c0_175 = arith.constant 0 : index
      %c0_176 = arith.constant 0 : index
      %310 = vector.load %arg2[%c35, %c0_175, %c0_176] : memref<49x128x128xbf16, #tpu.memory_space<vmem>>, vector<1x128x128xbf16>
      %311 = vector.shape_cast %310 : vector<1x128x128xbf16> to vector<128x128xbf16>
      %cst_177 = arith.constant dense<0.000000e+00> : vector<8x128xf32>
      %312 = tpu.matmul %309, %311, %cst_177 {dimension_numbers = #tpu.dot_dimension_numbers<[1], [0], [0], [1], [0, 0, 1, 1], [], []>} : vector<8x128xbf16>, vector<128x128xbf16>, vector<8x128xf32> -> vector<8x128xf32>
      %313 = arith.addf %303, %312 : vector<8x128xf32>
      %314 = vector.extract_strided_slice %307 {offsets = [1, 0], sizes = [8, 128], strides = [1, 1]} : vector<14x128xf32> to vector<8x128xf32>
      %315 = arith.truncf %314 : vector<8x128xf32> to vector<8x128xbf16>
      %c36 = arith.constant 36 : index
      %c0_178 = arith.constant 0 : index
      %c0_179 = arith.constant 0 : index
      %316 = vector.load %arg2[%c36, %c0_178, %c0_179] : memref<49x128x128xbf16, #tpu.memory_space<vmem>>, vector<1x128x128xbf16>
      %317 = vector.shape_cast %316 : vector<1x128x128xbf16> to vector<128x128xbf16>
      %cst_180 = arith.constant dense<0.000000e+00> : vector<8x128xf32>
      %318 = tpu.matmul %315, %317, %cst_180 {dimension_numbers = #tpu.dot_dimension_numbers<[1], [0], [0], [1], [0, 0, 1, 1], [], []>} : vector<8x128xbf16>, vector<128x128xbf16>, vector<8x128xf32> -> vector<8x128xf32>
      %319 = arith.addf %313, %318 : vector<8x128xf32>
      %320 = vector.extract_strided_slice %307 {offsets = [2, 0], sizes = [8, 128], strides = [1, 1]} : vector<14x128xf32> to vector<8x128xf32>
      %321 = arith.truncf %320 : vector<8x128xf32> to vector<8x128xbf16>
      %c37 = arith.constant 37 : index
      %c0_181 = arith.constant 0 : index
      %c0_182 = arith.constant 0 : index
      %322 = vector.load %arg2[%c37, %c0_181, %c0_182] : memref<49x128x128xbf16, #tpu.memory_space<vmem>>, vector<1x128x128xbf16>
      %323 = vector.shape_cast %322 : vector<1x128x128xbf16> to vector<128x128xbf16>
      %cst_183 = arith.constant dense<0.000000e+00> : vector<8x128xf32>
      %324 = tpu.matmul %321, %323, %cst_183 {dimension_numbers = #tpu.dot_dimension_numbers<[1], [0], [0], [1], [0, 0, 1, 1], [], []>} : vector<8x128xbf16>, vector<128x128xbf16>, vector<8x128xf32> -> vector<8x128xf32>
      %325 = arith.addf %319, %324 : vector<8x128xf32>
      %326 = vector.extract_strided_slice %307 {offsets = [3, 0], sizes = [8, 128], strides = [1, 1]} : vector<14x128xf32> to vector<8x128xf32>
      %327 = arith.truncf %326 : vector<8x128xf32> to vector<8x128xbf16>
      %c38 = arith.constant 38 : index
      %c0_184 = arith.constant 0 : index
      %c0_185 = arith.constant 0 : index
      %328 = vector.load %arg2[%c38, %c0_184, %c0_185] : memref<49x128x128xbf16, #tpu.memory_space<vmem>>, vector<1x128x128xbf16>
      %329 = vector.shape_cast %328 : vector<1x128x128xbf16> to vector<128x128xbf16>
      %cst_186 = arith.constant dense<0.000000e+00> : vector<8x128xf32>
      %330 = tpu.matmul %327, %329, %cst_186 {dimension_numbers = #tpu.dot_dimension_numbers<[1], [0], [0], [1], [0, 0, 1, 1], [], []>} : vector<8x128xbf16>, vector<128x128xbf16>, vector<8x128xf32> -> vector<8x128xf32>
      %331 = arith.addf %325, %330 : vector<8x128xf32>
      %332 = vector.extract_strided_slice %307 {offsets = [4, 0], sizes = [8, 128], strides = [1, 1]} : vector<14x128xf32> to vector<8x128xf32>
      %333 = arith.truncf %332 : vector<8x128xf32> to vector<8x128xbf16>
      %c39 = arith.constant 39 : index
      %c0_187 = arith.constant 0 : index
      %c0_188 = arith.constant 0 : index
      %334 = vector.load %arg2[%c39, %c0_187, %c0_188] : memref<49x128x128xbf16, #tpu.memory_space<vmem>>, vector<1x128x128xbf16>
      %335 = vector.shape_cast %334 : vector<1x128x128xbf16> to vector<128x128xbf16>
      %cst_189 = arith.constant dense<0.000000e+00> : vector<8x128xf32>
      %336 = tpu.matmul %333, %335, %cst_189 {dimension_numbers = #tpu.dot_dimension_numbers<[1], [0], [0], [1], [0, 0, 1, 1], [], []>} : vector<8x128xbf16>, vector<128x128xbf16>, vector<8x128xf32> -> vector<8x128xf32>
      %337 = arith.addf %331, %336 : vector<8x128xf32>
      %338 = vector.extract_strided_slice %307 {offsets = [5, 0], sizes = [8, 128], strides = [1, 1]} : vector<14x128xf32> to vector<8x128xf32>
      %339 = arith.truncf %338 : vector<8x128xf32> to vector<8x128xbf16>
      %c40 = arith.constant 40 : index
      %c0_190 = arith.constant 0 : index
      %c0_191 = arith.constant 0 : index
      %340 = vector.load %arg2[%c40, %c0_190, %c0_191] : memref<49x128x128xbf16, #tpu.memory_space<vmem>>, vector<1x128x128xbf16>
      %341 = vector.shape_cast %340 : vector<1x128x128xbf16> to vector<128x128xbf16>
      %cst_192 = arith.constant dense<0.000000e+00> : vector<8x128xf32>
      %342 = tpu.matmul %339, %341, %cst_192 {dimension_numbers = #tpu.dot_dimension_numbers<[1], [0], [0], [1], [0, 0, 1, 1], [], []>} : vector<8x128xbf16>, vector<128x128xbf16>, vector<8x128xf32> -> vector<8x128xf32>
      %343 = arith.addf %337, %342 : vector<8x128xf32>
      %344 = vector.extract_strided_slice %307 {offsets = [6, 0], sizes = [8, 128], strides = [1, 1]} : vector<14x128xf32> to vector<8x128xf32>
      %345 = arith.truncf %344 : vector<8x128xf32> to vector<8x128xbf16>
      %c41 = arith.constant 41 : index
      %c0_193 = arith.constant 0 : index
      %c0_194 = arith.constant 0 : index
      %346 = vector.load %arg2[%c41, %c0_193, %c0_194] : memref<49x128x128xbf16, #tpu.memory_space<vmem>>, vector<1x128x128xbf16>
      %347 = vector.shape_cast %346 : vector<1x128x128xbf16> to vector<128x128xbf16>
      %cst_195 = arith.constant dense<0.000000e+00> : vector<8x128xf32>
      %348 = tpu.matmul %345, %347, %cst_195 {dimension_numbers = #tpu.dot_dimension_numbers<[1], [0], [0], [1], [0, 0, 1, 1], [], []>} : vector<8x128xbf16>, vector<128x128xbf16>, vector<8x128xf32> -> vector<8x128xf32>
      %349 = arith.addf %343, %348 : vector<8x128xf32>
      %c6_i32 = arith.constant 6 : i32
      %350 = arith.addi %68, %c6_i32 : i32
      %351 = arith.index_cast %350 : i32 to index
      %c0_196 = arith.constant 0 : index
      %c0_197 = arith.constant 0 : index
      %352 = vector.load %arg14[%351, %c0_196, %c0_197] : memref<14x14x128xf32, #tpu.memory_space<vmem>>, vector<1x14x128xf32>
      %353 = vector.shape_cast %352 : vector<1x14x128xf32> to vector<14x128xf32>
      %354 = vector.extract_strided_slice %353 {offsets = [0, 0], sizes = [8, 128], strides = [1, 1]} : vector<14x128xf32> to vector<8x128xf32>
      %355 = arith.truncf %354 : vector<8x128xf32> to vector<8x128xbf16>
      %c42 = arith.constant 42 : index
      %c0_198 = arith.constant 0 : index
      %c0_199 = arith.constant 0 : index
      %356 = vector.load %arg2[%c42, %c0_198, %c0_199] : memref<49x128x128xbf16, #tpu.memory_space<vmem>>, vector<1x128x128xbf16>
      %357 = vector.shape_cast %356 : vector<1x128x128xbf16> to vector<128x128xbf16>
      %cst_200 = arith.constant dense<0.000000e+00> : vector<8x128xf32>
      %358 = tpu.matmul %355, %357, %cst_200 {dimension_numbers = #tpu.dot_dimension_numbers<[1], [0], [0], [1], [0, 0, 1, 1], [], []>} : vector<8x128xbf16>, vector<128x128xbf16>, vector<8x128xf32> -> vector<8x128xf32>
      %359 = arith.addf %349, %358 : vector<8x128xf32>
      %360 = vector.extract_strided_slice %353 {offsets = [1, 0], sizes = [8, 128], strides = [1, 1]} : vector<14x128xf32> to vector<8x128xf32>
      %361 = arith.truncf %360 : vector<8x128xf32> to vector<8x128xbf16>
      %c43 = arith.constant 43 : index
      %c0_201 = arith.constant 0 : index
      %c0_202 = arith.constant 0 : index
      %362 = vector.load %arg2[%c43, %c0_201, %c0_202] : memref<49x128x128xbf16, #tpu.memory_space<vmem>>, vector<1x128x128xbf16>
      %363 = vector.shape_cast %362 : vector<1x128x128xbf16> to vector<128x128xbf16>
      %cst_203 = arith.constant dense<0.000000e+00> : vector<8x128xf32>
      %364 = tpu.matmul %361, %363, %cst_203 {dimension_numbers = #tpu.dot_dimension_numbers<[1], [0], [0], [1], [0, 0, 1, 1], [], []>} : vector<8x128xbf16>, vector<128x128xbf16>, vector<8x128xf32> -> vector<8x128xf32>
      %365 = arith.addf %359, %364 : vector<8x128xf32>
      %366 = vector.extract_strided_slice %353 {offsets = [2, 0], sizes = [8, 128], strides = [1, 1]} : vector<14x128xf32> to vector<8x128xf32>
      %367 = arith.truncf %366 : vector<8x128xf32> to vector<8x128xbf16>
      %c44 = arith.constant 44 : index
      %c0_204 = arith.constant 0 : index
      %c0_205 = arith.constant 0 : index
      %368 = vector.load %arg2[%c44, %c0_204, %c0_205] : memref<49x128x128xbf16, #tpu.memory_space<vmem>>, vector<1x128x128xbf16>
      %369 = vector.shape_cast %368 : vector<1x128x128xbf16> to vector<128x128xbf16>
      %cst_206 = arith.constant dense<0.000000e+00> : vector<8x128xf32>
      %370 = tpu.matmul %367, %369, %cst_206 {dimension_numbers = #tpu.dot_dimension_numbers<[1], [0], [0], [1], [0, 0, 1, 1], [], []>} : vector<8x128xbf16>, vector<128x128xbf16>, vector<8x128xf32> -> vector<8x128xf32>
      %371 = arith.addf %365, %370 : vector<8x128xf32>
      %372 = vector.extract_strided_slice %353 {offsets = [3, 0], sizes = [8, 128], strides = [1, 1]} : vector<14x128xf32> to vector<8x128xf32>
      %373 = arith.truncf %372 : vector<8x128xf32> to vector<8x128xbf16>
      %c45 = arith.constant 45 : index
      %c0_207 = arith.constant 0 : index
      %c0_208 = arith.constant 0 : index
      %374 = vector.load %arg2[%c45, %c0_207, %c0_208] : memref<49x128x128xbf16, #tpu.memory_space<vmem>>, vector<1x128x128xbf16>
      %375 = vector.shape_cast %374 : vector<1x128x128xbf16> to vector<128x128xbf16>
      %cst_209 = arith.constant dense<0.000000e+00> : vector<8x128xf32>
      %376 = tpu.matmul %373, %375, %cst_209 {dimension_numbers = #tpu.dot_dimension_numbers<[1], [0], [0], [1], [0, 0, 1, 1], [], []>} : vector<8x128xbf16>, vector<128x128xbf16>, vector<8x128xf32> -> vector<8x128xf32>
      %377 = arith.addf %371, %376 : vector<8x128xf32>
      %378 = vector.extract_strided_slice %353 {offsets = [4, 0], sizes = [8, 128], strides = [1, 1]} : vector<14x128xf32> to vector<8x128xf32>
      %379 = arith.truncf %378 : vector<8x128xf32> to vector<8x128xbf16>
      %c46 = arith.constant 46 : index
      %c0_210 = arith.constant 0 : index
      %c0_211 = arith.constant 0 : index
      %380 = vector.load %arg2[%c46, %c0_210, %c0_211] : memref<49x128x128xbf16, #tpu.memory_space<vmem>>, vector<1x128x128xbf16>
      %381 = vector.shape_cast %380 : vector<1x128x128xbf16> to vector<128x128xbf16>
      %cst_212 = arith.constant dense<0.000000e+00> : vector<8x128xf32>
      %382 = tpu.matmul %379, %381, %cst_212 {dimension_numbers = #tpu.dot_dimension_numbers<[1], [0], [0], [1], [0, 0, 1, 1], [], []>} : vector<8x128xbf16>, vector<128x128xbf16>, vector<8x128xf32> -> vector<8x128xf32>
      %383 = arith.addf %377, %382 : vector<8x128xf32>
      %384 = vector.extract_strided_slice %353 {offsets = [5, 0], sizes = [8, 128], strides = [1, 1]} : vector<14x128xf32> to vector<8x128xf32>
      %385 = arith.truncf %384 : vector<8x128xf32> to vector<8x128xbf16>
      %c47 = arith.constant 47 : index
      %c0_213 = arith.constant 0 : index
      %c0_214 = arith.constant 0 : index
      %386 = vector.load %arg2[%c47, %c0_213, %c0_214] : memref<49x128x128xbf16, #tpu.memory_space<vmem>>, vector<1x128x128xbf16>
      %387 = vector.shape_cast %386 : vector<1x128x128xbf16> to vector<128x128xbf16>
      %cst_215 = arith.constant dense<0.000000e+00> : vector<8x128xf32>
      %388 = tpu.matmul %385, %387, %cst_215 {dimension_numbers = #tpu.dot_dimension_numbers<[1], [0], [0], [1], [0, 0, 1, 1], [], []>} : vector<8x128xbf16>, vector<128x128xbf16>, vector<8x128xf32> -> vector<8x128xf32>
      %389 = arith.addf %383, %388 : vector<8x128xf32>
      %390 = vector.extract_strided_slice %353 {offsets = [6, 0], sizes = [8, 128], strides = [1, 1]} : vector<14x128xf32> to vector<8x128xf32>
      %391 = arith.truncf %390 : vector<8x128xf32> to vector<8x128xbf16>
      %c48 = arith.constant 48 : index
      %c0_216 = arith.constant 0 : index
      %c0_217 = arith.constant 0 : index
      %392 = vector.load %arg2[%c48, %c0_216, %c0_217] : memref<49x128x128xbf16, #tpu.memory_space<vmem>>, vector<1x128x128xbf16>
      %393 = vector.shape_cast %392 : vector<1x128x128xbf16> to vector<128x128xbf16>
      %cst_218 = arith.constant dense<0.000000e+00> : vector<8x128xf32>
      %394 = tpu.matmul %391, %393, %cst_218 {dimension_numbers = #tpu.dot_dimension_numbers<[1], [0], [0], [1], [0, 0, 1, 1], [], []>} : vector<8x128xbf16>, vector<128x128xbf16>, vector<8x128xf32> -> vector<8x128xf32>
      %395 = arith.addf %389, %394 : vector<8x128xf32>
      %c0_219 = arith.constant 0 : index
      %c0_220 = arith.constant 0 : index
      %396 = vector.load %arg8[%c0_219, %c0_220] : memref<128x128xf32, #tpu.memory_space<vmem>>, vector<128x128xf32>
      %cst_221 = arith.constant dense<0.000000e+00> : vector<8x128xf32>
      %397 = tpu.matmul %395, %396, %cst_221 {dimension_numbers = #tpu.dot_dimension_numbers<[1], [0], [0], [1], [0, 0, 1, 1], [], []>, precision = #tpu.contract_precision<fp32>} : vector<8x128xf32>, vector<128x128xf32>, vector<8x128xf32> -> vector<8x128xf32>
      %398 = arith.subf %395, %397 : vector<8x128xf32>
      %399 = arith.mulf %398, %398 : vector<8x128xf32>
      %cst_222 = arith.constant dense<0.000000e+00> : vector<8x128xf32>
      %400 = tpu.matmul %399, %396, %cst_222 {dimension_numbers = #tpu.dot_dimension_numbers<[1], [0], [0], [1], [0, 0, 1, 1], [], []>, precision = #tpu.contract_precision<fp32>} : vector<8x128xf32>, vector<128x128xf32>, vector<8x128xf32> -> vector<8x128xf32>
      %cst_223 = arith.constant 9.99999974E-6 : f32
      %401 = vector.broadcast %cst_223 : f32 to vector<8x128xf32>
      %402 = arith.addf %400, %401 : vector<8x128xf32>
      %403 = math.rsqrt %402 : vector<8x128xf32>
      %404 = arith.mulf %398, %403 : vector<8x128xf32>
      %405 = vector.broadcast %62 : vector<1x128xf32> to vector<8x128xf32>
      %406 = arith.mulf %404, %405 : vector<8x128xf32>
      %407 = vector.broadcast %63 : vector<1x128xf32> to vector<8x128xf32>
      %408 = arith.addf %406, %407 : vector<8x128xf32>
      %409 = arith.truncf %408 : vector<8x128xf32> to vector<8x128xbf16>
      %c0_224 = arith.constant 0 : index
      %c0_225 = arith.constant 0 : index
      %410 = vector.load %arg9[%c0_224, %c0_225] : memref<128x512xbf16, #tpu.memory_space<vmem>>, vector<128x512xbf16>
      %cst_226 = arith.constant dense<0.000000e+00> : vector<8x512xf32>
      %411 = tpu.matmul %409, %410, %cst_226 {dimension_numbers = #tpu.dot_dimension_numbers<[1], [0], [0], [1], [0, 0, 1, 1], [], []>} : vector<8x128xbf16>, vector<128x512xbf16>, vector<8x512xf32> -> vector<8x512xf32>
      %412 = vector.broadcast %64 : vector<1x512xf32> to vector<8x512xf32>
      %413 = arith.addf %411, %412 : vector<8x512xf32>
      %414 = arith.mulf %413, %413 : vector<8x512xf32>
      %415 = arith.mulf %413, %414 : vector<8x512xf32>
      %cst_227 = arith.constant 4.471500e-02 : f32
      %416 = vector.broadcast %cst_227 : f32 to vector<8x512xf32>
      %417 = arith.mulf %416, %415 : vector<8x512xf32>
      %418 = arith.addf %413, %417 : vector<8x512xf32>
      %cst_228 = arith.constant 0.797884583 : f32
      %419 = vector.broadcast %cst_228 : f32 to vector<8x512xf32>
      %420 = arith.mulf %419, %418 : vector<8x512xf32>
      %421 = math.tanh %420 : vector<8x512xf32>
      %cst_229 = arith.constant 1.000000e+00 : f32
      %422 = vector.broadcast %cst_229 : f32 to vector<8x512xf32>
      %423 = arith.addf %422, %421 : vector<8x512xf32>
      %cst_230 = arith.constant 5.000000e-01 : f32
      %424 = vector.broadcast %cst_230 : f32 to vector<8x512xf32>
      %425 = arith.mulf %424, %423 : vector<8x512xf32>
      %426 = arith.mulf %413, %425 : vector<8x512xf32>
      %427 = arith.truncf %426 : vector<8x512xf32> to vector<8x512xbf16>
      %c0_231 = arith.constant 0 : index
      %c0_232 = arith.constant 0 : index
      %428 = vector.load %arg11[%c0_231, %c0_232] : memref<512x128xbf16, #tpu.memory_space<vmem>>, vector<512x128xbf16>
      %cst_233 = arith.constant dense<0.000000e+00> : vector<8x128xf32>
      %429 = tpu.matmul %427, %428, %cst_233 {dimension_numbers = #tpu.dot_dimension_numbers<[1], [0], [0], [1], [0, 0, 1, 1], [], []>} : vector<8x512xbf16>, vector<512x128xbf16>, vector<8x128xf32> -> vector<8x128xf32>
      %430 = vector.broadcast %65 : vector<1x128xf32> to vector<8x128xf32>
      %431 = arith.addf %429, %430 : vector<8x128xf32>
      %432 = arith.addf %395, %431 : vector<8x128xf32>
      %c0_234 = arith.constant 0 : index
      %433 = arith.index_cast %68 : i32 to index
      %c0_235 = arith.constant 0 : index
      %c0_236 = arith.constant 0 : index
      %434 = vector.load %arg13[%c0_234, %433, %c0_235, %c0_236] : memref<1x8x8x128xf32, #tpu.memory_space<vmem>>, vector<1x1x8x128xf32>
      %435 = vector.shape_cast %434 : vector<1x1x8x128xf32> to vector<8x128xf32>
      %436 = vector.shape_cast %432 : vector<8x128xf32> to vector<1x1x8x128xf32>
      tpu.vector_store %arg13[%c0_234, %433, %c0_235, %c0_236], %436 {strides = array<i32>} : memref<1x8x8x128xf32, #tpu.memory_space<vmem>>, vector<1x1x8x128xf32>,
    }
    %c8_i32_41 = arith.constant 8 : i32
    return
  }
  func.func @transform_0(%arg0: i32) -> (i32, i32, i32, i32) {
    %c0_i32 = arith.constant 0 : i32
    %c0_i32_0 = arith.constant 0 : i32
    %c0_i32_1 = arith.constant 0 : i32
    %c0_i32_2 = arith.constant 0 : i32
    return %arg0, %c0_i32, %c0_i32_0, %c0_i32_1 : i32, i32, i32, i32
  }
  func.func @transform_1(%arg0: i32) -> (i32, i32, i32) {
    %c0_i32 = arith.constant 0 : i32
    %c0_i32_0 = arith.constant 0 : i32
    %c0_i32_1 = arith.constant 0 : i32
    %c0_i32_2 = arith.constant 0 : i32
    return %c0_i32, %c0_i32_0, %c0_i32_1 : i32, i32, i32
  }
  func.func @transform_2(%arg0: i32) -> (i32, i32) {
    %c0_i32 = arith.constant 0 : i32
    %c0_i32_0 = arith.constant 0 : i32
    %c0_i32_1 = arith.constant 0 : i32
    return %c0_i32, %c0_i32_0 : i32, i32
  }
  func.func @transform_3(%arg0: i32) -> (i32, i32) {
    %c0_i32 = arith.constant 0 : i32
    %c0_i32_0 = arith.constant 0 : i32
    %c0_i32_1 = arith.constant 0 : i32
    return %c0_i32, %c0_i32_0 : i32, i32
  }
  func.func @transform_4(%arg0: i32) -> (i32, i32) {
    %c0_i32 = arith.constant 0 : i32
    %c0_i32_0 = arith.constant 0 : i32
    %c0_i32_1 = arith.constant 0 : i32
    return %c0_i32, %c0_i32_0 : i32, i32
  }
  func.func @transform_5(%arg0: i32) -> (i32, i32) {
    %c0_i32 = arith.constant 0 : i32
    %c0_i32_0 = arith.constant 0 : i32
    %c0_i32_1 = arith.constant 0 : i32
    return %c0_i32, %c0_i32_0 : i32, i32
  }
  func.func @transform_6(%arg0: i32) -> (i32, i32) {
    %c0_i32 = arith.constant 0 : i32
    %c0_i32_0 = arith.constant 0 : i32
    %c0_i32_1 = arith.constant 0 : i32
    return %c0_i32, %c0_i32_0 : i32, i32
  }
  func.func @transform_7(%arg0: i32) -> (i32, i32) {
    %c0_i32 = arith.constant 0 : i32
    %c0_i32_0 = arith.constant 0 : i32
    %c0_i32_1 = arith.constant 0 : i32
    return %c0_i32, %c0_i32_0 : i32, i32
  }
  func.func @transform_8(%arg0: i32) -> (i32, i32) {
    %c0_i32 = arith.constant 0 : i32
    %c0_i32_0 = arith.constant 0 : i32
    %c0_i32_1 = arith.constant 0 : i32
    return %c0_i32, %c0_i32_0 : i32, i32
  }
  func.func @transform_9(%arg0: i32) -> (i32, i32) {
    %c0_i32 = arith.constant 0 : i32
    %c0_i32_0 = arith.constant 0 : i32
    %c0_i32_1 = arith.constant 0 : i32
    return %c0_i32, %c0_i32_0 : i32, i32
  }
  func.func @transform_10(%arg0: i32) -> (i32, i32) {
    %c0_i32 = arith.constant 0 : i32
    %c0_i32_0 = arith.constant 0 : i32
    %c0_i32_1 = arith.constant 0 : i32
    return %c0_i32, %c0_i32_0 : i32, i32
  }
  func.func @transform_11(%arg0: i32) -> (i32, i32) {
    %c0_i32 = arith.constant 0 : i32
    %c0_i32_0 = arith.constant 0 : i32
    %c0_i32_1 = arith.constant 0 : i32
    return %c0_i32, %c0_i32_0 : i32, i32
  }
  func.func @transform_12(%arg0: i32) -> (i32, i32, i32, i32) {
    %c0_i32 = arith.constant 0 : i32
    %c0_i32_0 = arith.constant 0 : i32
    %c0_i32_1 = arith.constant 0 : i32
    %c0_i32_2 = arith.constant 0 : i32
    return %arg0, %c0_i32, %c0_i32_0, %c0_i32_1 : i32, i32, i32, i32
  }
}

</mosaic_0001>

<bundles_post_ra>
// kernel: conv_block_forward.1
= control target key start
LH: loop header
LB: loop body
LE: loop exit
PB: predicated region body
PF: predicated region fallthrough
CT: control target
= control target key end

     0   :  { %s17912_s0 = inlined_call_operand.vmem [shape: f32[2,8,8,128], index: 0, kind: input, shape index: {}]   ;;  %s17913_s1 = inlined_call_operand.hbm [shape: bf16[49,128,128], index: 1, kind: input, shape index: {}]   ;;  %s17914_s2 = inlined_call_operand.hbm [shape: f32[1,128], index: 2, kind: input, shape index: {}]   ;;  %s17915_s3 = inlined_call_operand.hbm [shape: f32[1,128], index: 3, kind: input, shape index: {}]   ;;  %s17916_s4 = inlined_call_operand.hbm [shape: f32[1,128], index: 4, kind: input, shape index: {}]   ;;  %s17917_s5 = inlined_call_operand.hbm [shape: f32[1,128], index: 5, kind: input, shape index: {}]   ;;  %s17918_s6 = inlined_call_operand.hbm [shape: f32[1,128], index: 6, kind: input, shape index: {}]   ;;  %s17919_s7 = inlined_call_operand.hbm [shape: f32[128,128], index: 7, kind: input, shape index: {}]   ;;  %s17920_s8 = inlined_call_operand.hbm [shape: bf16[128,512], index: 8, kind: input, shape index: {}]   ;;  %s17921_s9 = inlined_call_operand.hbm [shape: f32[1,512], index: 9, kind: input, shape index: {}]   ;;  %s17922_s10 = inlined_call_operand.hbm [shape: bf16[512,128], index: 10, kind: input, shape index: {}]   ;;  %s17923_s11 = inlined_call_operand.hbm [shape: f32[1,128], index: 11, kind: input, shape index: {}]   ;;  %s17924_s12 = inlined_call_operand.vmem [shape: f32[2,8,8,128], index: 12, kind: output, shape index: {}]  }
   0x1   :  { %17973 = sst [smem:[#allocation50_spill]] %s17914_s2 }
   0x2   :  { %17974 = sst [smem:[#allocation51_spill]] %s17916_s4 }
   0x3   :  { %17975 = sst [smem:[#allocation52_spill]] %s17918_s6 }
   0x4   :  { %17 = vsyncpa [#allocation4], 0 }
   0x5   :  { %18 = vsyncpa [#allocation6], 0 }
   0x6   :  { %19 = vsyncpa [#allocation9], 0 }
   0x7   :  { %20 = vsyncpa [#allocation12], 0 }
   0x8   :  { %21 = vsyncpa [#allocation15], 0 }
   0x9   :  { %22 = vsyncpa [#allocation18], 0  ;;  %s15651_s21 = smov 0  }
   0xa LB: > { %s15564_s22 = smov [#allocation5]   ;;  %s15657_s24 = sadd.s32 4294967295, %s15558_s21   ;;  %s15558_s21 = sphi %s15651_s21, %s28_s21  }
   0xb   : > { %s342_s23 = sshll.u32 %s15564_s22, 4  ;;  %p10188_p0 = scmp.ge.s32.totalorder %s15558_s21, 1  ;;  %s15662_s23 = int_to_ptr.vmem [resolvable:$true] %s342_s23 }
   0xc   : > { %p316_p1 = scmp.lt.s32.totalorder %s15558_s21, 3  ;;  %p17925_p2 = scmp.eq.s32.totalorder %s15657_s24, 0 }
   0xd   : > { %s15565_s26 = smov [#allocation8]   ;;  %s15566_s28 = smov [#allocation11]  }
   0xe   : > { %p15664_p3 = pnand %p10188_p0, %p316_p1  ;;  %s364_s27 = sshll.u32 %s15565_s26, 4  ;;  %s15670_s27 = int_to_ptr.vmem [resolvable:$true] %s364_s27 }
   0xf   : > { %s386_s29 = sshll.u32 %s15566_s28, 4  ;;  %s15567_s13 = smov [#allocation14]   ;;  %s15678_s29 = int_to_ptr.vmem [resolvable:$true] %s386_s29 }
  0x10   : > { %s17976_s25 = scalar_select %p15664_p3, 1, 0 }
  0x11   : > { %p14623_p4 = pneg %p15664_p3  ;;  %s409_s14 = sshll.u32 %s15567_s13, 4  ;;  %s15680_s14 = int_to_ptr.vmem [resolvable:$true] %s409_s14 }
  0x12   : > { %s17978_s2 = sld [smem:[#allocation50_spill]] }
  0x13   : > { %p15674_p5 = pnand %p17925_p2, %p14623_p4 }
  0x15   : > { %p15690_p7 = pneg %p15674_p5 }
  0x18   : > { %s15216_s17 = scalar_lea.hbm %s17978_s2, 16 }
  0x19   : > { %p15217_p6 = scmp.ne.s32.totalorder %s17978_s2, %s15216_s17  ;;  %p15223_p10 = scmp.lt.u32.totalorder %s15216_s17, %s17978_s2 }
  0x1b   : > { %p15219_p8 = pnand %p15690_p7, %p15217_p6 }
  0x1d   : > { %p15220_p9 = pneg %p15219_p8 }
  0x1f   : > { %p15225_p11 = pnand %p15223_p10, %p15220_p9 }
  0x21   : > { %15228 = shalt.err (!%p15225_p11)
}
  0x22   : > { %s15229_s28 = scalar_lea.vmem %s15662_s23, 16  ;;  %s15236_s13 = scalar_lea.vmem %s15662_s23, 32 }
  0x23   : > { %p15230_p12 = scmp.ne.s32.totalorder %s15662_s23, %s15229_s28  ;;  %p15237_p1 = scmp.lt.s32.totalorder %s15662_s23, %s15662_s23 }
  0x24   : > { %p15238_p4 = scmp.lt.s32.totalorder %s15236_s13, %s15229_s28 }
  0x25   : > { %p15232_p13 = pnand %p15230_p12, %p15690_p7 }
  0x26   : > { %p15239_p6 = por %p15238_p4, %p15237_p1 }
  0x27   : > { %p15233_p0 = pneg %p15232_p13 }
  0x29   : > { %p15240_p8 = pnand %p15239_p6, %p15233_p0 }
  0x2b   : > { %15243 = shalt.err (!%p15240_p8)
}
  0x2c   : > { %14629 = dma.hbm_to_vmem [thread:$0]  (!%p15674_p5), %s17978_s2, 16, %s15662_s23, [#allocation6]  }
  0x2d   : > { %s17980_s4 = sld [smem:[#allocation51_spill]] }
  0x33   : > { %s15244_s19 = scalar_lea.hbm %s17980_s4, 16 }
  0x34   : > { %p15245_p9 = scmp.ne.s32.totalorder %s17980_s4, %s15244_s19  ;;  %p15251_p12 = scmp.lt.u32.totalorder %s15244_s19, %s17980_s4 }
  0x36   : > { %p15247_p10 = pnand %p15245_p9, %p15690_p7 }
  0x38   : > { %p15248_p11 = pneg %p15247_p10 }
  0x3a   : > { %p15253_p13 = pnand %p15251_p12, %p15248_p11 }
  0x3c   : > { %15256 = shalt.err (!%p15253_p13)
}
  0x3d   : > { %s15257_s23 = scalar_lea.vmem %s15670_s27, 16  ;;  %s15264_s15 = scalar_lea.vmem %s15670_s27, 32 }
  0x3e   : > { %p15258_p0 = scmp.ne.s32.totalorder %s15670_s27, %s15257_s23  ;;  %p15265_p6 = scmp.lt.s32.totalorder %s15670_s27, %s15670_s27 }
  0x3f   : > { %p15266_p8 = scmp.lt.s32.totalorder %s15264_s15, %s15257_s23 }
  0x40   : > { %p15260_p1 = pnand %p15258_p0, %p15690_p7 }
  0x41   : > { %p15267_p9 = por %p15266_p8, %p15265_p6 }
  0x42   : > { %p15261_p4 = pneg %p15260_p1 }
  0x44   : > { %p15268_p10 = pnand %p15267_p9, %p15261_p4 }
  0x46   : > { %15271 = shalt.err (!%p15268_p10)
}
  0x47   : > { %14635 = dma.hbm_to_vmem [thread:$0]  (!%p15674_p5), %s17980_s4, 16, %s15670_s27, [#allocation9]  }
  0x48   : > { %s17981_s6 = sld [smem:[#allocation52_spill]] }
  0x4e   : > { %s15272_s22 = scalar_lea.hbm %s17981_s6, 16 }
  0x4f   : > { %p15273_p11 = scmp.ne.s32.totalorder %s17981_s6, %s15272_s22  ;;  %p15279_p0 = scmp.lt.u32.totalorder %s15272_s22, %s17981_s6 }
  0x51   : > { %p15275_p12 = pnand %p15273_p11, %p15690_p7 }
  0x53   : > { %p15276_p13 = pneg %p15275_p12 }
  0x55   : > { %p15281_p1 = pnand %p15279_p0, %p15276_p13 }
  0x57   : > { %15284 = shalt.err (!%p15281_p1)
}
  0x58   : > { %s15285_s27 = scalar_lea.vmem %s15678_s29, 16  ;;  %s15292_s15 = scalar_lea.vmem %s15678_s29, 32 }
  0x59   : > { %p15286_p4 = scmp.ne.s32.totalorder %s15678_s29, %s15285_s27  ;;  %p15293_p9 = scmp.lt.s32.totalorder %s15678_s29, %s15678_s29 }
  0x5a   : > { %p15294_p10 = scmp.lt.s32.totalorder %s15292_s15, %s15285_s27 }
  0x5b   : > { %p15288_p6 = pnand %p15286_p4, %p15690_p7 }
  0x5c   : > { %p15295_p11 = por %p15294_p10, %p15293_p9 }
  0x5d   : > { %p15289_p8 = pneg %p15288_p6 }
  0x5f   : > { %p15296_p12 = pnand %p15295_p11, %p15289_p8 }
  0x61   : > { %15299 = shalt.err (!%p15296_p12)
}
  0x62   : > { %14641 = dma.hbm_to_vmem [thread:$0]  (!%p15674_p5), %s17981_s6, 16, %s15678_s29, [#allocation12]  }
  0x63   : > { %s15300_s22 = scalar_lea.hbm %s17920_s8, 4096 }
  0x64   : > { %p15301_p13 = scmp.ne.s32.totalorder %s17920_s8, %s15300_s22  ;;  %p15307_p4 = scmp.lt.u32.totalorder %s15300_s22, %s17920_s8 }
  0x66   : > { %p15303_p0 = pnand %p15301_p13, %p15690_p7 }
  0x68   : > { %p15304_p1 = pneg %p15303_p0 }
  0x6a   : > { %p15309_p6 = pnand %p15307_p4, %p15304_p1 }
  0x6c   : > { %15312 = shalt.err (!%p15309_p6)
}
  0x6d   : > { %s15313_s29 = scalar_lea.vmem %s15680_s14, 4096  ;;  %p15321_p11 = scmp.lt.s32.totalorder %s15680_s14, %s15680_s14 }
  0x6e   : > { %p15314_p8 = scmp.ne.s32.totalorder %s15680_s14, %s15313_s29  ;;  %p15322_p12 = scmp.lt.s32.totalorder %s15313_s29, %s15313_s29 }
  0x70   : > { %p15316_p9 = pnand %p15314_p8, %p15690_p7  ;;  %p15323_p13 = por %p15322_p12, %p15321_p11 }
  0x72   : > { %p15317_p10 = pneg %p15316_p9 }
  0x74   : > { %p15324_p0 = pnand %p15323_p13, %p15317_p10 }
  0x76   : > { %15327 = shalt.err (!%p15324_p0)
}
  0x77   : > { %s15568_s27 = smov 256   ;;  %s15569_s15 = smov 16  }
  0x78   : > { %14647 = dma.hbm_to_vmem [thread:$0]  (!%p15674_p5), %s17920_s8, 4096, %s15680_s14, [#allocation15], %s15568_s27, %s15568_s27, %s15569_s15  }
  0x79   : > { %s15570_s18 = smov [#allocation17]   ;;  %s15571_s22 = smov [#allocation3]  }
  0x7a   : > { %s433_s19 = sshll.u32 %s15570_s18, 4  ;;  %s328_s26 = sshll.u32 %s15571_s22, 4  ;;  %s434_s19 = int_to_ptr.vmem [resolvable:$true] %s433_s19  ;;  %s329_s26 = int_to_ptr.vmem [resolvable:$true] %s328_s26 }
  0x7b   : > { %s15328_s23 = scalar_lea.hbm %s17922_s10, 4096 }
  0x7c   : > { %p15329_p1 = scmp.ne.s32.totalorder %s17922_s10, %s15328_s23  ;;  %p15335_p8 = scmp.lt.u32.totalorder %s15328_s23, %s17922_s10 }
  0x7e   : > { %p15331_p4 = pnand %p15329_p1, %p15690_p7 }
  0x80   : > { %p15332_p6 = pneg %p15331_p4 }
  0x82   : > { %p15337_p9 = pnand %p15335_p8, %p15332_p6 }
  0x84   : > { %15340 = shalt.err (!%p15337_p9)
}
  0x85   : > { %s15341_s14 = scalar_lea.vmem %s434_s19, 4096  ;;  %p15349_p13 = scmp.lt.s32.totalorder %s434_s19, %s434_s19 }
  0x86   : > { %p15342_p10 = scmp.ne.s32.totalorder %s434_s19, %s15341_s14  ;;  %p15350_p0 = scmp.lt.s32.totalorder %s15341_s14, %s15341_s14 }
  0x88   : > { %p15344_p11 = pnand %p15342_p10, %p15690_p7  ;;  %p15351_p2 = por %p15350_p0, %p15349_p13 }
  0x8a   : > { %p15345_p12 = pneg %p15344_p11 }
  0x8c   : > { %p15352_p3 = pnand %p15351_p2, %p15345_p12 }
  0x8e   : > { %15355 = shalt.err (!%p15352_p3)
}
  0x8f   : > { %s15572_s2 = smov 64   ;;  %s15573_s27 = smov 4  }
  0x90   : > { %14653 = dma.hbm_to_vmem [thread:$0]  (!%p15674_p5), %s17922_s10, 4096, %s434_s19, [#allocation18], %s15572_s2, %s15572_s2, %s15573_s27  }
  0x91   : > { %s15356_s17 = scalar_lea.hbm %s17913_s1, 50176 }
  0x92   : > { %p15357_p1 = scmp.ne.s32.totalorder %s17913_s1, %s15356_s17  ;;  %p15363_p4 = scmp.lt.u32.totalorder %s15356_s17, %s17913_s1 }
  0x94   : > { %p15359_p2 = pnand %p15357_p1, %p15690_p7 }
  0x96   : > { %p15360_p3 = pneg %p15359_p2 }
  0x98   : > { %p15365_p6 = pnand %p15363_p4, %p15360_p3 }
  0x9a   : > { %15368 = shalt.err (!%p15365_p6)
}
  0x9b   : > { %s15369_s23 = scalar_lea.vmem %s329_s26, 50176  ;;  %p15377_p11 = scmp.lt.s32.totalorder %s329_s26, %s329_s26 }
  0x9c   : > { %p15370_p8 = scmp.ne.s32.totalorder %s329_s26, %s15369_s23  ;;  %p15378_p12 = scmp.lt.s32.totalorder %s15369_s23, %s15369_s23 }
  0x9e   : > { %p15372_p9 = pnand %p15370_p8, %p15690_p7  ;;  %p15379_p13 = por %p15378_p12, %p15377_p11 }
  0xa0   : > { %p15373_p10 = pneg %p15372_p9 }
  0xa2   : > { %p15380_p0 = pnand %p15379_p13, %p15373_p10 }
  0xa4   : > { %15383 = shalt.err (!%p15380_p0)
}
  0xa5   : > { %14626 = dma.hbm_to_vmem [thread:$0]  (!%p15674_p5), %s17913_s1, 50176, %s329_s26, [#allocation4], %s15572_s2, %s15572_s2, %s15573_s27  }
  0xa6   : > { %s15574_s14 = smov [#allocation7]   ;;  %s15575_s6 = smov [#allocation10]  }
  0xa7   : > { %s353_s4 = sshll.u32 %s15574_s14, 4  ;;  %s375_s15 = sshll.u32 %s15575_s6, 4  ;;  %s354_s4 = int_to_ptr.vmem [resolvable:$true] %s353_s4  ;;  %s376_s15 = int_to_ptr.vmem [resolvable:$true] %s375_s15 }
  0xa8   : > { %s15384_s18 = scalar_lea.hbm %s17915_s3, 16 }
  0xa9   : > { %p15385_p1 = scmp.ne.s32.totalorder %s17915_s3, %s15384_s18  ;;  %p15391_p4 = scmp.lt.u32.totalorder %s15384_s18, %s17915_s3 }
  0xab   : > { %p15387_p2 = pnand %p15385_p1, %p15690_p7 }
  0xad   : > { %p15388_p3 = pneg %p15387_p2 }
  0xaf   : > { %p15393_p6 = pnand %p15391_p4, %p15388_p3 }
  0xb1   : > { %15396 = shalt.err (!%p15393_p6)
}
  0xb2   : > { %s15397_s26 = scalar_lea.vmem %s354_s4, 16  ;;  %s15404_s2 = scalar_lea.vmem %s354_s4, 32 }
  0xb3   : > { %p15398_p8 = scmp.ne.s32.totalorder %s354_s4, %s15397_s26  ;;  %p15405_p11 = scmp.lt.s32.totalorder %s354_s4, %s354_s4 }
  0xb4   : > { %p15406_p12 = scmp.lt.s32.totalorder %s15404_s2, %s15397_s26 }
  0xb5   : > { %p15400_p9 = pnand %p15398_p8, %p15690_p7 }
  0xb6   : > { %p15407_p13 = por %p15406_p12, %p15405_p11 }
  0xb7   : > { %p15401_p10 = pneg %p15400_p9 }
  0xb9   : > { %p15408_p0 = pnand %p15407_p13, %p15401_p10 }
  0xbb   : > { %15411 = shalt.err (!%p15408_p0)
}
  0xbc   : > { %14632 = dma.hbm_to_vmem [thread:$0]  (!%p15674_p5), %s17915_s3, 16, %s354_s4, [#allocation6]  }
  0xbd   : > { %s15412_s6 = scalar_lea.hbm %s17917_s5, 16 }
  0xbe   : > { %p15413_p1 = scmp.ne.s32.totalorder %s17917_s5, %s15412_s6  ;;  %p15419_p4 = scmp.lt.u32.totalorder %s15412_s6, %s17917_s5 }
  0xc0   : > { %p15415_p2 = pnand %p15413_p1, %p15690_p7 }
  0xc2   : > { %p15416_p3 = pneg %p15415_p2 }
  0xc4   : > { %p15421_p6 = pnand %p15419_p4, %p15416_p3 }
  0xc6   : > { %15424 = shalt.err (!%p15421_p6)
}
  0xc7   : > { %s15425_s28 = scalar_lea.vmem %s376_s15, 16  ;;  %s15432_s4 = scalar_lea.vmem %s376_s15, 32 }
  0xc8   : > { %p15426_p8 = scmp.ne.s32.totalorder %s376_s15, %s15425_s28  ;;  %p15433_p11 = scmp.lt.s32.totalorder %s376_s15, %s376_s15 }
  0xc9   : > { %p15434_p12 = scmp.lt.s32.totalorder %s15432_s4, %s15425_s28 }
  0xca   : > { %p15428_p9 = pnand %p15426_p8, %p15690_p7 }
  0xcb   : > { %p15435_p13 = por %p15434_p12, %p15433_p11 }
  0xcc   : > { %p15429_p10 = pneg %p15428_p9 }
  0xce   : > { %p15436_p0 = pnand %p15435_p13, %p15429_p10 }
  0xd0   : > { %15439 = shalt.err (!%p15436_p0)
}
  0xd1   : > { %14638 = dma.hbm_to_vmem [thread:$0]  (!%p15674_p5), %s17917_s5, 16, %s376_s15, [#allocation9]  }
  0xd2   : > { %s15576_s26 = smov [#allocation13]   ;;  %s15440_s29 = scalar_lea.hbm %s17919_s7, 2048 }
  0xd3   : > { %s396_s2 = sshll.u32 %s15576_s26, 4  ;;  %p15441_p1 = scmp.ne.s32.totalorder %s17919_s7, %s15440_s29  ;;  %s397_s2 = int_to_ptr.vmem [resolvable:$true] %s396_s2 }
  0xd4   : > { %p15447_p4 = scmp.lt.u32.totalorder %s15440_s29, %s17919_s7 }
  0xd5   : > { %p15443_p2 = pnand %p15441_p1, %p15690_p7 }
  0xd7   : > { %p15444_p3 = pneg %p15443_p2 }
  0xd9   : > { %p15449_p6 = pnand %p15447_p4, %p15444_p3 }
  0xdb   : > { %15452 = shalt.err (!%p15449_p6)
}
  0xdc   : > { %s15453_s15 = scalar_lea.vmem %s397_s2, 2048  ;;  %p15461_p11 = scmp.lt.s32.totalorder %s397_s2, %s397_s2 }
  0xdd   : > { %p15454_p8 = scmp.ne.s32.totalorder %s397_s2, %s15453_s15  ;;  %p15462_p12 = scmp.lt.s32.totalorder %s15453_s15, %s15453_s15 }
  0xdf   : > { %p15456_p9 = pnand %p15454_p8, %p15690_p7  ;;  %p15463_p13 = por %p15462_p12, %p15461_p11 }
  0xe1   : > { %p15457_p10 = pneg %p15456_p9 }
  0xe3   : > { %p15464_p0 = pnand %p15463_p13, %p15457_p10 }
  0xe5   : > { %15467 = shalt.err (!%p15464_p0)
}
  0xe6   : > { %s15577_s18 = smov 128   ;;  %s15578_s22 = smov 8  }
  0xe7   : > { %14644 = dma.hbm_to_vmem [thread:$0]  (!%p15674_p5), %s17919_s7, 2048, %s397_s2, [#allocation12], %s15577_s18, %s15577_s18, %s15578_s22  }
  0xe8   : > { %s15579_s13 = smov [#allocation16]   ;;  %s15580_s26 = smov [#allocation19]  }
  0xe9   : > { %s423_s23 = sshll.u32 %s15579_s13, 4  ;;  %s447_s27 = sshll.u32 %s15580_s26, 4  ;;  %s424_s23 = int_to_ptr.vmem [resolvable:$true] %s423_s23  ;;  %s15873_s27 = int_to_ptr.vmem [resolvable:$true] %s447_s27 }
  0xea   : > { %s15468_s14 = scalar_lea.hbm %s17921_s9, 64 }
  0xeb   : > { %p15469_p1 = scmp.ne.s32.totalorder %s17921_s9, %s15468_s14  ;;  %p15475_p4 = scmp.lt.u32.totalorder %s15468_s14, %s17921_s9 }
  0xed   : > { %p15471_p2 = pnand %p15469_p1, %p15690_p7 }
  0xef   : > { %p15472_p3 = pneg %p15471_p2 }
  0xf1   : > { %p15477_p6 = pnand %p15475_p4, %p15472_p3 }
  0xf3   : > { %15480 = shalt.err (!%p15477_p6)
}
  0xf4   : > { %s15481_s15 = scalar_lea.vmem %s424_s23, 64  ;;  %p15489_p11 = scmp.lt.s32.totalorder %s424_s23, %s424_s23 }
  0xf5   : > { %p15482_p8 = scmp.ne.s32.totalorder %s424_s23, %s15481_s15  ;;  %p15490_p12 = scmp.lt.s32.totalorder %s15481_s15, %s15481_s15 }
  0xf7   : > { %p15484_p9 = pnand %p15482_p8, %p15690_p7  ;;  %p15491_p13 = por %p15490_p12, %p15489_p11 }
  0xf9   : > { %p15485_p10 = pneg %p15484_p9 }
  0xfb   : > { %p15492_p0 = pnand %p15491_p13, %p15485_p10 }
  0xfd   : > { %15495 = shalt.err (!%p15492_p0)
}
  0xfe   : > { %14650 = dma.hbm_to_vmem [thread:$0]  (!%p15674_p5), %s17921_s9, 64, %s424_s23, [#allocation15]  }
  0xff   : > { %s15496_s13 = scalar_lea.hbm %s17923_s11, 16 }
 0x100   : > { %p15497_p1 = scmp.ne.s32.totalorder %s17923_s11, %s15496_s13  ;;  %p15503_p4 = scmp.lt.u32.totalorder %s15496_s13, %s17923_s11 }
 0x102   : > { %p15499_p2 = pnand %p15497_p1, %p15690_p7 }
 0x104   : > { %p15500_p3 = pneg %p15499_p2 }
 0x106   : > { %p15505_p6 = pnand %p15503_p4, %p15500_p3 }
 0x108   : > { %15508 = shalt.err (!%p15505_p6)
}
 0x109   : > { %s15509_s23 = scalar_lea.vmem %s15873_s27, 16  ;;  %s15516_s6 = scalar_lea.vmem %s15873_s27, 32 }
 0x10a   : > { %p15510_p8 = scmp.ne.s32.totalorder %s15873_s27, %s15509_s23  ;;  %p15517_p11 = scmp.lt.s32.totalorder %s15873_s27, %s15873_s27 }
 0x10b   : > { %p15518_p12 = scmp.lt.s32.totalorder %s15516_s6, %s15509_s23 }
 0x10c   : > { %p15512_p9 = pnand %p15510_p8, %p15690_p7 }
 0x10d   : > { %p15519_p13 = por %p15518_p12, %p15517_p11 }
 0x10e   : > { %p15513_p10 = pneg %p15512_p9 }
 0x110   : > { %p15520_p0 = pnand %p15519_p13, %p15513_p10 }
 0x112   : > { %15523 = shalt.err (!%p15520_p0)
}
 0x113   : > { %14656 = dma.hbm_to_vmem [thread:$0]  (!%p15674_p5), %s17923_s11, 16, %s15873_s27, [#allocation18]  }
 0x114   : > { %p17982_p1 = scmp.ne.s32.totalorder %s17976_s25, 0 }
 0x116   : > { %468 = sbr.rel (%p17982_p1) target bundleno = 3694 (0xe6e), region = 68 }
 0x11d   : > { %p17983_p7 = scmp.eq.s32.totalorder %s15657_s24, 0 }
 0x11f   : > { %15533 = dma.done.wait (%p17983_p7), [#allocation4], 50176   ;;  %p17984_p2 = pmov %p17983_p7 }
 0x121   : > { %15535 = vsyncadd (%p17984_p2), [#allocation4], 4294917120  ;;  %p17985_p3 = pmov %p17984_p2 }
 0x122   : > { %p17986_p4 = pmov %p17984_p2 }
 0x123   : > { %15537 = dma.done.wait (%p17985_p3), [#allocation6], 32  }
 0x124   : > { %15539 = vsyncadd (%p17986_p4), [#allocation6], 4294967264  ;;  %p17987_p6 = pmov %p17984_p2 }
 0x125   : > { %p17988_p5 = pmov %p17984_p2 }
 0x126   : > { %15541 = dma.done.wait (%p17987_p6), [#allocation9], 32  }
 0x127   : > { %15543 = vsyncadd (%p17988_p5), [#allocation9], 4294967264  ;;  %p17989_p8 = pmov %p17984_p2 }
 0x128   : > { %p17990_p9 = pmov %p17984_p2 }
 0x129   : > { %15545 = dma.done.wait (%p17989_p8), [#allocation12], 2064  }
 0x12a   : > { %15547 = vsyncadd (%p17990_p9), [#allocation12], 4294965232  ;;  %p17991_p10 = pmov %p17984_p2 }
 0x12b   : > { %p17992_p11 = pmov %p17984_p2 }
 0x12c   : > { %15549 = dma.done.wait (%p17991_p10), [#allocation15], 4160  }
 0x12d   : > { %15551 = vsyncadd (%p17992_p11), [#allocation15], 4294963136  ;;  %p17993_p12 = pmov %p17984_p2 }
 0x12e   : > { %p17994_p13 = pmov %p17984_p2 }
 0x12f   : > { %15553 = dma.done.wait (%p17993_p12), [#allocation18], 4112  }
 0x130   : > { %15555 = vsyncadd (%p17994_p13), [#allocation18], 4294963184  ;;  %p550_p0 = scmp.lt.s32.totalorder %s15657_s24, 1  ;;  %v15950_v0 = vld [vmem:[#allocation5] ss:$0 sm:$0xff]  ;;  %v597_v5 = vld [vmem:[#allocation13] sm:$0xff] }
 0x131   : > { %17995 = vst [vmem:[#allocation26_spill] sm:$0xff] %v15950_v0  ;;  %v15952_v1 = vld [vmem:[#allocation10] ss:$0 sm:$0xff]  ;;  %v15954_v2 = vld [vmem:[#allocation11] ss:$0 sm:$0xff]  ;;  %v598_v6 = vld [vmem:[#allocation13 + $0x8] sm:$0xff] }
 0x132   : > { %s18078_s24 = smov (!%p550_p0, %s15657_s24), 1  ;;  %17996 = vst [vmem:[#allocation27_spill] sm:$0xff] %v15952_v1  ;;  %17997 = vst [vmem:[#allocation28_spill] sm:$0xff] %v15954_v2  ;;  %v15956_v3 = vld [vmem:[#allocation16] sm:$0xf]  ;;  %v616_v7 = vand.u32 4294901760, %v597_v5 }
 0x133   : > { %s10701_s25 = sshll.u32 %s18078_s24, 6  ;;  %17998 = vst [vmem:[#allocation29_spill] sm:$0xff] %v15956_v3  ;;  %v15958_v4 = vld [vmem:[#allocation19] ss:$0 sm:$0xff]  ;;  %v599_v8 = vld [vmem:[#allocation13 + $0x10] sm:$0xff]  ;;  %v600_v9 = vld [vmem:[#allocation13 + $0x18] sm:$0xff] }
 0x134   : > { %s15948_s27 = scalar_lea.vmem %s17924_s12, %s10701_s25  ;;  %17999 = vst [vmem:[#allocation30_spill] sm:$0xff] %v15958_v4  ;;  %v619_v10 = vand.u32 4294901760, %v598_v6  ;;  %v622_v11 = vand.u32 4294901760, %v599_v8  ;;  %v625_v12 = vand.u32 4294901760, %v600_v9  ;;  %v601_v13 = vld [vmem:[#allocation13 + $0x20] sm:$0xff]  ;;  %v602_v14 = vld [vmem:[#allocation13 + $0x28] sm:$0xff]  ;;  %s15963_s15 = scalar_lea.vmem %s17912_s0, %s10701_s25  ;;  %v15997_v29 = vsub.f32 %v597_v5, %v616_v7 }
 0x135   : > { %v628_v17 = vand.u32 4294901760, %v601_v13  ;;  %v631_v18 = vand.u32 4294901760, %v602_v14  ;;  %v15969_v19 = vld [vmem:[#allocation13 + $0x30] sm:$0xff]  ;;  %v15971_v20 = vld [vmem:[#allocation13 + $0x38] sm:$0xff]  ;;  %v15989_v26 = vld [vmem:[#allocation13 + $0x40] sm:$0xff]  ;;  %s16720_s18 = smov 0  }
 0x136   : > { %v15965_v15 = vpack.c.bf16 %v619_v10, %v616_v7  ;;  %v15967_v16 = vpack.c.bf16 %v625_v12, %v622_v11  ;;  %v15975_v21 = vld [vmem:[%s15963_s15] sm:$0xff]  ;;  %v634_v24 = vand.u32 4294901760, %v15969_v19  ;;  %v637_v25 = vand.u32 4294901760, %v15971_v20  ;;  %v15991_v27 = vld [vmem:[#allocation13 + $0x48] sm:$0xff]  ;;  %v16004_v32 = vld [vmem:[%s15963_s15 + $0x8] sm:$0xff] }
 0x137   : > { %18000 = vst [vmem:[#allocation31_spill] sm:$0xff] %v15975_v21  ;;  %v15980_v22 = vand.u32 4294901760, %v15975_v21  ;;  %v15984_v23 = vpack.c.bf16 %v631_v18, %v628_v17  ;;  %v15999_v30 = vsub.f32 %v598_v6, %v619_v10  ;;  %18002 = vst [vmem:[#allocation33_spill] sm:$0xff] %v16004_v32  ;;  %v16006_v33 = vsub.f32 %v599_v8, %v622_v11  ;;  %v16019_v38 = vld [vmem:[#allocation13 + $0x50] sm:$0xff]  ;;  %v16021_v39 = vld [vmem:[#allocation13 + $0x58] sm:$0xff] }
 0x138   : > { %13609 = vmatprep.subr.bf16.mxu0 %v15965_v15  ;;  %13801 = vmatprep.subr.bf16.mxu1 %v15965_v15  ;;  %v16008_v34 = vsub.f32 %v600_v9, %v625_v12  ;;  %v16014_v35 = vpack.c.bf16 %v637_v25, %v634_v24  ;;  %v640_v36 = vand.u32 4294901760, %v15989_v26  ;;  %v17936_v37 = vand.u32 4294901760, %v15991_v27  ;;  %v16037_v48 = vld [vmem:[%s15963_s15 + $0x10] sm:$0xff]  ;;  %v16056_v55 = vld [vmem:[#allocation13 + $0x70] sm:$0xff]  ;;  %v16058_v56 = vld [vmem:[#allocation13 + $0x78] sm:$0xff] }
 0x139   : > { %13611 = vmatpush3.bf16.msra.mxu0 %v15965_v15  ;;  %13803 = vmatpush3.bf16.msra.mxu1 %v15965_v15  ;;  %18001 = vst [vmem:[#allocation32_spill] sm:$0xff] %v15984_v23  ;;  %v15995_v28 = vsub.f32 %v15975_v21, %v15980_v22  ;;  %v17932_v41 = vand.u32 4294901760, %v15997_v29  ;;  %v17931_v42 = vand.u32 4294901760, %v15999_v30  ;;  %v16029_v43 = vand.u32 4294901760, %v16004_v32  ;;  %18004 = vst [vmem:[#allocation35_spill] sm:$0xff] %v16037_v48  ;;  %v16052_v53 = vld [vmem:[#allocation13 + $0x60] sm:$0xff] }
 0x13a   : > { %13613 = vmatprep.subr.bf16.mxu0 %v15967_v16  ;;  %13805 = vmatprep.subr.bf16.mxu1 %v15967_v16  ;;  %18003 = vst [vmem:[#allocation34_spill] sm:$0xff] %v16014_v35  ;;  %v17930_v45 = vand.u32 4294901760, %v16006_v33  ;;  %v17928_v46 = vand.u32 4294901760, %v16008_v34  ;;  %v16034_v47 = vsub.f32 %v601_v13, %v628_v17  ;;  %v16045_v49 = vpack.c.bf16 %v17936_v37, %v640_v36  ;;  %v16054_v54 = vld [vmem:[#allocation13 + $0x68] sm:$0xff]  ;;  %v16096_v10 = vld [vmem:[%s15963_s15 + $0x20] sm:$0xff] }
 0x13b   : > { %v17927_v31 = vand.u32 4294901760, %v15995_v28  ;;  %v17935_v50 = vand.u32 4294901760, %v16019_v38  ;;  %v17934_v51 = vand.u32 4294901760, %v16021_v39  ;;  %v16049_v52 = vsub.f32 %v602_v14, %v631_v18  ;;  %v16074_v61 = vld [vmem:[%s15963_s15 + $0x18] sm:$0xff]  ;;  %18008 = vst [vmem:[#allocation39_spill] sm:$0xff] %v16096_v10 }
 0x13c   : > { %18005 = vst [vmem:[#allocation36_spill] sm:$0xff] %v16045_v49  ;;  %v780_v57 = vsub.f32 %v15997_v29, %v17932_v41  ;;  %v787_v58 = vsub.f32 %v15999_v30, %v17931_v42  ;;  %v16068_v59 = vsub.f32 %v16004_v32, %v16029_v43  ;;  %v16071_v60 = vand.u32 4294901760, %v16037_v48  ;;  %18006 = vst [vmem:[#allocation37_spill] sm:$0xff] %v16074_v61  ;;  %v16138_v42 = vld [vmem:[%s15963_s15 + $0x30] sm:$0xff] }
 0x13d   : > { %13615 = vmatpush3.bf16.msra.mxu0 %v15967_v16  ;;  %13807 = vmatpush3.bf16.msra.mxu1 %v15967_v16  ;;  %v699_v40 = vsub.f32 %v15995_v28, %v17927_v31  ;;  %v794_v62 = vsub.f32 %v16006_v33, %v17930_v45  ;;  %v801_v63 = vsub.f32 %v16008_v34, %v17928_v46  ;;  %v17929_v5 = vand.u32 4294901760, %v16034_v47 }
 0x13e   : > { %13617 = vmatprep.subr.bf16.mxu0 %v15984_v23  ;;  %13809 = vmatprep.subr.bf16.mxu1 %v15984_v23  ;;  %v16090_v6 = vpack.c.bf16 %v17934_v51, %v17935_v50  ;;  %v652_v7 = vand.u32 4294901760, %v16052_v53  ;;  %v655_v8 = vand.u32 4294901760, %v16054_v54  ;;  %v17933_v9 = vand.u32 4294901760, %v16049_v52  ;;  %18012 = vst [vmem:[#allocation43_spill] sm:$0xff] %v16138_v42 }
 0x13f   : > { %v700_v44 = vand.u32 4294901760, %v699_v40  ;;  %v658_v11 = vand.u32 4294901760, %v16056_v55  ;;  %v661_v12 = vand.u32 4294901760, %v16058_v56  ;;  %v16102_v13 = vsub.f32 %v15969_v19, %v634_v24 }
 0x140   : > { %18007 = vst [vmem:[#allocation38_spill] sm:$0xff] %v16090_v6  ;;  %v16105_v14 = vand.u32 4294901760, %v16074_v61  ;;  %v781_v17 = vand.u32 4294901760, %v780_v57  ;;  %v788_v18 = vand.u32 4294901760, %v787_v58  ;;  %v17937_v40 = vand.u32 4294901760, %v16068_v59 }
 0x141   : > { %13619 = vmatpush3.bf16.msra.mxu0 %v15984_v23  ;;  %13811 = vmatpush3.bf16.msra.mxu1 %v15984_v23  ;;  %v795_v31 = vand.u32 4294901760, %v794_v62  ;;  %v802_v46 = vand.u32 4294901760, %v801_v63  ;;  %v808_v19 = vsub.f32 %v16034_v47, %v17929_v5  ;;  %v16117_v24 = vand.u32 4294901760, %v16096_v10  ;;  %v16131_v63 = vld [vmem:[%s15963_s15 + $0x28] sm:$0xff] }
 0x142   : > { %13621 = vmatprep.subr.bf16.mxu0 %v16014_v35  ;;  %13813 = vmatprep.subr.bf16.mxu1 %v16014_v35  ;;  %v16121_v57 = vpack.c.bf16 %v655_v8, %v652_v7  ;;  %v815_v58 = vsub.f32 %v16049_v52, %v17933_v9  ;;  %v16128_v62 = vsub.f32 %v16074_v61, %v16105_v14  ;;  %v18020_v1 = vand.u32 4294901760, %v16021_v39 }
 0x143   : > { %11712 = vmatprep.mubr.f32.mxu0 %v700_v44  ;;  %v16110_v44 = vsub.f32 %v16037_v48, %v16071_v60  ;;  %18010 = vst [vmem:[#allocation41_spill] sm:$0xff] %v16131_v63  ;;  %v16134_v5 = vpack.c.bf16 %v661_v12, %v658_v11  ;;  %v16140_v41 = vpack.c.bf16 %v788_v18, %v781_v17  ;;  %v809_v45 = vand.u32 4294901760, %v808_v19  ;;  %v16173_v19 = vld [vmem:[%s15963_s15 + $0x38] sm:$0xff] }
 0x144   : > { %18009 = vst [vmem:[#allocation40_spill] sm:$0xff] %v16121_v57  ;;  %v709_v9 = vsub.f32 %v16068_v59, %v17937_v40  ;;  %v16148_v51 = vsub.f32 %v15971_v20, %v637_v25  ;;  %v16152_v37 = vpack.c.bf16 %v802_v46, %v795_v31  ;;  %v16156_v17 = vsub.f32 %v16096_v10, %v16117_v24 }
 0x145   : > { %13623 = vmatpush3.bf16.msra.mxu0 %v16014_v35  ;;  %13815 = vmatpush3.bf16.msra.mxu1 %v16014_v35  ;;  %18011 = vst [vmem:[#allocation42_spill] sm:$0xff] %v16134_v5  ;;  %18013 = vst [vmem:[#allocation44_spill] sm:$0xff] %v16140_v41  ;;  %v16159_v18 = vand.u32 4294901760, %v16131_v63  ;;  %v816_v20 = vand.u32 4294901760, %v815_v58  ;;  %v16166_v25 = vsub.f32 %v15989_v26, %v640_v36  ;;  %v16170_v46 = vand.u32 4294901760, %v16138_v42 }
 0x146   : > { %13625 = vmatprep.subr.bf16.mxu0 %v16045_v49  ;;  %13817 = vmatprep.subr.bf16.mxu1 %v16045_v49  ;;  %18014 = vst [vmem:[#allocation45_spill] sm:$0xff] %v16173_v19  ;;  %v18015_v40 = vand.u32 4294901760, %v16102_v13  ;;  %v18016_v58 = vand.u32 4294901760, %v15991_v27  ;;  %v18017_v26 = vand.u32 4294901760, %v16019_v38  ;;  %v828_v3 = vand.u32 4294901760, %v16148_v51 }
 0x147   : > { %v16193_v31 = vsub.f32 %v16131_v63, %v16159_v18  ;;  %v18019_v2 = vand.u32 4294901760, %v16110_v44  ;;  %v16214_v0 = vsub.f32 %v16054_v54, %v655_v8  ;;  %v16231_v54 = vpack.c.bf16 %v816_v20, %v809_v45 }
 0x148   : > { %v16179_v50 = vsub.f32 %v16102_v13, %v18015_v40  ;;  %v16184_v4 = vsub.f32 %v15991_v27, %v18016_v58  ;;  %v16189_v36 = vsub.f32 %v16019_v38, %v18017_v26  ;;  %v16202_v27 = vsub.f32 %v16021_v39, %v18020_v1 }
 0x149   : > { %13627 = vmatpush3.bf16.msra.mxu0 %v16045_v49  ;;  %13819 = vmatpush3.bf16.msra.mxu1 %v16045_v49  ;;  %18018 = vst [vmem:[#allocation46_spill] sm:$0xff] %v16193_v31  ;;  %v719_v40 = vsub.f32 %v16110_v44, %v18019_v2  ;;  %v16206_v58 = vsub.f32 %v16138_v42, %v16170_v46  ;;  %v16217_v2 = vand.u32 4294901760, %v16173_v19  ;;  %v710_v1 = vand.u32 4294901760, %v709_v9 }
 0x14a   : > { %13629 = vmatprep.subr.bf16.mxu0 %v16090_v6  ;;  %13821 = vmatprep.subr.bf16.mxu1 %v16090_v6  ;;  %v16211_v26 = vsub.f32 %v16052_v53, %v652_v7  ;;  %v18022_v39 = vand.u32 4294901760, %v16128_v62  ;;  %v16225_v38 = vsub.f32 %v16056_v55, %v658_v11  ;;  %v16228_v53 = vsub.f32 %v16058_v56, %v661_v12 }
 0x14b   : > { %18021 = vst [vmem:[#allocation47_spill] sm:$0xff] %v16206_v58  ;;  %v16237_v9 = vsub.f32 %v16173_v19, %v16217_v2  ;;  %v835_v55 = vand.u32 4294901760, %v16166_v25  ;;  %v842_v11 = vand.u32 4294901760, %v16184_v4  ;;  %v849_v56 = vand.u32 4294901760, %v16189_v36 }
 0x14c   : > { %v729_v42 = vsub.f32 %v16128_v62, %v18022_v39  ;;  %v829_v39 = vsub.f32 %v16148_v51, %v828_v3  ;;  %v720_v45 = vand.u32 4294901760, %v719_v40  ;;  %v856_v12 = vand.u32 4294901760, %v16202_v27 }
 0x14d   : > { %13631 = vmatpush3.bf16.msra.mxu0 %v16090_v6  ;;  %13823 = vmatpush3.bf16.msra.mxu1 %v16090_v6  ;;  %v18023_v20 = vand.u32 4294901760, %v16156_v17  ;;  %v863_v7 = vand.u32 4294901760, %v16211_v26  ;;  %v870_v10 = vand.u32 4294901760, %v16214_v0  ;;  %v877_v63 = vand.u32 4294901760, %v16225_v38 }
 0x14e   : > { %13633 = vmatprep.subr.bf16.mxu0 %v16121_v57  ;;  %13825 = vmatprep.subr.bf16.mxu1 %v16121_v57  ;;  %v730_v19 = vand.u32 4294901760, %v729_v42  ;;  %v884_v48 = vand.u32 4294901760, %v16228_v53  ;;  %v18024_v40 = vand.u32 4294901760, %v16193_v31  ;;  %v18026_v42 = vand.u32 4294901760, %v15997_v29 }
 0x14f   : > { %v739_v8 = vsub.f32 %v16156_v17, %v18023_v20  ;;  %v18025_v20 = vand.u32 4294901760, %v16206_v58  ;;  %v18028_v6 = vand.u32 4294901760, %v16006_v33  ;;  %v18029_v49 = vand.u32 4294901760, %v16008_v34 }
 0x150   : > { %v749_v61 = vsub.f32 %v16193_v31, %v18024_v40  ;;  %v18030_v40 = vand.u32 4294901760, %v16034_v47  ;;  %v18031_v31 = vand.u32 4294901760, %v16049_v52  ;;  %v18032_v32 = vand.u32 4294901760, %v16102_v13 }
 0x151   : > { %13635 = vmatpush3.bf16.msra.mxu0 %v16121_v57  ;;  %13827 = vmatpush3.bf16.msra.mxu1 %v16121_v57  ;;  %v759_v21 = vsub.f32 %v16206_v58, %v18025_v20  ;;  %v16272_v35 = vpack.c.bf16 %v18029_v49, %v18028_v6  ;;  %v16284_v23 = vpack.c.bf16 %v842_v11, %v835_v55 }
 0x152   : > { %13637 = vmatprep.subr.bf16.mxu0 %v16134_v5  ;;  %13829 = vmatprep.subr.bf16.mxu1 %v16134_v5  ;;  %v16278_v20 = vpack.c.bf16 %v18031_v31, %v18030_v40  ;;  %v16282_v58 = vpack.c.bf16 %v828_v3, %v18032_v32  ;;  %v16289_v49 = vpack.c.bf16 %v870_v10, %v863_v7  ;;  %v823_v31 = vand.u32 4294901760, %v16179_v50 }
 0x153   : > { %v16291_v6 = vpack.c.bf16 %v884_v48, %v877_v63  ;;  %v836_v3 = vsub.f32 %v16166_v25, %v835_v55  ;;  %v843_v32 = vsub.f32 %v16184_v4, %v842_v11  ;;  %v750_v40 = vand.u32 4294901760, %v749_v61 }
 0x154   : > { %18033 = vst [vmem:[#allocation48_spill] sm:$0xff] %v16289_v49  ;;  %v760_v49 = vand.u32 4294901760, %v759_v21  ;;  %v871_v21 = vsub.f32 %v16214_v0, %v870_v10 }
 0x155   : > { %13639 = vmatpush3.bf16.msra.mxu0 %v16134_v5  ;;  %13831 = vmatpush3.bf16.msra.mxu1 %v16134_v5  ;;  %v18027_v5 = vand.u32 4294901760, %v15999_v30  ;;  %18034 = vst [vmem:[#allocation49_spill] sm:$0xff] %v16291_v6  ;;  %v857_v6 = vsub.f32 %v16202_v27, %v856_v12  ;;  %v844_v55 = vand.u32 4294901760, %v843_v32  ;;  %v18047_v32 = vand.u32 4294901760, %v16128_v62 }
 0x156   : > { %13641 = vmatprep.subr.bf16.mxu0 %v16140_v41  ;;  %13833 = vmatprep.subr.bf16.mxu1 %v16140_v41 }
 0x157   : > { %v16266_v57 = vpack.c.bf16 %v18027_v5, %v18026_v42  ;;  %v740_v5 = vand.u32 4294901760, %v739_v8  ;;  %v830_v42 = vand.u32 4294901760, %v829_v39  ;;  %v837_v39 = vand.u32 4294901760, %v836_v3 }
 0x158   : > { %11713 = vmatmul.mubr.f32.vlgmr.msra.gmra.mrb[0].mxu0 %v710_v1  ;;  %v16287_v1 = vpack.c.bf16 %v856_v12, %v849_v56  ;;  %v858_v11 = vand.u32 4294901760, %v857_v6  ;;  %v864_v12 = vsub.f32 %v16211_v26, %v863_v7  ;;  %v872_v6 = vand.u32 4294901760, %v871_v21 }
 0x159   : > { %13643 = vmatpush3.bf16.msra.mxu0 %v16140_v41  ;;  %11715 = vmatprep.mubr.f32.mxu0 %v720_v45  ;;  %v18035_v45 = vand.u32 4294901760, %v16237_v9  ;;  %v850_v41 = vsub.f32 %v16189_v36, %v849_v56  ;;  %v16304_v50 = vpack.c.bf16 %v830_v42, %v823_v31  ;;  %v16308_v56 = vpack.c.bf16 %v844_v55, %v837_v39  ;;  %v18055_v55 = vld [vmem:[#allocation31_spill] sm:$0xff] }
 0x15a   : > { %13645 = vmatprep.subr.bf16.mxu0 %v16152_v37  ;;  %v885_v31 = vsub.f32 %v16228_v53, %v884_v48  ;;  %v16331_v48 = vpack.c.bf16 %v15999_v30, %v15997_v29  ;;  %v16345_v29 = vpack.c.bf16 %v16049_v52, %v16034_v47  ;;  %v16353_v30 = vpack.c.bf16 %v16148_v51, %v16102_v13  ;;  %v18037_v51 = vld [vmem:[#allocation46_spill] sm:$0xff]  ;;  %v18038_v52 = vld [vmem:[#allocation47_spill] sm:$0xff] }
 0x15b   : > { %v769_v8 = vsub.f32 %v16237_v9, %v18035_v45  ;;  %v16381_v47 = vpack.c.bf16 %v16228_v53, %v16225_v38  ;;  %v18039_v13 = vld [vmem:[#allocation34_spill] sm:$0xff]  ;;  %v18046_v53 = vand.u32 4294901760, %v16110_v44 }
 0x15c   : > { %11716 = vmatmul.mubr.f32.gmra.mrb[2].mxu0 %v730_v19  ;;  %v851_v19 = vand.u32 4294901760, %v850_v41  ;;  %v865_v41 = vand.u32 4294901760, %v864_v12  ;;  %v886_v42 = vand.u32 4294901760, %v885_v31 }
 0x15d   : > { %13647 = vmatpush3.bf16.msra.mxu0 %v16152_v37  ;;  %11718 = vmatprep.mubr.f32.mxu0 %v740_v5  ;;  %v770_v61 = vand.u32 4294901760, %v769_v8 }
 0x15e   : > { %13649 = vmatprep.subr.bf16.mxu0 %v16231_v54  ;;  %v16313_v5 = vpack.c.bf16 %v858_v11, %v851_v19  ;;  %v16321_v10 = vpack.c.bf16 %v872_v6, %v865_v41  ;;  %v18057_v11 = vld [vmem:[#allocation35_spill] sm:$0xff] }
 0x160   : > { %11719 = vmatmul.mubr.f32.gmra.mrb[4].mxu0 %v750_v40  ;;  %v18048_v40 = vand.u32 4294901760, %v16156_v17 }
 0x161   : > { %13651 = vmatpush3.bf16.msra.mxu0 %v16231_v54  ;;  %11721 = vmatprep.mubr.f32.mxu0 %v760_v49  ;;  %v878_v49 = vsub.f32 %v16225_v38, %v877_v63  ;;  %v16337_v63 = vpack.c.bf16 %v16008_v34, %v16006_v33  ;;  %v16361_v33 = vpack.c.bf16 %v16184_v4, %v16166_v25  ;;  %v18040_v25 = vand.u32 4294901760, %v15995_v28  ;;  %v18043_v38 = vld [vmem:[#allocation40_spill] sm:$0xff] }
 0x162   : > { %13653 = vmatprep.subr.bf16.mxu0 %v16304_v50  ;;  %v16369_v34 = vpack.c.bf16 %v16202_v27, %v16189_v36  ;;  %v16375_v4 = vpack.c.bf16 %v16214_v0, %v16211_v26  ;;  %v18036_v0 = vld [vmem:[#allocation32_spill] sm:$0xff]  ;;  %v18042_v27 = vld [vmem:[#allocation38_spill] sm:$0xff] }
 0x163   : > { %v879_v7 = vand.u32 4294901760, %v878_v49  ;;  %v18041_v36 = vld [vmem:[#allocation36_spill] sm:$0xff]  ;;  %v18044_v26 = vld [vmem:[#allocation42_spill] sm:$0xff] }
 0x164   : > { %11722 = vmatmul.mubr.f32.gmra.mrb[6].mxu0 %v770_v61 }
 0x165   : > { %13655 = vmatpush3.bf16.msra.mxu0 %v16304_v50  ;;  %11756 = vmatprep.mubr.f32.mxu0 %v15980_v22  ;;  %v16325_v3 = vpack.c.bf16 %v886_v42, %v879_v7  ;;  %v18058_v42 = vld [vmem:[#allocation41_spill] sm:$0xff] }
 0x166   : > { %13657 = vmatprep.subr.bf16.mxu0 %v16308_v56 }
 0x169   : > { %13659 = vmatpush3.bf16.msra.mxu0 %v16308_v56 }
 0x16a   : > { %13661 = vmatprep.subr.bf16.mxu0 %v16313_v5 }
 0x16d   : > { %13663 = vmatpush3.bf16.msra.mxu0 %v16313_v5 }
 0x16e   : > { %13665 = vmatprep.subr.bf16.mxu0 %v16321_v10 }
 0x171   : > { %13667 = vmatpush3.bf16.msra.mxu0 %v16321_v10 }
 0x172   : > { %13669 = vmatprep.subr.bf16.mxu0 %v16325_v3 }
 0x175   : > { %13671 = vmatpush3.bf16.msra.mxu0 %v16325_v3 }
 0x176   : > { %13673 = vmatprep.subr.bf16.mxu0 %v16331_v48 }
 0x178   : > { %11757 = vmatmul.mubr.f32.vlgmr.msra.gmra.mrb[0].mxu0 %v16029_v43 }
 0x179   : > { %13675 = vmatpush3.bf16.msra.mxu0 %v16331_v48  ;;  %11759 = vmatprep.mubr.f32.mxu0 %v16071_v60 }
 0x17a   : > { %13677 = vmatprep.subr.bf16.mxu0 %v16337_v63 }
 0x17c   : > { %11760 = vmatmul.mubr.f32.gmra.mrb[2].mxu0 %v16105_v14 }
 0x17d   : > { %13679 = vmatpush3.bf16.msra.mxu0 %v16337_v63  ;;  %11762 = vmatprep.mubr.f32.mxu0 %v16117_v24 }
 0x17e   : > { %13681 = vmatprep.subr.bf16.mxu0 %v16345_v29 }
 0x180   : > { %11763 = vmatmul.mubr.f32.gmra.mrb[4].mxu0 %v16159_v18 }
 0x181   : > { %13683 = vmatpush3.bf16.msra.mxu0 %v16345_v29  ;;  %11765 = vmatprep.mubr.f32.mxu0 %v16170_v46 }
 0x182   : > { %13685 = vmatprep.subr.bf16.mxu0 %v16353_v30 }
 0x184   : > { %11766 = vmatmul.mubr.f32.gmra.mrb[6].mxu0 %v16217_v2 }
 0x185   : > { %13687 = vmatpush3.bf16.msra.mxu0 %v16353_v30  ;;  %11800 = vmatprep.mubr.f32.mxu0 %v15995_v28  ;;  %v18045_v28 = vand.u32 4294901760, %v16068_v59 }
 0x186   : > { %13689 = vmatprep.subr.bf16.mxu0 %v16361_v33 }
 0x189   : > { %13691 = vmatpush3.bf16.msra.mxu0 %v16361_v33 }
 0x18a   : > { %13693 = vmatprep.subr.bf16.mxu0 %v16369_v34 }
 0x18d   : > { %13695 = vmatpush3.bf16.msra.mxu0 %v16369_v34 }
 0x18e   : > { %13697 = vmatprep.subr.bf16.mxu0 %v16375_v4 }
 0x191   : > { %13699 = vmatpush3.bf16.msra.mxu0 %v16375_v4 }
 0x192   : > { %13701 = vmatprep.subr.bf16.mxu0 %v16381_v47 }
 0x195   : > { %13703 = vmatpush3.bf16.msra.mxu0 %v16381_v47 }
 0x196   : > { %13705 = vmatprep.subr.bf16.mxu0 %v15965_v15 }
 0x198   : > { %11801 = vmatmul.mubr.f32.vlgmr.msra.gmra.mrb[0].mxu0 %v16068_v59  ;;  %v18049_v59 = vand.u32 4294901760, %v18037_v51 }
 0x199   : > { %13707 = vmatpush3.bf16.msra.mxu0 %v15965_v15  ;;  %11803 = vmatprep.mubr.f32.mxu0 %v16110_v44  ;;  %v18050_v44 = vand.u32 4294901760, %v18038_v52 }
 0x19a   : > { %13709 = vmatprep.subr.bf16.mxu0 %v15967_v16 }
 0x19c   : > { %11804 = vmatmul.mubr.f32.gmra.mrb[2].mxu0 %v16128_v62  ;;  %v18051_v62 = vmov %v18035_v45  ;;  %v18053_v45 = vld [vmem:[#allocation49_spill] sm:$0xff] }
 0x19d   : > { %13711 = vmatpush3.bf16.msra.mxu0 %v15967_v16  ;;  %11806 = vmatprep.mubr.f32.mxu0 %v16156_v17  ;;  %v18052_v17 = vld [vmem:[#allocation48_spill] sm:$0xff] }
 0x19e   : > { %13713 = vmatprep.subr.bf16.mxu0 %v18036_v0 }
 0x1a0   : > { %11807 = vmatmul.mubr.f32.gmra.mrb[4].mxu0 %v18037_v51 }
 0x1a1   : > { %13715 = vmatpush3.bf16.msra.mxu0 %v18036_v0  ;;  %11809 = vmatprep.mubr.f32.mxu0 %v18038_v52 }
 0x1a2   : > { %13717 = vmatprep.subr.bf16.mxu0 %v18039_v13 }
 0x1a4   : > { %11810 = vmatmul.mubr.f32.gmra.mrb[6].mxu0 %v16237_v9  ;;  %v18054_v9 = vld [vmem:[#allocation33_spill] sm:$0xff] }
 0x1a5   : > { %13719 = vmatpush3.bf16.msra.mxu0 %v18039_v13  ;;  %11844 = vmatprep.mubr.f32.mxu0 %v18040_v25 }
 0x1a6   : > { %13721 = vmatprep.subr.bf16.mxu0 %v18041_v36 }
 0x1a9   : > { %13723 = vmatpush3.bf16.msra.mxu0 %v18041_v36 }
 0x1aa   : > { %13725 = vmatprep.subr.bf16.mxu0 %v18042_v27 }
 0x1ad   : > { %13727 = vmatpush3.bf16.msra.mxu0 %v18042_v27 }
 0x1ae   : > { %13729 = vmatprep.subr.bf16.mxu0 %v18043_v38 }
 0x1b1   : > { %13731 = vmatpush3.bf16.msra.mxu0 %v18043_v38 }
 0x1b2   : > { %13733 = vmatprep.subr.bf16.mxu0 %v18044_v26 }
 0x1b5   : > { %13735 = vmatpush3.bf16.msra.mxu0 %v18044_v26 }
 0x1b6   : > { %13737 = vmatprep.subr.bf16.mxu0 %v16266_v57 }
 0x1b8   : > { %11845 = vmatmul.mubr.f32.vlgmr.msra.gmra.mrb[0].mxu0 %v18045_v28 }
 0x1b9   : > { %13739 = vmatpush3.bf16.msra.mxu0 %v16266_v57  ;;  %11847 = vmatprep.mubr.f32.mxu0 %v18046_v53  ;;  %v18059_v53 = vld [vmem:[#allocation39_spill] sm:$0xff] }
 0x1ba   : > { %13741 = vmatprep.subr.bf16.mxu0 %v16272_v35 }
 0x1bc   : > { %11848 = vmatmul.mubr.f32.gmra.mrb[2].mxu0 %v18047_v32 }
 0x1bd   : > { %13743 = vmatpush3.bf16.msra.mxu0 %v16272_v35  ;;  %11850 = vmatprep.mubr.f32.mxu0 %v18048_v40 }
 0x1be   : > { %13745 = vmatprep.subr.bf16.mxu0 %v16278_v20 }
 0x1c0   : > { %11851 = vmatmul.mubr.f32.gmra.mrb[4].mxu0 %v18049_v59 }
 0x1c1   : > { %13747 = vmatpush3.bf16.msra.mxu0 %v16278_v20  ;;  %11853 = vmatprep.mubr.f32.mxu0 %v18050_v44 }
 0x1c2   : > { %13749 = vmatprep.subr.bf16.mxu0 %v16282_v58 }
 0x1c4   : > { %11854 = vmatmul.mubr.f32.gmra.mrb[6].mxu0 %v18051_v62 }
 0x1c5   : > { %13751 = vmatpush3.bf16.msra.mxu0 %v16282_v58  ;;  %11888 = vmatprep.mubr.f32.mxu0 %v15980_v22 }
 0x1c6   : > { %13753 = vmatprep.subr.bf16.mxu0 %v16284_v23 }
 0x1c9   : > { %13755 = vmatpush3.bf16.msra.mxu0 %v16284_v23 }
 0x1ca   : > { %13757 = vmatprep.subr.bf16.mxu0 %v16287_v1 }
 0x1cd   : > { %13759 = vmatpush3.bf16.msra.mxu0 %v16287_v1 }
 0x1ce   : > { %13761 = vmatprep.subr.bf16.mxu0 %v18052_v17 }
 0x1d1   : > { %13763 = vmatpush3.bf16.msra.mxu0 %v18052_v17 }
 0x1d2   : > { %13765 = vmatprep.subr.bf16.mxu0 %v18053_v45 }
 0x1d5   : > { %13767 = vmatpush3.bf16.msra.mxu0 %v18053_v45 }
 0x1d6   : > { %13769 = vmatprep.subr.bf16.mxu0 %v15965_v15 }
 0x1d8   : > { %11889 = vmatmul.mubr.f32.vlgmr.msra.gmra.mrb[0].mxu0 %v16029_v43 }
 0x1d9   : > { %13771 = vmatpush3.bf16.msra.mxu0 %v15965_v15  ;;  %11891 = vmatprep.mubr.f32.mxu0 %v16071_v60 }
 0x1da   : > { %13773 = vmatprep.subr.bf16.mxu0 %v15967_v16 }
 0x1dc   : > { %11892 = vmatmul.mubr.f32.gmra.mrb[2].mxu0 %v16105_v14 }
 0x1dd   : > { %13775 = vmatpush3.bf16.msra.mxu0 %v15967_v16  ;;  %11894 = vmatprep.mubr.f32.mxu0 %v16117_v24 }
 0x1de   : > { %13777 = vmatprep.subr.bf16.mxu0 %v18036_v0 }
 0x1e0   : > { %11895 = vmatmul.mubr.f32.gmra.mrb[4].mxu0 %v16159_v18 }
 0x1e1   : > { %13779 = vmatpush3.bf16.msra.mxu0 %v18036_v0  ;;  %11897 = vmatprep.mubr.f32.mxu0 %v16170_v46 }
 0x1e2   : > { %13781 = vmatprep.subr.bf16.mxu0 %v18039_v13 }
 0x1e4   : > { %11898 = vmatmul.mubr.f32.gmra.mrb[6].mxu0 %v16217_v2 }
 0x1e5   : > { %13783 = vmatpush3.bf16.msra.mxu0 %v18039_v13  ;;  %11932 = vmatprep.mubr.f32.mxu0 %v15980_v22 }
 0x1e6   : > { %13785 = vmatprep.subr.bf16.mxu0 %v18041_v36 }
 0x1e9   : > { %13787 = vmatpush3.bf16.msra.mxu0 %v18041_v36 }
 0x1ea   : > { %13789 = vmatprep.subr.bf16.mxu0 %v18042_v27 }
 0x1ed   : > { %13791 = vmatpush3.bf16.msra.mxu0 %v18042_v27 }
 0x1ee   : > { %13793 = vmatprep.subr.bf16.mxu0 %v18043_v38 }
 0x1f1   : > { %13795 = vmatpush3.bf16.msra.mxu0 %v18043_v38 }
 0x1f2   : > { %13797 = vmatprep.subr.bf16.mxu0 %v18044_v26 }
 0x1f5   : > { %13799 = vmatpush3.bf16.msra.mxu0 %v18044_v26 }
 0x1f8   : > { %11933 = vmatmul.mubr.f32.vlgmr.msra.gmra.mrb[0].mxu0 %v16029_v43 }
 0x1f9   : > { %11935 = vmatprep.mubr.f32.mxu0 %v16071_v60 }
 0x1fc   : > { %11936 = vmatmul.mubr.f32.gmra.mrb[2].mxu0 %v16105_v14 }
 0x1fd   : > { %11938 = vmatprep.mubr.f32.mxu0 %v16117_v24 }
 0x200   : > { %11939 = vmatmul.mubr.f32.gmra.mrb[4].mxu0 %v16159_v18  ;;  %v18056_v18 = vld [vmem:[#allocation37_spill] sm:$0xff] }
 0x201   : > { %11941 = vmatprep.mubr.f32.mxu0 %v16170_v46 }
 0x204   : > { %11942 = vmatmul.mubr.f32.gmra.mrb[6].mxu0 %v16217_v2 }
 0x2cb   : > { %v11934_v22 = vpop.f32.mrb[0].mxu0 }
 0x2cc   : > { %v16474_v8 = vsub.f32 %v18054_v9, %v11934_v22  ;;  %v1511_v39 = vpop.f32.mrb[1].mxu0 }
 0x2cd   : > { %v16477_v61 = vsub.f32 %v18055_v55, %v1511_v39 }
 0x2ce   : > { %v1566_v43 = vmul.f32 %v16474_v8, %v16474_v8 }
 0x2cf   : > { %v1565_v60 = vmul.f32 %v16477_v61, %v16477_v61  ;;  %v11937_v14 = vpop.f32.mrb[2].mxu0 }
 0x2d0   : > { %v16483_v24 = vand.u32 4294901760, %v1566_v43  ;;  %v16486_v46 = vsub.f32 %v18056_v18, %v11937_v14  ;;  %v1523_v2 = vpop.f32.mrb[3].mxu0 }
 0x2d1   : > { %v16488_v19 = vand.u32 4294901760, %v1565_v60  ;;  %v16491_v12 = vsub.f32 %v18057_v11, %v1523_v2 }
 0x2d2   : > { %v16494_v21 = vsub.f32 %v1566_v43, %v16483_v24  ;;  %v1568_v41 = vmul.f32 %v16486_v46, %v16486_v46 }
 0x2d3   : > { %v16499_v6 = vsub.f32 %v1565_v60, %v16488_v19  ;;  %v1567_v49 = vmul.f32 %v16491_v12, %v16491_v12  ;;  %v11940_v31 = vpop.f32.mrb[4].mxu0  ;;  %v18060_v60 = vld [vmem:[#allocation45_spill] sm:$0xff] }
 0x2d4   : > { %v16503_v7 = vand.u32 4294901760, %v1568_v41  ;;  %v16506_v51 = vsub.f32 %v18058_v42, %v11940_v31  ;;  %v1535_v52 = vpop.f32.mrb[5].mxu0  ;;  %v17966_v25 = vand.u32 4294901760, %v16494_v21 }
 0x2d5   : > { %v16509_v28 = vand.u32 4294901760, %v1567_v49  ;;  %v16512_v32 = vsub.f32 %v18059_v53, %v1535_v52  ;;  %v17967_v40 = vand.u32 4294901760, %v16499_v6 }
 0x2d6   : > { %v16516_v59 = vsub.f32 %v1568_v41, %v16503_v7  ;;  %v1570_v44 = vmul.f32 %v16506_v51, %v16506_v51  ;;  %v1667_v62 = vsub.f32 %v16494_v21, %v17966_v25  ;;  %v18062_v41 = vld [vmem:[#allocation43_spill] sm:$0xff] }
 0x2d7   : > { %v16524_v22 = vsub.f32 %v1567_v49, %v16509_v28  ;;  %v1569_v9 = vmul.f32 %v16512_v32, %v16512_v32  ;;  %v11943_v39 = vpop.f32.mrb[6].mxu0  ;;  %v1657_v55 = vsub.f32 %v16499_v6, %v17967_v40  ;;  %v18064_v40 = vld [vmem:[#allocation44_spill] sm:$0xff] }
 0x2d8   : > { %v16531_v43 = vand.u32 4294901760, %v1570_v44  ;;  %v16534_v14 = vsub.f32 %v18060_v60, %v11943_v39  ;;  %v1547_v18 = vpop.f32.mrb[7].mxu0  ;;  %v17968_v2 = vand.u32 4294901760, %v16516_v59  ;;  %v1668_v25 = vand.u32 4294901760, %v1667_v62 }
 0x2d9   : > { %v16537_v11 = vand.u32 4294901760, %v1569_v9  ;;  %v16540_v49 = vsub.f32 %v18062_v41, %v1547_v18  ;;  %v1658_v31 = vand.u32 4294901760, %v1657_v55  ;;  %v17970_v42 = vand.u32 4294901760, %v16524_v22 }
 0x2da   : > { %18061 = vst [vmem:[#allocation32_spill] sm:$0xff] %v16534_v14  ;;  %v16544_v52 = vsub.f32 %v1570_v44, %v16531_v43  ;;  %v1572_v53 = vmul.f32 %v16534_v14, %v16534_v14  ;;  %v1687_v39 = vsub.f32 %v16516_v59, %v17968_v2 }
 0x2db   : > { %18063 = vst [vmem:[#allocation46_spill] sm:$0xff] %v16540_v49  ;;  %v16552_v60 = vsub.f32 %v1569_v9, %v16537_v11  ;;  %v1571_v18 = vmul.f32 %v16540_v49, %v16540_v49  ;;  %11976 = vmatprep.mubr.f32.mxu1 %v1658_v31  ;;  %v1677_v44 = vsub.f32 %v16524_v22, %v17970_v42 }
 0x2dc   : > { %v16559_v55 = vand.u32 4294901760, %v1572_v53  ;;  %11977 = vmatmul.mubr.f32.vlgmr.msra.gmra.mrb[0].mxu1 %v1668_v25  ;;  %v1706_v62 = vand.u32 4294901760, %v16544_v52  ;;  %v1688_v31 = vand.u32 4294901760, %v1687_v39 }
 0x2dd   : > { %v16562_v41 = vand.u32 4294901760, %v1571_v18  ;;  %13835 = vmatpush3.bf16.msra.mxu1 %v18064_v40  ;;  %v1678_v2 = vand.u32 4294901760, %v1677_v44  ;;  %v1696_v9 = vand.u32 4294901760, %v16552_v60 }
 0x2de   : > { %v16567_v14 = vsub.f32 %v1572_v53, %v16559_v55  ;;  %13837 = vmatprep.subr.bf16.mxu1 %v16152_v37  ;;  %v1707_v42 = vsub.f32 %v16544_v52, %v1706_v62 }
 0x2df   : > { %v16574_v25 = vsub.f32 %v1571_v18, %v16562_v41  ;;  %11979 = vmatprep.mubr.f32.mxu1 %v1678_v2  ;;  %v1697_v40 = vsub.f32 %v16552_v60, %v1696_v9 }
 0x2e0   : > { %11980 = vmatmul.mubr.f32.gmra.mrb[2].mxu1 %v1688_v31  ;;  %v1726_v44 = vand.u32 4294901760, %v16567_v14  ;;  %v1708_v49 = vand.u32 4294901760, %v1707_v42 }
 0x2e1   : > { %13839 = vmatpush3.bf16.msra.mxu1 %v16152_v37  ;;  %v1698_v53 = vand.u32 4294901760, %v1697_v40  ;;  %v1716_v39 = vand.u32 4294901760, %v16574_v25 }
 0x2e2   : > { %13841 = vmatprep.subr.bf16.mxu1 %v16231_v54  ;;  %v1727_v18 = vsub.f32 %v16567_v14, %v1726_v44 }
 0x2e3   : > { %11982 = vmatprep.mubr.f32.mxu1 %v1698_v53  ;;  %v1717_v2 = vsub.f32 %v16574_v25, %v1716_v39 }
 0x2e4   : > { %11983 = vmatmul.mubr.f32.gmra.mrb[4].mxu1 %v1708_v49  ;;  %v1728_v37 = vand.u32 4294901760, %v1727_v18 }
 0x2e5   : > { %13843 = vmatpush3.bf16.msra.mxu1 %v16231_v54  ;;  %v1718_v31 = vand.u32 4294901760, %v1717_v2  ;;  %v15581_v54 = vmov 0.0  }
 0x2e6   : > { %13845 = vmatprep.subr.bf16.mxu1 %v16304_v50  ;;  %561 = vst [vmem:[#allocation2] sm:$0xff] %v15581_v54  ;;  %562 = vst [vmem:[#allocation2 + $0x8] sm:$0x3f] %v15581_v54 }
 0x2e7   : > { %11985 = vmatprep.mubr.f32.mxu1 %v1718_v31  ;;  %563 = vst [vmem:[#allocation2 + $0x10] sm:$0xff] %v15581_v54  ;;  %564 = vst [vmem:[#allocation2 + $0x18] sm:$0x3f] %v15581_v54 }
 0x2e8   : > { %11986 = vmatmul.mubr.f32.gmra.mrb[6].mxu1 %v1728_v37  ;;  %565 = vst [vmem:[#allocation2 + $0x20] sm:$0xff] %v15581_v54  ;;  %566 = vst [vmem:[#allocation2 + $0x28] sm:$0x3f] %v15581_v54 }
 0x2e9   : > { %13847 = vmatpush3.bf16.msra.mxu1 %v16304_v50  ;;  %12020 = vmatprep.mubr.f32.mxu1 %v16488_v19  ;;  %569 = vst [vmem:[#allocation2 + $0x40] sm:$0xff] %v15581_v54  ;;  %570 = vst [vmem:[#allocation2 + $0x48] sm:$0x3f] %v15581_v54  ;;  %v18065_v50 = vand.u32 4294901760, %v16499_v6 }
 0x2ea   : > { %13849 = vmatprep.subr.bf16.mxu1 %v16308_v56  ;;  %583 = vst [vmem:[#allocation2 + $0xb0] sm:$0xff] %v15581_v54  ;;  %584 = vst [vmem:[#allocation2 + $0xb8] sm:$0x3f] %v15581_v54 }
 0x2eb   : > { %585 = vst [vmem:[#allocation2 + $0xc0] sm:$0xff] %v15581_v54  ;;  %586 = vst [vmem:[#allocation2 + $0xc8] sm:$0x3f] %v15581_v54 }
 0x2ec   : > { %587 = vst [vmem:[#allocation2 + $0xd0] sm:$0xff] %v15581_v54  ;;  %588 = vst [vmem:[#allocation2 + $0xd8] sm:$0x3f] %v15581_v54 }
 0x2ed   : > { %13851 = vmatpush3.bf16.msra.mxu1 %v16308_v56  ;;  %567 = vst [vmem:[#allocation2 + $0x30] sm:$0xff] %v15581_v54  ;;  %568 = vst [vmem:[#allocation2 + $0x38] sm:$0x3f] %v15581_v54  ;;  %v18066_v56 = vand.u32 4294901760, %v16494_v21 }
 0x2ee   : > { %13853 = vmatprep.subr.bf16.mxu1 %v16313_v5  ;;  %571 = vst [vmem:[#allocation2 + $0x50] sm:$0xff] %v15581_v54  ;;  %572 = vst [vmem:[#allocation2 + $0x58] sm:$0x3f] %v15581_v54 }
 0x2ef   : > { %573 = vst [vmem:[#allocation2 + $0x60] sm:$0xff] %v15581_v54  ;;  %574 = vst [vmem:[#allocation2 + $0x68] sm:$0x3f] %v15581_v54 }
 0x2f0   : > { %575 = vst [vmem:[#allocation2 + $0x70] sm:$0xff] %v15581_v54  ;;  %576 = vst [vmem:[#allocation2 + $0x78] sm:$0x3f] %v15581_v54 }
 0x2f1   : > { %13855 = vmatpush3.bf16.msra.mxu1 %v16313_v5  ;;  %577 = vst [vmem:[#allocation2 + $0x80] sm:$0xff] %v15581_v54  ;;  %578 = vst [vmem:[#allocation2 + $0x88] sm:$0x3f] %v15581_v54  ;;  %v18067_v5 = vand.u32 4294901760, %v16524_v22 }
 0x2f2   : > { %13857 = vmatprep.subr.bf16.mxu1 %v16321_v10  ;;  %579 = vst [vmem:[#allocation2 + $0x90] sm:$0xff] %v15581_v54  ;;  %580 = vst [vmem:[#allocation2 + $0x98] sm:$0x3f] %v15581_v54 }
 0x2f3   : > { %581 = vst [vmem:[#allocation2 + $0xa0] sm:$0xff] %v15581_v54  ;;  %582 = vst [vmem:[#allocation2 + $0xa8] sm:$0x3f] %v15581_v54 }
 0x2f5   : > { %13859 = vmatpush3.bf16.msra.mxu1 %v16321_v10  ;;  %v18068_v10 = vand.u32 4294901760, %v16516_v59 }
 0x2f6   : > { %13861 = vmatprep.subr.bf16.mxu1 %v16325_v3 }
 0x2f9   : > { %13863 = vmatpush3.bf16.msra.mxu1 %v16325_v3 }
 0x2fa   : > { %13865 = vmatprep.subr.bf16.mxu1 %v16331_v48 }
 0x2fc   : > { %12021 = vmatmul.mubr.f32.vlgmr.msra.gmra.mrb[0].mxu1 %v16483_v24 }
 0x2fd   : > { %12023 = vmatprep.mubr.f32.mxu1 %v16509_v28  ;;  %13867 = vmatpush3.bf16.msra.mxu1 %v16331_v48 }
 0x2fe   : > { %13869 = vmatprep.subr.bf16.mxu1 %v16337_v63 }
 0x300   : > { %12024 = vmatmul.mubr.f32.gmra.mrb[2].mxu1 %v16503_v7 }
 0x301   : > { %12026 = vmatprep.mubr.f32.mxu1 %v16537_v11  ;;  %13871 = vmatpush3.bf16.msra.mxu1 %v16337_v63 }
 0x302   : > { %13873 = vmatprep.subr.bf16.mxu1 %v16345_v29 }
 0x304   : > { %12027 = vmatmul.mubr.f32.gmra.mrb[4].mxu1 %v16531_v43 }
 0x305   : > { %12029 = vmatprep.mubr.f32.mxu1 %v16562_v41  ;;  %13875 = vmatpush3.bf16.msra.mxu1 %v16345_v29 }
 0x306   : > { %13877 = vmatprep.subr.bf16.mxu1 %v16353_v30 }
 0x308   : > { %12030 = vmatmul.mubr.f32.gmra.mrb[6].mxu1 %v16559_v55 }
 0x309   : > { %13879 = vmatpush3.bf16.msra.mxu1 %v16353_v30  ;;  %12064 = vmatprep.mubr.f32.mxu1 %v16499_v6 }
 0x30a   : > { %13881 = vmatprep.subr.bf16.mxu1 %v16361_v33 }
 0x30d   : > { %13883 = vmatpush3.bf16.msra.mxu1 %v16361_v33 }
 0x30e   : > { %13885 = vmatprep.subr.bf16.mxu1 %v16369_v34 }
 0x311   : > { %13887 = vmatpush3.bf16.msra.mxu1 %v16369_v34  ;;  %v10217_v34 = vld [vmem:[#allocation7] ss:$0 sm:$0xff] }
 0x312   : > { %13889 = vmatprep.subr.bf16.mxu1 %v16375_v4 }
 0x315   : > { %13891 = vmatpush3.bf16.msra.mxu1 %v16375_v4 }
 0x316   : > { %13893 = vmatprep.subr.bf16.mxu1 %v16381_v47 }
 0x319   : > { %13895 = vmatpush3.bf16.msra.mxu1 %v16381_v47 }
 0x31a   : > { %13897 = vmatprep.subr.bf16.mxu1 %v15965_v15 }
 0x31c   : > { %12065 = vmatmul.mubr.f32.vlgmr.msra.gmra.mrb[0].mxu1 %v16494_v21 }
 0x31d   : > { %12067 = vmatprep.mubr.f32.mxu1 %v16524_v22  ;;  %13899 = vmatpush3.bf16.msra.mxu1 %v15965_v15 }
 0x31e   : > { %13901 = vmatprep.subr.bf16.mxu1 %v15967_v16 }
 0x320   : > { %12068 = vmatmul.mubr.f32.gmra.mrb[2].mxu1 %v16516_v59 }
 0x321   : > { %12070 = vmatprep.mubr.f32.mxu1 %v16552_v60  ;;  %13903 = vmatpush3.bf16.msra.mxu1 %v15967_v16 }
 0x322   : > { %13905 = vmatprep.subr.bf16.mxu1 %v18036_v0 }
 0x324   : > { %12071 = vmatmul.mubr.f32.gmra.mrb[4].mxu1 %v16544_v52 }
 0x325   : > { %12073 = vmatprep.mubr.f32.mxu1 %v16574_v25  ;;  %13907 = vmatpush3.bf16.msra.mxu1 %v18036_v0 }
 0x326   : > { %13909 = vmatprep.subr.bf16.mxu1 %v18039_v13 }
 0x328   : > { %12074 = vmatmul.mubr.f32.gmra.mrb[6].mxu1 %v16567_v14 }
 0x329   : > { %13911 = vmatpush3.bf16.msra.mxu1 %v18039_v13  ;;  %12108 = vmatprep.mubr.f32.mxu1 %v18065_v50 }
 0x32a   : > { %13913 = vmatprep.subr.bf16.mxu1 %v18041_v36 }
 0x32d   : > { %13915 = vmatpush3.bf16.msra.mxu1 %v18041_v36 }
 0x32e   : > { %13917 = vmatprep.subr.bf16.mxu1 %v18042_v27 }
 0x331   : > { %13919 = vmatpush3.bf16.msra.mxu1 %v18042_v27 }
 0x332   : > { %13921 = vmatprep.subr.bf16.mxu1 %v18043_v38 }
 0x335   : > { %13923 = vmatpush3.bf16.msra.mxu1 %v18043_v38 }
 0x336   : > { %13925 = vmatprep.subr.bf16.mxu1 %v18044_v26 }
 0x339   : > { %13927 = vmatpush3.bf16.msra.mxu1 %v18044_v26 }
 0x33a   : > { %13929 = vmatprep.subr.bf16.mxu1 %v16266_v57 }
 0x33c   : > { %12109 = vmatmul.mubr.f32.vlgmr.msra.gmra.mrb[0].mxu1 %v18066_v56 }
 0x33d   : > { %12111 = vmatprep.mubr.f32.mxu1 %v18067_v5  ;;  %13931 = vmatpush3.bf16.msra.mxu1 %v16266_v57 }
 0x33e   : > { %13933 = vmatprep.subr.bf16.mxu1 %v16272_v35 }
 0x340   : > { %12112 = vmatmul.mubr.f32.gmra.mrb[2].mxu1 %v18068_v10 }
 0x341   : > { %12114 = vmatprep.mubr.f32.mxu1 %v1696_v9  ;;  %13935 = vmatpush3.bf16.msra.mxu1 %v16272_v35 }
 0x342   : > { %13937 = vmatprep.subr.bf16.mxu1 %v16278_v20 }
 0x344   : > { %12115 = vmatmul.mubr.f32.gmra.mrb[4].mxu1 %v1706_v62 }
 0x345   : > { %12117 = vmatprep.mubr.f32.mxu1 %v1716_v39  ;;  %13939 = vmatpush3.bf16.msra.mxu1 %v16278_v20 }
 0x346   : > { %13941 = vmatprep.subr.bf16.mxu1 %v16282_v58 }
 0x348   : > { %12118 = vmatmul.mubr.f32.gmra.mrb[6].mxu1 %v1726_v44 }
 0x349   : > { %13943 = vmatpush3.bf16.msra.mxu1 %v16282_v58  ;;  %12152 = vmatprep.mubr.f32.mxu1 %v16488_v19 }
 0x34a   : > { %13945 = vmatprep.subr.bf16.mxu1 %v16284_v23 }
 0x34d   : > { %13947 = vmatpush3.bf16.msra.mxu1 %v16284_v23 }
 0x34e   : > { %13949 = vmatprep.subr.bf16.mxu1 %v16287_v1 }
 0x351   : > { %13951 = vmatpush3.bf16.msra.mxu1 %v16287_v1 }
 0x352   : > { %13953 = vmatprep.subr.bf16.mxu1 %v18052_v17 }
 0x355   : > { %13955 = vmatpush3.bf16.msra.mxu1 %v18052_v17 }
 0x356   : > { %13957 = vmatprep.subr.bf16.mxu1 %v18053_v45 }
 0x359   : > { %13959 = vmatpush3.bf16.msra.mxu1 %v18053_v45 }
 0x35a   : > { %13961 = vmatprep.subr.bf16.mxu1 %v15965_v15 }
 0x35c   : > { %12153 = vmatmul.mubr.f32.vlgmr.msra.gmra.mrb[0].mxu1 %v16483_v24 }
 0x35d   : > { %12155 = vmatprep.mubr.f32.mxu1 %v16509_v28  ;;  %13963 = vmatpush3.bf16.msra.mxu1 %v15965_v15 }
 0x35e   : > { %13965 = vmatprep.subr.bf16.mxu1 %v15967_v16 }
 0x360   : > { %12156 = vmatmul.mubr.f32.gmra.mrb[2].mxu1 %v16503_v7 }
 0x361   : > { %12158 = vmatprep.mubr.f32.mxu1 %v16537_v11  ;;  %13967 = vmatpush3.bf16.msra.mxu1 %v15967_v16 }
 0x362   : > { %13969 = vmatprep.subr.bf16.mxu1 %v18036_v0 }
 0x364   : > { %12159 = vmatmul.mubr.f32.gmra.mrb[4].mxu1 %v16531_v43 }
 0x365   : > { %12161 = vmatprep.mubr.f32.mxu1 %v16562_v41  ;;  %13971 = vmatpush3.bf16.msra.mxu1 %v18036_v0 }
 0x366   : > { %13973 = vmatprep.subr.bf16.mxu1 %v18039_v13 }
 0x368   : > { %12162 = vmatmul.mubr.f32.gmra.mrb[6].mxu1 %v16559_v55 }
 0x369   : > { %13975 = vmatpush3.bf16.msra.mxu1 %v18039_v13  ;;  %12196 = vmatprep.mubr.f32.mxu1 %v16488_v19 }
 0x36a   : > { %13977 = vmatprep.subr.bf16.mxu1 %v18041_v36 }
 0x36d   : > { %13979 = vmatpush3.bf16.msra.mxu1 %v18041_v36 }
 0x36e   : > { %13981 = vmatprep.subr.bf16.mxu1 %v18042_v27 }
 0x371   : > { %13983 = vmatpush3.bf16.msra.mxu1 %v18042_v27  ;;  %v10218_v27 = vld [vmem:[#allocation8] ss:$0 sm:$0xff] }
 0x372   : > { %13985 = vmatprep.subr.bf16.mxu1 %v18043_v38 }
 0x375   : > { %13987 = vmatpush3.bf16.msra.mxu1 %v18043_v38 }
 0x376   : > { %13989 = vmatprep.subr.bf16.mxu1 %v18044_v26 }
 0x379   : > { %13991 = vmatpush3.bf16.msra.mxu1 %v18044_v26 }
 0x37c   : > { %12197 = vmatmul.mubr.f32.vlgmr.msra.gmra.mrb[0].mxu1 %v16483_v24 }
 0x37d   : > { %12199 = vmatprep.mubr.f32.mxu1 %v16509_v28 }
 0x380   : > { %12200 = vmatmul.mubr.f32.gmra.mrb[2].mxu1 %v16503_v7 }
 0x381   : > { %12202 = vmatprep.mubr.f32.mxu1 %v16537_v11 }
 0x384   : > { %12203 = vmatmul.mubr.f32.gmra.mrb[4].mxu1 %v16531_v43 }
 0x385   : > { %12205 = vmatprep.mubr.f32.mxu1 %v16562_v41  ;;  %v18070_v41 = vld [vmem:[#allocation46_spill] sm:$0xff] }
 0x388   : > { %12206 = vmatmul.mubr.f32.gmra.mrb[6].mxu1 %v16559_v55 }
 0x44f   : > { %v12198_v15 = vpop.f32.mrb[0].mxu1 }
 0x450   : > { %v14280_v16 = vadd.f32 1e-05, %v12198_v15  ;;  %v2469_v23 = vpop.f32.mrb[1].mxu1 }
 0x451   : > { %v14281_v35 = vadd.f32 1e-05, %v2469_v23 }
 0x452   : > { %14717 = vrsqrt.f32 %v14280_v16 }
 0x453   : > { %14719 = vrsqrt.f32 %v14281_v35  ;;  %v12201_v57 = vpop.f32.mrb[2].mxu1 }
 0x454   : > { %v14282_v58 = vadd.f32 1e-05, %v12201_v57  ;;  %v2481_v20 = vpop.f32.mrb[3].mxu1 }
 0x455   : > { %v14283_v1 = vadd.f32 1e-05, %v2481_v20 }
 0x456   : > { %14721 = vrsqrt.f32 %v14282_v58 }
 0x457   : > { %14723 = vrsqrt.f32 %v14283_v1  ;;  %v12204_v3 = vpop.f32.mrb[4].mxu1 }
 0x458   : > { %v14284_v48 = vadd.f32 1e-05, %v12204_v3  ;;  %v2493_v63 = vpop.f32.mrb[5].mxu1 }
 0x459   : > { %v14285_v29 = vadd.f32 1e-05, %v2493_v63 }
 0x45a   : > { %14725 = vrsqrt.f32 %v14284_v48 }
 0x45b   : > { %14727 = vrsqrt.f32 %v14285_v29  ;;  %v12207_v30 = vpop.f32.mrb[6].mxu1 }
 0x45c   : > { %v14718_v33 = vpop.eup %14717  ;;  %v14286_v4 = vadd.f32 1e-05, %v12207_v30  ;;  %v2505_v47 = vpop.f32.mrb[7].mxu1 }
 0x45d   : > { %v14720_v0 = vpop.eup %14719  ;;  %v2524_v13 = vmul.f32 %v14718_v33, %v16474_v8  ;;  %v14287_v36 = vadd.f32 1e-05, %v2505_v47 }
 0x45e   : > { %v2523_v38 = vmul.f32 %v14720_v0, %v16477_v61  ;;  %14729 = vrsqrt.f32 %v14286_v4 }
 0x45f   : > { %v2538_v26 = vmul.f32 %v10217_v34, %v2524_v13  ;;  %14731 = vrsqrt.f32 %v14287_v36 }
 0x460   : > { %v14722_v17 = vpop.eup %14721  ;;  %v2537_v45 = vmul.f32 %v10217_v34, %v2523_v38 }
 0x461   : > { %v14724_v24 = vpop.eup %14723  ;;  %v2552_v19 = vadd.f32 %v10218_v27, %v2538_v26  ;;  %v2526_v21 = vmul.f32 %v14722_v17, %v16486_v46 }
 0x462   : > { %v2551_v6 = vadd.f32 %v10218_v27, %v2537_v45  ;;  %v2525_v7 = vmul.f32 %v14724_v24, %v16491_v12  ;;  %v18069_v12 = vld [vmem:[#allocation32_spill] sm:$0xff] }
 0x463   : > { %2562 = vst [vmem:[#allocation2 + $0x43] sm:$0xff] %v2552_v19  ;;  %v2540_v28 = vmul.f32 %v10217_v34, %v2526_v21 }
 0x464   : > { %v14726_v59 = vpop.eup %14725  ;;  %2560 = vst [vmem:[#allocation2 + $0x33] sm:$0xff] %v2551_v6  ;;  %v2539_v8 = vmul.f32 %v10217_v34, %v2525_v7 }
 0x465   : > { %v14728_v22 = vpop.eup %14727  ;;  %v2554_v43 = vadd.f32 %v10218_v27, %v2540_v28  ;;  %v2528_v61 = vmul.f32 %v14726_v59, %v16506_v51 }
 0x466   : > { %v2553_v14 = vadd.f32 %v10218_v27, %v2539_v8  ;;  %v2527_v11 = vmul.f32 %v14728_v22, %v16512_v32 }
 0x467   : > { %2566 = vst [vmem:[#allocation2 + $0x63] sm:$0xff] %v2554_v43  ;;  %v2542_v49 = vmul.f32 %v10217_v34, %v2528_v61 }
 0x468   : > { %v14730_v42 = vpop.eup %14729  ;;  %2564 = vst [vmem:[#allocation2 + $0x53] sm:$0xff] %v2553_v14  ;;  %v2541_v46 = vmul.f32 %v10217_v34, %v2527_v11 }
 0x469   : > { %v14732_v52 = vpop.eup %14731  ;;  %v2556_v60 = vadd.f32 %v10218_v27, %v2542_v49  ;;  %v2530_v55 = vmul.f32 %v14730_v42, %v18069_v12 }
 0x46a   : > { %v2555_v62 = vadd.f32 %v10218_v27, %v2541_v46  ;;  %v2529_v9 = vmul.f32 %v14732_v52, %v18070_v41 }
 0x46b   : > { %2570 = vst [vmem:[#allocation2 + $0x83] sm:$0xff] %v2556_v60  ;;  %v2544_v25 = vmul.f32 %v10217_v34, %v2530_v55 }
 0x46c   : > { %2568 = vst [vmem:[#allocation2 + $0x73] sm:$0xff] %v2555_v62  ;;  %v2543_v40 = vmul.f32 %v10217_v34, %v2529_v9 }
 0x46d   : > { %v2558_v51 = vadd.f32 %v10218_v27, %v2544_v25 }
 0x46e   : > { %v2557_v44 = vadd.f32 %v10218_v27, %v2543_v40 }
 0x46f   : > { %2574 = vst [vmem:[#allocation2 + $0xa3] sm:$0xff] %v2558_v51 }
 0x470   : > { %2572 = vst [vmem:[#allocation2 + $0x93] sm:$0xff] %v2557_v44 }
 0x471 LB: >> { %v14733_v32 = vld [vmem:[#allocation3 + $0x400] sm:$0xff]   ;;  %v15582_v53 = vmov 0.0   ;;  %v14734_v39 = vld [vmem:[#allocation3 + $0x408] sm:$0xff]   ;;  %vm15583_vm0 = vmmov 0   ;;  %v14735_v18 = vld [vmem:[#allocation3 + $0x410] sm:$0xff]   ;;  %s10221_s22 = sshll.u32 %s15562_s18, 4  ;;  %s15562_s18 = sphi %s16720_s18, %s2585_s18  }
 0x472   : >> { %12528 = vmatprep.subr.bf16.mxu0 %v15582_v53  ;;  %12208 = vmatprep.subr.bf16.mxu1 %v15582_v53  ;;  %v14736_v2 = vld [vmem:[#allocation3 + $0x418] sm:$0xff]   ;;  %v14737_v31 = vld [vmem:[#allocation3 + $0x420] sm:$0xff]   ;;  %v14738_v54 = vld [vmem:[#allocation3 + $0x428] sm:$0xff]   ;;  %s16738_s28 = scalar_lea.vmem [#allocation2], %s10221_s22  ;;  %s10219_s4 = sshll.u32 %s15562_s18, 3 }
 0x473   : >> { %12529 = vmatpush3.bf16.msra.mxu0 %v14733_v32  ;;  %12544 = vmatprep.mubr.msk.bf16.mxu0 %vm15583_vm0, %v15582_v53  ;;  %v14748_v37 = vld [vmem:[#allocation3] sm:$0xff]   ;;  %v14750_v50 = vld [vmem:[#allocation3 + $0x8] sm:$0xff]   ;;  %v14739_v56 = vld [vmem:[#allocation3 + $0x430] sm:$0xff]   ;;  %s2587_s13 = scalar_lea.vmem %s15963_s15, %s10219_s4  ;;  %s9993_s26 = scalar_lea.vmem %s15948_s27, %s10219_s4 }
 0x474   : >> { %12530 = vmatprep.subr.bf16.mxu0 %v15582_v53  ;;  %12224 = vmatprep.mubr.msk.bf16.mxu1 %vm15583_vm0, %v15582_v53  ;;  %v14752_v15 = vld [vmem:[#allocation3 + $0x10] sm:$0xff]   ;;  %v14740_v16 = vld [vmem:[#allocation3 + $0x438] sm:$0xff]   ;;  %v14741_v58 = vld [vmem:[#allocation3 + $0x440] sm:$0xff]   ;;  %s2585_s18 = sadd.s32 1, %s15562_s18  }
 0x475   : >> { %12209 = vmatpush3.bf16.msra.mxu1 %v14748_v37  ;;  %v14754_v35 = vld [vmem:[#allocation3 + $0x18] sm:$0xff]   ;;  %v14756_v20 = vld [vmem:[#allocation3 + $0x20] sm:$0xff]   ;;  %v14742_v1 = vld [vmem:[#allocation3 + $0x448] sm:$0xff]   ;;  %p2582_p1 = scmp.ge.s32.totalorder %s2585_s18, 8  }
 0x476   : >> { %12210 = vmatprep.subr.bf16.mxu1 %v15582_v53  ;;  %v14758_v3 = vld [vmem:[#allocation3 + $0x28] sm:$0xff]   ;;  %v14743_v48 = vld [vmem:[#allocation3 + $0x450] sm:$0xff]   ;;  %v14744_v29 = vld [vmem:[#allocation3 + $0x458] sm:$0xff]  }
 0x477   : >> { %12531 = vmatpush3.bf16.msra.mxu0 %v14734_v39  ;;  %v10338_v5 = vld [vmem:[%s16738_s28 + $0x20] sm:$0xff]  ;;  %v10339_v10 = vld [vmem:[%s16738_s28 + $0x28] sm:$0x3f]  ;;  %v14760_v63 = vld [vmem:[#allocation3 + $0x30] sm:$0xff]  }
 0x478   : >> { %12532 = vmatprep.subr.bf16.mxu0 %v15582_v53  ;;  %v16744_v23 = vpack.c.bf16 %v10339_v10, %v10338_v5  ;;  %v14762_v30 = vld [vmem:[#allocation3 + $0x38] sm:$0xff]   ;;  %v2598_v33 = vld [vmem:[%s16738_s28] sm:$0xff]  ;;  %v14746_v0 = vld [vmem:[#allocation3 + $0x468] sm:$0xff]  }
 0x479   : >> { %12211 = vmatpush3.bf16.msra.mxu1 %v14750_v50  ;;  %v14745_v34 = vld [vmem:[#allocation3 + $0x460] sm:$0xff]   ;;  %v2600_v4 = vpack.c.bf16 %v2598_v33, %v2598_v33  ;;  %v14766_v13 = vld [vmem:[#allocation3 + $0x48] sm:$0xff]   ;;  %v14747_v38 = vld [vmem:[#allocation3 + $0x470] sm:$0xff]  }
 0x47a   : >> { %12212 = vmatprep.subr.bf16.mxu1 %v15582_v53  ;;  %v4383_v57 = vrot.slane %v16744_v23, 1  ;;  %v14764_v47 = vld [vmem:[#allocation3 + $0x40] sm:$0xff]   ;;  %v16767_v36 = vshrl.u32 %v16744_v23, 16  ;;  %v16770_v27 = vshll.u32 %v16744_v23, 16  ;;  %v14768_v26 = vld [vmem:[#allocation3 + $0x50] sm:$0xff]   ;;  %v14749_v24 = vld [vmem:[#allocation3 + $0x478] sm:$0xff]  }
 0x47b   : >> { %12533 = vmatpush3.bf16.msra.mxu0 %v14735_v18  ;;  %v14770_v19 = vld [vmem:[#allocation3 + $0x58] sm:$0xff]   ;;  %v14751_v6 = vld [vmem:[#allocation3 + $0x480] sm:$0xff]   ;;  %v2599_v7 = vld [vmem:[%s16738_s28 + $0x8] sm:$0x3f]  ;;  %v4601_v51 = vrot.slane %v16744_v23, 2 }
 0x47c   : >> { %12534 = vmatprep.subr.bf16.mxu0 %v15582_v53  ;;  %v4491_v17 = vrot.slane %v16767_v36, 1  ;;  %v4492_v45 = vrot.slane %v16770_v27, 2  ;;  %v14772_v28 = vld [vmem:[#allocation3 + $0x60] sm:$0xff]   ;;  %v14753_v59 = vld [vmem:[#allocation3 + $0x488] sm:$0xff]   ;;  %v16781_v8 = vpack.c.bf16 %v2599_v7, %v2598_v33  ;;  %v14755_v43 = vld [vmem:[#allocation3 + $0x490] sm:$0xff]   ;;  %v4819_v7 = vrot.slane %v16744_v23, 3 }
 0x47d   : >> { %12213 = vmatpush3.bf16.msra.mxu1 %v14752_v15  ;;  %v14774_v22 = vld [vmem:[#allocation3 + $0x68] sm:$0xff]   ;;  %v14776_v14 = vld [vmem:[#allocation3 + $0x70] sm:$0xff]   ;;  %v14757_v11 = vld [vmem:[#allocation3 + $0x498] sm:$0xff]  }
 0x47e   : >> { %12214 = vmatprep.subr.bf16.mxu1 %v15582_v53  ;;  %v4493_v21 = vor.u32 %v4492_v45, %v4491_v17  ;;  %v16788_v61 = vshll.u32 %v16781_v8, 16  ;;  %v16793_v49 = vshrl.u32 %v16781_v8, 16  ;;  %v14778_v46 = vld [vmem:[#allocation3 + $0x78] sm:$0xff]   ;;  %v14759_v52 = vld [vmem:[#allocation3 + $0x4a0] sm:$0xff]   ;;  %v14761_v55 = vld [vmem:[#allocation3 + $0x4a8] sm:$0xff]   ;;  %v2839_v50 = vrot.slane %v16781_v8, 1 }
 0x47f   : >> { %12535 = vmatpush3.bf16.msra.mxu0 %v14736_v2  ;;  %v14780_v12 = vld [vmem:[#allocation3 + $0x80] sm:$0xff]   ;;  %v14782_v62 = vld [vmem:[#allocation3 + $0x88] sm:$0xff]   ;;  %v14763_v41 = vld [vmem:[#allocation3 + $0x4b0] sm:$0xff]  }
 0x480   : >> { %12536 = vmatprep.subr.bf16.mxu0 %v15582_v53  ;;  %v2729_v42 = vrot.slane %v16788_v61, 1  ;;  %v14784_v9 = vld [vmem:[#allocation3 + $0x90] sm:$0xff]   ;;  %v14765_v25 = vld [vmem:[#allocation3 + $0x4b8] sm:$0xff]   ;;  %v14767_v44 = vld [vmem:[#allocation3 + $0x4c0] sm:$0xff]  }
 0x481   : >> { %12215 = vmatpush3.bf16.msra.mxu1 %v14754_v35  ;;  %v14786_v40 = vld [vmem:[#allocation3 + $0x98] sm:$0xff]   ;;  %v14788_v32 = vld [vmem:[#allocation3 + $0xa0] sm:$0xff]   ;;  %v14769_v39 = vld [vmem:[#allocation3 + $0x4c8] sm:$0xff]   ;;  %v4709_v35 = vrot.slane %v16767_v36, 2 }
 0x482   : >> { %12216 = vmatprep.subr.bf16.mxu1 %v15582_v53  ;;  %v2730_v60 = vor.u32 %v2729_v42, %v16793_v49  ;;  %v14790_v18 = vld [vmem:[#allocation3 + $0xa8] sm:$0xff]   ;;  %v14771_v2 = vld [vmem:[#allocation3 + $0x4d0] sm:$0xff]   ;;  %v14773_v37 = vld [vmem:[#allocation3 + $0x4d8] sm:$0xff]  }
 0x483   : >> { %12537 = vmatpush3.bf16.msra.mxu0 %v14737_v31  ;;  %v14792_v31 = vld [vmem:[#allocation3 + $0xb0] sm:$0xff]   ;;  %v14796_v5 = vld [vmem:[#allocation3 + $0xc0] sm:$0xff]   ;;  %v14777_v10 = vld [vmem:[#allocation3 + $0x4e8] sm:$0xff]  }
 0x484   : >> { %12538 = vmatprep.subr.bf16.mxu0 %v15582_v53  ;;  %v14798_v15 = vld [vmem:[#allocation3 + $0xc8] sm:$0xff]   ;;  %v14787_v33 = vld [vmem:[#allocation3 + $0x510] sm:$0xff]   ;;  %v14812_v17 = vld [vmem:[#allocation3 + $0x100] sm:$0xff]  }
 0x485   : >> { %12217 = vmatpush3.bf16.msra.mxu1 %v14756_v20  ;;  %v14781_v20 = vld [vmem:[#allocation3 + $0x4f8] sm:$0xff]   ;;  %v14793_v45 = vld [vmem:[#allocation3 + $0x528] sm:$0xff]  }
 0x486   : >> { %12218 = vmatprep.subr.bf16.mxu1 %v15582_v53  ;;  %v14822_v23 = vld [vmem:[#allocation3 + $0x128] sm:$0xff]   ;;  %v14805_v42 = vld [vmem:[#allocation3 + $0x558] sm:$0xff]  }
 0x487   : >> { %12539 = vmatpush3.bf16.msra.mxu0 %v14738_v54  ;;  %v14794_v54 = vld [vmem:[#allocation3 + $0xb8] sm:$0xff]  }
 0x488   : >> { %12540 = vmatprep.subr.bf16.mxu0 %v15582_v53 }
 0x489   : >> { %12219 = vmatpush3.bf16.msra.mxu1 %v14758_v3  ;;  %v14783_v3 = vld [vmem:[#allocation3 + $0x500] sm:$0xff]  }
 0x48a   : >> { %12220 = vmatprep.subr.bf16.mxu1 %v15582_v53 }
 0x48b   : >> { %12541 = vmatpush3.bf16.msra.mxu0 %v14739_v56  ;;  %v14775_v56 = vld [vmem:[#allocation3 + $0x4e0] sm:$0xff]  }
 0x48c   : >> { %12542 = vmatprep.subr.bf16.mxu0 %v15582_v53 }
 0x48d   : >> { %12221 = vmatpush3.bf16.msra.mxu1 %v14760_v63  ;;  %v14804_v63 = vld [vmem:[#allocation3 + $0xe0] sm:$0xff]  }
 0x48e   : >> { %12222 = vmatprep.subr.bf16.mxu1 %v15582_v53 }
 0x48f   : >> { %12543 = vmatpush3.bf16.msra.mxu0 %v14740_v16  ;;  %v14779_v16 = vld [vmem:[#allocation3 + $0x4f0] sm:$0xff]  }
 0x490   : >> { %12548 = vmatprep.subr.bf16.mxu0 %v15582_v53 }
 0x491   : >> { %12223 = vmatpush3.bf16.msra.mxu1 %v14762_v30  ;;  %v14806_v30 = vld [vmem:[#allocation3 + $0xe8] sm:$0xff]  }
 0x492   : >> { %12545 = vmatmul.mubr.bf16.vlgmr.msra.gmra.mrb[0].mxu0 %v4383_v57  ;;  %12228 = vmatprep.subr.bf16.mxu1 %v15582_v53  ;;  %v4710_v57 = vrot.slane %v16770_v27, 3 }
 0x493   : >> { %12549 = vmatpush3.bf16.msra.mxu0 %v14741_v58  ;;  %12564 = vmatprep.mubr.msk.bf16.mxu0 %vm15583_vm0, %v15582_v53  ;;  %v14800_v58 = vld [vmem:[#allocation3 + $0xd0] sm:$0xff]  }
 0x494   : >> { %12550 = vmatprep.subr.bf16.mxu0 %v15582_v53  ;;  %12225 = vmatmul.mubr.bf16.vlgmr.msra.gmra.mrb[0].mxu1 %v2600_v4  ;;  %v2947_v4 = vrot.slane %v16793_v49, 1 }
 0x495   : >> { %12229 = vmatpush3.bf16.msra.mxu1 %v14764_v47  ;;  %12244 = vmatprep.mubr.msk.bf16.mxu1 %vm15583_vm0, %v15582_v53  ;;  %v2948_v47 = vrot.slane %v16788_v61, 2 }
 0x496   : >> { %12230 = vmatprep.subr.bf16.mxu1 %v15582_v53 }
 0x497   : >> { %12551 = vmatpush3.bf16.msra.mxu0 %v14742_v1  ;;  %v14802_v1 = vld [vmem:[#allocation3 + $0xd8] sm:$0xff]  }
 0x498   : >> { %12552 = vmatprep.subr.bf16.mxu0 %v15582_v53 }
 0x499   : >> { %12231 = vmatpush3.bf16.msra.mxu1 %v14766_v13  ;;  %v14810_v13 = vld [vmem:[#allocation3 + $0xf8] sm:$0xff]  }
 0x49a   : >> { %12232 = vmatprep.subr.bf16.mxu1 %v15582_v53 }
 0x49b   : >> { %12553 = vmatpush3.bf16.msra.mxu0 %v14743_v48  ;;  %v4711_v48 = vor.u32 %v4710_v57, %v4709_v35 }
 0x49c   : >> { %12554 = vmatprep.subr.bf16.mxu0 %v15582_v53 }
 0x49d   : >> { %12233 = vmatpush3.bf16.msra.mxu1 %v14768_v26  ;;  %v2949_v26 = vor.u32 %v2948_v47, %v2947_v4  ;;  %v14833_v4 = vld [vmem:[#allocation3 + $0x5c8] sm:$0xff]  }
 0x49e   : >> { %12234 = vmatprep.subr.bf16.mxu1 %v15582_v53  ;;  %v14854_v47 = vld [vmem:[#allocation3 + $0x1a8] sm:$0xff]  }
 0x49f   : >> { %12555 = vmatpush3.bf16.msra.mxu0 %v14744_v29  ;;  %v14785_v29 = vld [vmem:[#allocation3 + $0x508] sm:$0xff]  }
 0x4a0   : >> { %12556 = vmatprep.subr.bf16.mxu0 %v15582_v53 }
 0x4a1   : >> { %12235 = vmatpush3.bf16.msra.mxu1 %v14770_v19  ;;  %v14795_v19 = vld [vmem:[#allocation3 + $0x530] sm:$0xff]  }
 0x4a2   : >> { %12236 = vmatprep.subr.bf16.mxu1 %v15582_v53 }
 0x4a3   : >> { %12557 = vmatpush3.bf16.msra.mxu0 %v14745_v34  ;;  %v14808_v34 = vld [vmem:[#allocation3 + $0xf0] sm:$0xff]  }
 0x4a4   : >> { %12558 = vmatprep.subr.bf16.mxu0 %v15582_v53 }
 0x4a5   : >> { %12237 = vmatpush3.bf16.msra.mxu1 %v14772_v28  ;;  %v14818_v28 = vld [vmem:[#allocation3 + $0x118] sm:$0xff]  }
 0x4a6   : >> { %12238 = vmatprep.subr.bf16.mxu1 %v15582_v53 }
 0x4a7   : >> { %12559 = vmatpush3.bf16.msra.mxu0 %v14746_v0  ;;  %v14789_v0 = vld [vmem:[#allocation3 + $0x518] sm:$0xff]  }
 0x4a8   : >> { %12560 = vmatprep.subr.bf16.mxu0 %v15582_v53 }
 0x4a9   : >> { %12239 = vmatpush3.bf16.msra.mxu1 %v14774_v22  ;;  %v14820_v22 = vld [vmem:[#allocation3 + $0x120] sm:$0xff]  }
 0x4aa   : >> { %12240 = vmatprep.subr.bf16.mxu1 %v15582_v53 }
 0x4ab   : >> { %12561 = vmatpush3.bf16.msra.mxu0 %v14747_v38  ;;  %v14791_v38 = vld [vmem:[#allocation3 + $0x520] sm:$0xff]  }
 0x4ac   : >> { %12562 = vmatprep.subr.bf16.mxu0 %v15582_v53 }
 0x4ad   : >> { %12241 = vmatpush3.bf16.msra.mxu1 %v14776_v14  ;;  %v14803_v14 = vld [vmem:[#allocation3 + $0x550] sm:$0xff]  }
 0x4ae   : >> { %12242 = vmatprep.subr.bf16.mxu1 %v15582_v53 }
 0x4af   : >> { %12563 = vmatpush3.bf16.msra.mxu0 %v14749_v24  ;;  %v14814_v24 = vld [vmem:[#allocation3 + $0x108] sm:$0xff]  }
 0x4b0   : >> { %12568 = vmatprep.subr.bf16.mxu0 %v15582_v53 }
 0x4b1   : >> { %12243 = vmatpush3.bf16.msra.mxu1 %v14778_v46  ;;  %v14826_v46 = vld [vmem:[#allocation3 + $0x138] sm:$0xff]  }
 0x4b2   : >> { %12565 = vmatmul.mubr.bf16.vlgmr.msra.gmra.mrb[0].mxu0 %v4493_v21  ;;  %12248 = vmatprep.subr.bf16.mxu1 %v15582_v53  ;;  %v14816_v21 = vld [vmem:[#allocation3 + $0x110] sm:$0xff]  }
 0x4b3   : >> { %12569 = vmatpush3.bf16.msra.mxu0 %v14751_v6  ;;  %12584 = vmatprep.mubr.msk.bf16.mxu0 %vm15583_vm0, %v15582_v53  ;;  %v14797_v6 = vld [vmem:[#allocation3 + $0x538] sm:$0xff]  }
 0x4b4   : >> { %12570 = vmatprep.subr.bf16.mxu0 %v15582_v53  ;;  %12245 = vmatmul.mubr.bf16.vlgmr.msra.gmra.mrb[0].mxu1 %v2730_v60  ;;  %v14807_v60 = vld [vmem:[#allocation3 + $0x560] sm:$0xff]  }
 0x4b5   : >> { %12249 = vmatpush3.bf16.msra.mxu1 %v14780_v12  ;;  %12264 = vmatprep.mubr.msk.bf16.mxu1 %vm15583_vm0, %v15582_v53  ;;  %v14828_v12 = vld [vmem:[#allocation3 + $0x140] sm:$0xff]  }
 0x4b6   : >> { %12250 = vmatprep.subr.bf16.mxu1 %v15582_v53 }
 0x4b7   : >> { %12571 = vmatpush3.bf16.msra.mxu0 %v14753_v59  ;;  %v14799_v59 = vld [vmem:[#allocation3 + $0x540] sm:$0xff]  }
 0x4b8   : >> { %12572 = vmatprep.subr.bf16.mxu0 %v15582_v53 }
 0x4b9   : >> { %12251 = vmatpush3.bf16.msra.mxu1 %v14782_v62  ;;  %v14830_v62 = vld [vmem:[#allocation3 + $0x148] sm:$0xff]  }
 0x4ba   : >> { %12252 = vmatprep.subr.bf16.mxu1 %v15582_v53 }
 0x4bb   : >> { %12573 = vmatpush3.bf16.msra.mxu0 %v14755_v43  ;;  %v14801_v43 = vld [vmem:[#allocation3 + $0x548] sm:$0xff]  }
 0x4bc   : >> { %12574 = vmatprep.subr.bf16.mxu0 %v15582_v53 }
 0x4bd   : >> { %12253 = vmatpush3.bf16.msra.mxu1 %v14784_v9  ;;  %v14832_v9 = vld [vmem:[#allocation3 + $0x150] sm:$0xff]  }
 0x4be   : >> { %12254 = vmatprep.subr.bf16.mxu1 %v15582_v53 }
 0x4bf   : >> { %12575 = vmatpush3.bf16.msra.mxu0 %v14757_v11  ;;  %v14824_v11 = vld [vmem:[#allocation3 + $0x130] sm:$0xff]  }
 0x4c0   : >> { %12576 = vmatprep.subr.bf16.mxu0 %v15582_v53 }
 0x4c1   : >> { %12255 = vmatpush3.bf16.msra.mxu1 %v14786_v40  ;;  %v10397_v40 = vld [vmem:[%s16738_s28 + $0x30] sm:$0xff] }
 0x4c2   : >> { %12256 = vmatprep.subr.bf16.mxu1 %v15582_v53 }
 0x4c3   : >> { %12577 = vmatpush3.bf16.msra.mxu0 %v14759_v52  ;;  %v3057_v52 = vrot.slane %v16781_v8, 2 }
 0x4c4   : >> { %12578 = vmatprep.subr.bf16.mxu0 %v15582_v53 }
 0x4c5   : >> { %12257 = vmatpush3.bf16.msra.mxu1 %v14788_v32  ;;  %v4915_v32 = vpack.c.bf16 %v10397_v40, %v10397_v40 }
 0x4c6   : >> { %12258 = vmatprep.subr.bf16.mxu1 %v15582_v53 }
 0x4c7   : >> { %12579 = vmatpush3.bf16.msra.mxu0 %v14761_v55  ;;  %v14809_v55 = vld [vmem:[#allocation3 + $0x568] sm:$0xff]  }
 0x4c8   : >> { %12580 = vmatprep.subr.bf16.mxu0 %v15582_v53 }
 0x4c9   : >> { %12259 = vmatpush3.bf16.msra.mxu1 %v14790_v18  ;;  %v14817_v18 = vld [vmem:[#allocation3 + $0x588] sm:$0xff]  }
 0x4ca   : >> { %12260 = vmatprep.subr.bf16.mxu1 %v15582_v53 }
 0x4cb   : >> { %12581 = vmatpush3.bf16.msra.mxu0 %v14763_v41  ;;  %v14811_v41 = vld [vmem:[#allocation3 + $0x570] sm:$0xff]  }
 0x4cc   : >> { %12582 = vmatprep.subr.bf16.mxu0 %v15582_v53 }
 0x4cd   : >> { %12261 = vmatpush3.bf16.msra.mxu1 %v14792_v31  ;;  %v14819_v31 = vld [vmem:[#allocation3 + $0x590] sm:$0xff]  }
 0x4ce   : >> { %12262 = vmatprep.subr.bf16.mxu1 %v15582_v53 }
 0x4cf   : >> { %12583 = vmatpush3.bf16.msra.mxu0 %v14765_v25  ;;  %v14813_v25 = vld [vmem:[#allocation3 + $0x578] sm:$0xff]  }
 0x4d0   : >> { %12588 = vmatprep.subr.bf16.mxu0 %v15582_v53 }
 0x4d1   : >> { %12263 = vmatpush3.bf16.msra.mxu1 %v14794_v54  ;;  %v3165_v54 = vrot.slane %v16793_v49, 2  ;;  %v14825_v49 = vld [vmem:[#allocation3 + $0x5a8] sm:$0xff]  }
 0x4d2   : >> { %12585 = vmatmul.mubr.bf16.vlgmr.msra.gmra.mrb[0].mxu0 %v4601_v51  ;;  %12268 = vmatprep.subr.bf16.mxu1 %v15582_v53  ;;  %v14834_v51 = vld [vmem:[#allocation3 + $0x158] sm:$0xff]  }
 0x4d3   : >> { %12589 = vmatpush3.bf16.msra.mxu0 %v14767_v44  ;;  %12604 = vmatprep.mubr.msk.bf16.mxu0 %vm15583_vm0, %v15582_v53  ;;  %v14815_v44 = vld [vmem:[#allocation3 + $0x580] sm:$0xff]  }
 0x4d4   : >> { %12590 = vmatprep.subr.bf16.mxu0 %v15582_v53  ;;  %12265 = vmatmul.mubr.bf16.vlgmr.msra.gmra.mrb[0].mxu1 %v2839_v50  ;;  %v3166_v50 = vrot.slane %v16788_v61, 3  ;;  %v14844_v61 = vld [vmem:[#allocation3 + $0x180] sm:$0xff]  }
 0x4d5   : >> { %12269 = vmatpush3.bf16.msra.mxu1 %v14796_v5  ;;  %12284 = vmatprep.mubr.msk.bf16.mxu1 %vm15583_vm0, %v15582_v53  ;;  %v10398_v5 = vld [vmem:[%s16738_s28 + $0x38] sm:$0x3f] }
 0x4d6   : >> { %12270 = vmatprep.subr.bf16.mxu1 %v15582_v53  ;;  %v16891_v35 = vpack.c.bf16 %v10398_v5, %v10397_v40 }
 0x4d7   : >> { %12591 = vmatpush3.bf16.msra.mxu0 %v14769_v39  ;;  %v14836_v39 = vld [vmem:[#allocation3 + $0x160] sm:$0xff]  }
 0x4d8   : >> { %12592 = vmatprep.subr.bf16.mxu0 %v15582_v53  ;;  %v16897_v57 = vshll.u32 %v16891_v35, 16 }
 0x4d9   : >> { %12271 = vmatpush3.bf16.msra.mxu1 %v14798_v15  ;;  %v14823_v15 = vld [vmem:[#allocation3 + $0x5a0] sm:$0xff]  }
 0x4da   : >> { %12272 = vmatprep.subr.bf16.mxu1 %v15582_v53 }
 0x4db   : >> { %12593 = vmatpush3.bf16.msra.mxu0 %v14771_v2  ;;  %v14838_v2 = vld [vmem:[#allocation3 + $0x168] sm:$0xff]  }
 0x4dc   : >> { %12594 = vmatprep.subr.bf16.mxu0 %v15582_v53 }
 0x4dd   : >> { %12273 = vmatpush3.bf16.msra.mxu1 %v14800_v58  ;;  %v14846_v58 = vld [vmem:[#allocation3 + $0x188] sm:$0xff]  }
 0x4de   : >> { %12274 = vmatprep.subr.bf16.mxu1 %v15582_v53 }
 0x4df   : >> { %12595 = vmatpush3.bf16.msra.mxu0 %v14773_v37  ;;  %v14840_v37 = vld [vmem:[#allocation3 + $0x170] sm:$0xff]  }
 0x4e0   : >> { %12596 = vmatprep.subr.bf16.mxu0 %v15582_v53 }
 0x4e1   : >> { %12275 = vmatpush3.bf16.msra.mxu1 %v14802_v1  ;;  %v16904_v1 = vshrl.u32 %v16891_v35, 16 }
 0x4e2   : >> { %12276 = vmatprep.subr.bf16.mxu1 %v15582_v53 }
 0x4e3   : >> { %12597 = vmatpush3.bf16.msra.mxu0 %v14775_v56  ;;  %v14821_v56 = vld [vmem:[#allocation3 + $0x598] sm:$0xff]   ;;  %v5263_v40 = vrot.slane %v16904_v1, 1 }
 0x4e4   : >> { %12598 = vmatprep.subr.bf16.mxu0 %v15582_v53 }
 0x4e5   : >> { %12277 = vmatpush3.bf16.msra.mxu1 %v14804_v63  ;;  %v14829_v63 = vld [vmem:[#allocation3 + $0x5b8] sm:$0xff]  }
 0x4e6   : >> { %12278 = vmatprep.subr.bf16.mxu1 %v15582_v53 }
 0x4e7   : >> { %12599 = vmatpush3.bf16.msra.mxu0 %v14777_v10  ;;  %v14842_v10 = vld [vmem:[#allocation3 + $0x178] sm:$0xff]  }
 0x4e8   : >> { %12600 = vmatprep.subr.bf16.mxu0 %v15582_v53 }
 0x4e9   : >> { %12279 = vmatpush3.bf16.msra.mxu1 %v14806_v30 }
 0x4ea   : >> { %12280 = vmatprep.subr.bf16.mxu1 %v15582_v53 }
 0x4eb   : >> { %12601 = vmatpush3.bf16.msra.mxu0 %v14779_v16  ;;  %v3167_v16 = vor.u32 %v3166_v50, %v3165_v54  ;;  %v14884_v54 = vld [vmem:[#allocation3 + $0x220] sm:$0xff]   ;;  %v14865_v50 = vld [vmem:[#allocation3 + $0x648] sm:$0xff]  }
 0x4ec   : >> { %12602 = vmatprep.subr.bf16.mxu0 %v15582_v53 }
 0x4ed   : >> { %12281 = vmatpush3.bf16.msra.mxu1 %v14808_v34  ;;  %v14852_v34 = vld [vmem:[#allocation3 + $0x1a0] sm:$0xff]  }
 0x4ee   : >> { %12282 = vmatprep.subr.bf16.mxu1 %v15582_v53 }
 0x4ef   : >> { %12603 = vmatpush3.bf16.msra.mxu0 %v14781_v20  ;;  %v14827_v20 = vld [vmem:[#allocation3 + $0x5b0] sm:$0xff]  }
 0x4f0   : >> { %12608 = vmatprep.subr.bf16.mxu0 %v15582_v53 }
 0x4f1   : >> { %12283 = vmatpush3.bf16.msra.mxu1 %v14810_v13  ;;  %v14856_v13 = vld [vmem:[#allocation3 + $0x1b0] sm:$0xff]  }
 0x4f2   : >> { %12605 = vmatmul.mubr.bf16.vlgmr.msra.gmra.mrb[0].mxu0 %v4711_v48  ;;  %12288 = vmatprep.subr.bf16.mxu1 %v15582_v53  ;;  %v5045_v48 = vrot.slane %v16897_v57, 1 }
 0x4f3   : >> { %12609 = vmatpush3.bf16.msra.mxu0 %v14783_v3  ;;  %12624 = vmatprep.mubr.msk.bf16.mxu0 %vm15583_vm0, %v15582_v53  ;;  %v14848_v3 = vld [vmem:[#allocation3 + $0x190] sm:$0xff]  }
 0x4f4   : >> { %12610 = vmatprep.subr.bf16.mxu0 %v15582_v53  ;;  %12285 = vmatmul.mubr.bf16.vlgmr.msra.gmra.mrb[0].mxu1 %v2949_v26  ;;  %v5046_v30 = vor.u32 %v5045_v48, %v16904_v1  ;;  %v14858_v26 = vld [vmem:[#allocation3 + $0x1b8] sm:$0xff]   ;;  %v14892_v48 = vld [vmem:[#allocation3 + $0x240] sm:$0xff]  }
 0x4f5   : >> { %12289 = vmatpush3.bf16.msra.mxu1 %v14812_v17  ;;  %12304 = vmatprep.mubr.msk.bf16.mxu1 %vm15583_vm0, %v15582_v53  ;;  %v3275_v17 = vrot.slane %v16781_v8, 3  ;;  %v14864_v8 = vld [vmem:[#allocation3 + $0x1d0] sm:$0xff]  }
 0x4f6   : >> { %12290 = vmatprep.subr.bf16.mxu1 %v15582_v53 }
 0x4f7   : >> { %12611 = vmatpush3.bf16.msra.mxu0 %v14785_v29  ;;  %v14850_v29 = vld [vmem:[#allocation3 + $0x198] sm:$0xff]  }
 0x4f8   : >> { %12612 = vmatprep.subr.bf16.mxu0 %v15582_v53 }
 0x4f9   : >> { %12291 = vmatpush3.bf16.msra.mxu1 %v14814_v24  ;;  %v14860_v24 = vld [vmem:[#allocation3 + $0x1c0] sm:$0xff]  }
 0x4fa   : >> { %12292 = vmatprep.subr.bf16.mxu1 %v15582_v53 }
 0x4fb   : >> { %12613 = vmatpush3.bf16.msra.mxu0 %v14787_v33  ;;  %v14831_v33 = vld [vmem:[#allocation3 + $0x5c0] sm:$0xff]  }
 0x4fc   : >> { %12614 = vmatprep.subr.bf16.mxu0 %v15582_v53 }
 0x4fd   : >> { %12293 = vmatpush3.bf16.msra.mxu1 %v14816_v21  ;;  %v14862_v21 = vld [vmem:[#allocation3 + $0x1c8] sm:$0xff]  }
 0x4fe   : >> { %12294 = vmatprep.subr.bf16.mxu1 %v15582_v53 }
 0x4ff   : >> { %12615 = vmatpush3.bf16.msra.mxu0 %v14789_v0  ;;  %v14835_v0 = vld [vmem:[#allocation3 + $0x5d0] sm:$0xff]  }
 0x500   : >> { %12616 = vmatprep.subr.bf16.mxu0 %v15582_v53 }
 0x501   : >> { %12295 = vmatpush3.bf16.msra.mxu1 %v14818_v28  ;;  %v5155_v28 = vrot.slane %v16891_v35, 1 }
 0x502   : >> { %12296 = vmatprep.subr.bf16.mxu1 %v15582_v53 }
 0x503   : >> { %12617 = vmatpush3.bf16.msra.mxu0 %v14791_v38  ;;  %v14837_v38 = vld [vmem:[#allocation3 + $0x5d8] sm:$0xff]  }
 0x504   : >> { %12618 = vmatprep.subr.bf16.mxu0 %v15582_v53 }
 0x505   : >> { %12297 = vmatpush3.bf16.msra.mxu1 %v14820_v22  ;;  %v14847_v22 = vld [vmem:[#allocation3 + $0x600] sm:$0xff]  }
 0x506   : >> { %12298 = vmatprep.subr.bf16.mxu1 %v15582_v53 }
 0x507   : >> { %12619 = vmatpush3.bf16.msra.mxu0 %v14793_v45  ;;  %v14839_v45 = vld [vmem:[#allocation3 + $0x5e0] sm:$0xff]  }
 0x508   : >> { %12620 = vmatprep.subr.bf16.mxu0 %v15582_v53 }
 0x509   : >> { %12299 = vmatpush3.bf16.msra.mxu1 %v14822_v23  ;;  %v14849_v23 = vld [vmem:[#allocation3 + $0x608] sm:$0xff]  }
 0x50a   : >> { %12300 = vmatprep.subr.bf16.mxu1 %v15582_v53 }
 0x50b   : >> { %12621 = vmatpush3.bf16.msra.mxu0 %v14795_v19  ;;  %v14841_v19 = vld [vmem:[#allocation3 + $0x5e8] sm:$0xff]  }
 0x50c   : >> { %12622 = vmatprep.subr.bf16.mxu0 %v15582_v53 }
 0x50d   : >> { %12301 = vmatpush3.bf16.msra.mxu1 %v14824_v11  ;;  %v14851_v11 = vld [vmem:[#allocation3 + $0x610] sm:$0xff]  }
 0x50e   : >> { %12302 = vmatprep.subr.bf16.mxu1 %v15582_v53 }
 0x50f   : >> { %12623 = vmatpush3.bf16.msra.mxu0 %v14797_v6  ;;  %v14843_v6 = vld [vmem:[#allocation3 + $0x5f0] sm:$0xff]  }
 0x510   : >> { %12628 = vmatprep.subr.bf16.mxu0 %v15582_v53 }
 0x511   : >> { %12303 = vmatpush3.bf16.msra.mxu1 %v14826_v46  ;;  %v14853_v46 = vld [vmem:[#allocation3 + $0x618] sm:$0xff]  }
 0x512   : >> { %12625 = vmatmul.mubr.bf16.vlgmr.msra.gmra.mrb[0].mxu0 %v4819_v7  ;;  %12308 = vmatprep.subr.bf16.mxu1 %v15582_v53  ;;  %v14845_v7 = vld [vmem:[#allocation3 + $0x5f8] sm:$0xff]  }
 0x513   : >> { %12629 = vmatpush3.bf16.msra.mxu0 %v14799_v59  ;;  %12644 = vmatprep.mubr.msk.bf16.mxu0 %vm15583_vm0, %v15582_v53  ;;  %v14866_v59 = vld [vmem:[#allocation3 + $0x1d8] sm:$0xff]  }
 0x514   : >> { %12630 = vmatprep.subr.bf16.mxu0 %v15582_v53  ;;  %12305 = vmatmul.mubr.bf16.vlgmr.msra.gmra.mrb[0].mxu1 %v3057_v52  ;;  %v14874_v52 = vld [vmem:[#allocation3 + $0x1f8] sm:$0xff]  }
 0x515   : >> { %12309 = vmatpush3.bf16.msra.mxu1 %v14828_v12  ;;  %12324 = vmatprep.mubr.msk.bf16.mxu1 %vm15583_vm0, %v15582_v53  ;;  %v14855_v12 = vld [vmem:[#allocation3 + $0x620] sm:$0xff]  }
 0x516   : >> { %12310 = vmatprep.subr.bf16.mxu1 %v15582_v53 }
 0x517   : >> { %12631 = vmatpush3.bf16.msra.mxu0 %v14801_v43  ;;  %v14868_v43 = vld [vmem:[#allocation3 + $0x1e0] sm:$0xff]  }
 0x518   : >> { %12632 = vmatprep.subr.bf16.mxu0 %v15582_v53 }
 0x519   : >> { %12311 = vmatpush3.bf16.msra.mxu1 %v14830_v62  ;;  %v14876_v62 = vld [vmem:[#allocation3 + $0x200] sm:$0xff]  }
 0x51a   : >> { %12312 = vmatprep.subr.bf16.mxu1 %v15582_v53 }
 0x51b   : >> { %12633 = vmatpush3.bf16.msra.mxu0 %v14803_v14  ;;  %v14870_v14 = vld [vmem:[#allocation3 + $0x1e8] sm:$0xff]  }
 0x51c   : >> { %12634 = vmatprep.subr.bf16.mxu0 %v15582_v53 }
 0x51d   : >> { %12313 = vmatpush3.bf16.msra.mxu1 %v14832_v9  ;;  %v14878_v9 = vld [vmem:[#allocation3 + $0x208] sm:$0xff]  }
 0x51e   : >> { %12314 = vmatprep.subr.bf16.mxu1 %v15582_v53 }
 0x51f   : >> { %12635 = vmatpush3.bf16.msra.mxu0 %v14805_v42  ;;  %v14872_v42 = vld [vmem:[#allocation3 + $0x1f0] sm:$0xff]  }
 0x520   : >> { %12636 = vmatprep.subr.bf16.mxu0 %v15582_v53 }
 0x521   : >> { %12315 = vmatpush3.bf16.msra.mxu1 %v14834_v51  ;;  %v5264_v51 = vrot.slane %v16897_v57, 2 }
 0x522   : >> { %12316 = vmatprep.subr.bf16.mxu1 %v15582_v53 }
 0x523   : >> { %12637 = vmatpush3.bf16.msra.mxu0 %v14807_v60  ;;  %v10279_v60 = vld [vmem:[%s16738_s28 + $0x10] sm:$0xff] }
 0x524   : >> { %12638 = vmatprep.subr.bf16.mxu0 %v15582_v53 }
 0x525   : >> { %12317 = vmatpush3.bf16.msra.mxu1 %v14836_v39  ;;  %v10280_v39 = vld [vmem:[%s16738_s28 + $0x18] sm:$0x3f] }
 0x526   : >> { %12318 = vmatprep.subr.bf16.mxu1 %v15582_v53 }
 0x527   : >> { %12639 = vmatpush3.bf16.msra.mxu0 %v14809_v55  ;;  %v3371_v55 = vpack.c.bf16 %v10279_v60, %v10279_v60 }
 0x528   : >> { %12640 = vmatprep.subr.bf16.mxu0 %v15582_v53 }
 0x529   : >> { %12319 = vmatpush3.bf16.msra.mxu1 %v14838_v2  ;;  %v14863_v2 = vld [vmem:[#allocation3 + $0x640] sm:$0xff]  }
 0x52a   : >> { %12320 = vmatprep.subr.bf16.mxu1 %v15582_v53 }
 0x52b   : >> { %12641 = vmatpush3.bf16.msra.mxu0 %v14811_v41  ;;  %v14857_v41 = vld [vmem:[#allocation3 + $0x628] sm:$0xff]  }
 0x52c   : >> { %12642 = vmatprep.subr.bf16.mxu0 %v15582_v53 }
 0x52d   : >> { %12321 = vmatpush3.bf16.msra.mxu1 %v14840_v37  ;;  %v16958_v37 = vpack.c.bf16 %v10280_v39, %v10279_v60  ;;  %v14897_v60 = vld [vmem:[#allocation3 + $0x6c8] sm:$0xff]   ;;  %v14907_v39 = vld [vmem:[#allocation3 + $0x6f0] sm:$0xff]  }
 0x52e   : >> { %12322 = vmatprep.subr.bf16.mxu1 %v15582_v53 }
 0x52f   : >> { %12643 = vmatpush3.bf16.msra.mxu0 %v14813_v25  ;;  %v14859_v25 = vld [vmem:[#allocation3 + $0x630] sm:$0xff]   ;;  %v16965_v5 = vshll.u32 %v16958_v37, 16 }
 0x530   : >> { %12648 = vmatprep.subr.bf16.mxu0 %v15582_v53 }
 0x531   : >> { %12323 = vmatpush3.bf16.msra.mxu1 %v14842_v10  ;;  %v14867_v10 = vld [vmem:[#allocation3 + $0x650] sm:$0xff]  }
 0x532   : >> { %12645 = vmatmul.mubr.bf16.vlgmr.msra.gmra.mrb[0].mxu0 %v4915_v32  ;;  %12328 = vmatprep.subr.bf16.mxu1 %v15582_v53  ;;  %v14861_v32 = vld [vmem:[#allocation3 + $0x638] sm:$0xff]  }
 0x533   : >> { %12649 = vmatpush3.bf16.msra.mxu0 %v14815_v44  ;;  %12664 = vmatprep.mubr.msk.bf16.mxu0 %vm15583_vm0, %v15582_v53  ;;  %v14880_v44 = vld [vmem:[#allocation3 + $0x210] sm:$0xff]  }
 0x534   : >> { %12650 = vmatprep.subr.bf16.mxu0 %v15582_v53  ;;  %12325 = vmatmul.mubr.bf16.vlgmr.msra.gmra.mrb[0].mxu1 %v3167_v16  ;;  %v16970_v16 = vshrl.u32 %v16958_v37, 16 }
 0x535   : >> { %12329 = vmatpush3.bf16.msra.mxu1 %v14844_v61  ;;  %12344 = vmatprep.mubr.msk.bf16.mxu1 %vm15583_vm0, %v15582_v53  ;;  %v3501_v61 = vrot.slane %v16965_v5, 1 }
 0x536   : >> { %12330 = vmatprep.subr.bf16.mxu1 %v15582_v53 }
 0x537   : >> { %12651 = vmatpush3.bf16.msra.mxu0 %v14817_v18  ;;  %v14882_v18 = vld [vmem:[#allocation3 + $0x218] sm:$0xff]  }
 0x538   : >> { %12652 = vmatprep.subr.bf16.mxu0 %v15582_v53 }
 0x539   : >> { %12331 = vmatpush3.bf16.msra.mxu1 %v14846_v58  ;;  %v14890_v58 = vld [vmem:[#allocation3 + $0x238] sm:$0xff]  }
 0x53a   : >> { %12332 = vmatprep.subr.bf16.mxu1 %v15582_v53 }
 0x53b   : >> { %12653 = vmatpush3.bf16.msra.mxu0 %v14819_v31  ;;  %v5265_v31 = vor.u32 %v5264_v51, %v5263_v40  ;;  %v14924_v51 = vld [vmem:[#allocation3 + $0x2c0] sm:$0xff]  }
 0x53c   : >> { %12654 = vmatprep.subr.bf16.mxu0 %v15582_v53 }
 0x53d   : >> { %12333 = vmatpush3.bf16.msra.mxu1 %v14848_v3  ;;  %v3502_v3 = vor.u32 %v3501_v61, %v16970_v16  ;;  %v14936_v61 = vld [vmem:[#allocation3 + $0x2f0] sm:$0xff]  }
 0x53e   : >> { %12334 = vmatprep.subr.bf16.mxu1 %v15582_v53 }
 0x53f   : >> { %12655 = vmatpush3.bf16.msra.mxu0 %v14821_v56  ;;  %v14886_v56 = vld [vmem:[#allocation3 + $0x228] sm:$0xff]  }
 0x540   : >> { %12656 = vmatprep.subr.bf16.mxu0 %v15582_v53 }
 0x541   : >> { %12335 = vmatpush3.bf16.msra.mxu1 %v14850_v29  ;;  %v14894_v29 = vld [vmem:[#allocation3 + $0x248] sm:$0xff]  }
 0x542   : >> { %12336 = vmatprep.subr.bf16.mxu1 %v15582_v53 }
 0x543   : >> { %12657 = vmatpush3.bf16.msra.mxu0 %v14823_v15  ;;  %v14888_v15 = vld [vmem:[#allocation3 + $0x230] sm:$0xff]  }
 0x544   : >> { %12658 = vmatprep.subr.bf16.mxu0 %v15582_v53 }
 0x545   : >> { %12337 = vmatpush3.bf16.msra.mxu1 %v14852_v34  ;;  %v14877_v34 = vld [vmem:[#allocation3 + $0x678] sm:$0xff]  }
 0x546   : >> { %12338 = vmatprep.subr.bf16.mxu1 %v15582_v53 }
 0x547   : >> { %12659 = vmatpush3.bf16.msra.mxu0 %v14825_v49  ;;  %v14869_v49 = vld [vmem:[#allocation3 + $0x658] sm:$0xff]  }
 0x548   : >> { %12660 = vmatprep.subr.bf16.mxu0 %v15582_v53 }
 0x549   : >> { %12339 = vmatpush3.bf16.msra.mxu1 %v14854_v47  ;;  %v5373_v47 = vrot.slane %v16891_v35, 2 }
 0x54a   : >> { %12340 = vmatprep.subr.bf16.mxu1 %v15582_v53 }
 0x54b   : >> { %12661 = vmatpush3.bf16.msra.mxu0 %v14827_v20  ;;  %v14871_v20 = vld [vmem:[#allocation3 + $0x660] sm:$0xff]  }
 0x54c   : >> { %12662 = vmatprep.subr.bf16.mxu0 %v15582_v53 }
 0x54d   : >> { %12341 = vmatpush3.bf16.msra.mxu1 %v14856_v13  ;;  %v14900_v13 = vld [vmem:[#allocation3 + $0x260] sm:$0xff]  }
 0x54e   : >> { %12342 = vmatprep.subr.bf16.mxu1 %v15582_v53 }
 0x54f   : >> { %12663 = vmatpush3.bf16.msra.mxu0 %v14829_v63  ;;  %v14873_v63 = vld [vmem:[#allocation3 + $0x668] sm:$0xff]  }
 0x550   : >> { %12668 = vmatprep.subr.bf16.mxu0 %v15582_v53 }
 0x551   : >> { %12343 = vmatpush3.bf16.msra.mxu1 %v14858_v26  ;;  %v14902_v26 = vld [vmem:[#allocation3 + $0x268] sm:$0xff]  }
 0x552   : >> { %12665 = vmatmul.mubr.bf16.vlgmr.msra.gmra.mrb[0].mxu0 %v5046_v30  ;;  %12348 = vmatprep.subr.bf16.mxu1 %v15582_v53  ;;  %v14875_v30 = vld [vmem:[#allocation3 + $0x670] sm:$0xff]  }
 0x553   : >> { %12669 = vmatpush3.bf16.msra.mxu0 %v14831_v33  ;;  %12684 = vmatprep.mubr.msk.bf16.mxu0 %vm15583_vm0, %v15582_v53  ;;  %v14896_v33 = vld [vmem:[#allocation3 + $0x250] sm:$0xff]  }
 0x554   : >> { %12670 = vmatprep.subr.bf16.mxu0 %v15582_v53  ;;  %12345 = vmatmul.mubr.bf16.vlgmr.msra.gmra.mrb[0].mxu1 %v3275_v17  ;;  %v14883_v17 = vld [vmem:[#allocation3 + $0x690] sm:$0xff]  }
 0x555   : >> { %12349 = vmatpush3.bf16.msra.mxu1 %v14860_v24  ;;  %12364 = vmatprep.mubr.msk.bf16.mxu1 %vm15583_vm0, %v15582_v53  ;;  %v14885_v24 = vld [vmem:[#allocation3 + $0x698] sm:$0xff]  }
 0x556   : >> { %12350 = vmatprep.subr.bf16.mxu1 %v15582_v53 }
 0x557   : >> { %12671 = vmatpush3.bf16.msra.mxu0 %v14833_v4  ;;  %v14898_v4 = vld [vmem:[#allocation3 + $0x258] sm:$0xff]  }
 0x558   : >> { %12672 = vmatprep.subr.bf16.mxu0 %v15582_v53 }
 0x559   : >> { %12351 = vmatpush3.bf16.msra.mxu1 %v14862_v21  ;;  %v3611_v21 = vrot.slane %v16958_v37, 1 }
 0x55a   : >> { %12352 = vmatprep.subr.bf16.mxu1 %v15582_v53 }
 0x55b   : >> { %12673 = vmatpush3.bf16.msra.mxu0 %v14835_v0  ;;  %v14879_v0 = vld [vmem:[#allocation3 + $0x680] sm:$0xff]  }
 0x55c   : >> { %12674 = vmatprep.subr.bf16.mxu0 %v15582_v53 }
 0x55d   : >> { %12353 = vmatpush3.bf16.msra.mxu1 %v14864_v8  ;;  %v14908_v8 = vld [vmem:[#allocation3 + $0x280] sm:$0xff]  }
 0x55e   : >> { %12354 = vmatprep.subr.bf16.mxu1 %v15582_v53 }
 0x55f   : >> { %12675 = vmatpush3.bf16.msra.mxu0 %v14837_v38  ;;  %v14881_v38 = vld [vmem:[#allocation3 + $0x688] sm:$0xff]  }
 0x560   : >> { %12676 = vmatprep.subr.bf16.mxu0 %v15582_v53 }
 0x561   : >> { %12355 = vmatpush3.bf16.msra.mxu1 %v14866_v59  ;;  %v14891_v59 = vld [vmem:[#allocation3 + $0x6b0] sm:$0xff]  }
 0x562   : >> { %12356 = vmatprep.subr.bf16.mxu1 %v15582_v53 }
 0x563   : >> { %12677 = vmatpush3.bf16.msra.mxu0 %v14839_v45  ;;  %v14904_v45 = vld [vmem:[#allocation3 + $0x270] sm:$0xff]  }
 0x564   : >> { %12678 = vmatprep.subr.bf16.mxu0 %v15582_v53 }
 0x565   : >> { %12357 = vmatpush3.bf16.msra.mxu1 %v14868_v43  ;;  %v14893_v43 = vld [vmem:[#allocation3 + $0x6b8] sm:$0xff]  }
 0x566   : >> { %12358 = vmatprep.subr.bf16.mxu1 %v15582_v53 }
 0x567   : >> { %12679 = vmatpush3.bf16.msra.mxu0 %v14841_v19  ;;  %v14906_v19 = vld [vmem:[#allocation3 + $0x278] sm:$0xff]  }
 0x568   : >> { %12680 = vmatprep.subr.bf16.mxu0 %v15582_v53 }
 0x569   : >> { %12359 = vmatpush3.bf16.msra.mxu1 %v14870_v14  ;;  %v5482_v14 = vrot.slane %v16897_v57, 3  ;;  %v14918_v57 = vld [vmem:[#allocation3 + $0x2a8] sm:$0xff]  }
 0x56a   : >> { %12360 = vmatprep.subr.bf16.mxu1 %v15582_v53 }
 0x56b   : >> { %12681 = vmatpush3.bf16.msra.mxu0 %v14843_v6  ;;  %v14887_v6 = vld [vmem:[#allocation3 + $0x6a0] sm:$0xff]  }
 0x56c   : >> { %12682 = vmatprep.subr.bf16.mxu0 %v15582_v53 }
 0x56d   : >> { %12361 = vmatpush3.bf16.msra.mxu1 %v14872_v42  ;;  %v14895_v42 = vld [vmem:[#allocation3 + $0x6c0] sm:$0xff]  }
 0x56e   : >> { %12362 = vmatprep.subr.bf16.mxu1 %v15582_v53 }
 0x56f   : >> { %12683 = vmatpush3.bf16.msra.mxu0 %v14845_v7  ;;  %v14889_v7 = vld [vmem:[#allocation3 + $0x6a8] sm:$0xff]  }
 0x570   : >> { %12688 = vmatprep.subr.bf16.mxu0 %v15582_v53 }
 0x571   : >> { %12363 = vmatpush3.bf16.msra.mxu1 %v14874_v52  ;;  %v14916_v52 = vld [vmem:[#allocation3 + $0x2a0] sm:$0xff]  }
 0x572   : >> { %12685 = vmatmul.mubr.bf16.vlgmr.msra.gmra.mrb[0].mxu0 %v5155_v28  ;;  %12368 = vmatprep.subr.bf16.mxu1 %v15582_v53  ;;  %v14910_v28 = vld [vmem:[#allocation3 + $0x288] sm:$0xff]  }
 0x573   : >> { %12689 = vmatpush3.bf16.msra.mxu0 %v14847_v22  ;;  %12704 = vmatprep.mubr.msk.bf16.mxu0 %vm15583_vm0, %v15582_v53  ;;  %v14912_v22 = vld [vmem:[#allocation3 + $0x290] sm:$0xff]  }
 0x574   : >> { %12690 = vmatprep.subr.bf16.mxu0 %v15582_v53  ;;  %12365 = vmatmul.mubr.bf16.vlgmr.msra.gmra.mrb[0].mxu1 %v3371_v55  ;;  %v3719_v55 = vrot.slane %v16970_v16, 1 }
 0x575   : >> { %12369 = vmatpush3.bf16.msra.mxu1 %v14876_v62  ;;  %12384 = vmatprep.mubr.msk.bf16.mxu1 %vm15583_vm0, %v15582_v53  ;;  %v3720_v62 = vrot.slane %v16965_v5, 2 }
 0x576   : >> { %12370 = vmatprep.subr.bf16.mxu1 %v15582_v53 }
 0x577   : >> { %12691 = vmatpush3.bf16.msra.mxu0 %v14849_v23  ;;  %v5481_v23 = vrot.slane %v16904_v1, 2  ;;  %v14899_v1 = vld [vmem:[#allocation3 + $0x6d0] sm:$0xff]   ;;  %v3721_v40 = vor.u32 %v3720_v62, %v3719_v55  ;;  %v14945_v55 = vld [vmem:[#allocation3 + $0x788] sm:$0xff]  }
 0x578   : >> { %12692 = vmatprep.subr.bf16.mxu0 %v15582_v53  ;;  %v14966_v62 = vld [vmem:[#allocation3 + $0x368] sm:$0xff]  }
 0x579   : >> { %12371 = vmatpush3.bf16.msra.mxu1 %v14878_v9  ;;  %v14922_v9 = vld [vmem:[#allocation3 + $0x2b8] sm:$0xff]  }
 0x57a   : >> { %12372 = vmatprep.subr.bf16.mxu1 %v15582_v53 }
 0x57b   : >> { %12693 = vmatpush3.bf16.msra.mxu0 %v14851_v11  ;;  %v14914_v11 = vld [vmem:[#allocation3 + $0x298] sm:$0xff]  }
 0x57c   : >> { %12694 = vmatprep.subr.bf16.mxu0 %v15582_v53 }
 0x57d   : >> { %12373 = vmatpush3.bf16.msra.mxu1 %v14880_v44  ;;  %v14905_v44 = vld [vmem:[#allocation3 + $0x6e8] sm:$0xff]  }
 0x57e   : >> { %12374 = vmatprep.subr.bf16.mxu1 %v15582_v53 }
 0x57f   : >> { %12695 = vmatpush3.bf16.msra.mxu0 %v14853_v46  ;;  %v5483_v46 = vor.u32 %v5482_v14, %v5481_v23  ;;  %v14939_v14 = vld [vmem:[#allocation3 + $0x770] sm:$0xff]  }
 0x580   : >> { %12696 = vmatprep.subr.bf16.mxu0 %v15582_v53 }
 0x581   : >> { %12375 = vmatpush3.bf16.msra.mxu1 %v14882_v18  ;;  %v14928_v18 = vld [vmem:[#allocation3 + $0x2d0] sm:$0xff]  }
 0x582   : >> { %12376 = vmatprep.subr.bf16.mxu1 %v15582_v53 }
 0x583   : >> { %12697 = vmatpush3.bf16.msra.mxu0 %v14855_v12  ;;  %v14920_v12 = vld [vmem:[#allocation3 + $0x2b0] sm:$0xff]  }
 0x584   : >> { %12698 = vmatprep.subr.bf16.mxu0 %v15582_v53 }
 0x585   : >> { %12377 = vmatpush3.bf16.msra.mxu1 %v14884_v54  ;;  %v5591_v54 = vrot.slane %v16891_v35, 3  ;;  %v14915_v35 = vld [vmem:[#allocation3 + $0x710] sm:$0xff]  }
 0x586   : >> { %12378 = vmatprep.subr.bf16.mxu1 %v15582_v53 }
 0x587   : >> { %12699 = vmatpush3.bf16.msra.mxu0 %v14857_v41  ;;  %v14901_v41 = vld [vmem:[#allocation3 + $0x6d8] sm:$0xff]  }
 0x588   : >> { %12700 = vmatprep.subr.bf16.mxu0 %v15582_v53 }
 0x589   : >> { %12379 = vmatpush3.bf16.msra.mxu1 %v14886_v56  ;;  %v14932_v56 = vld [vmem:[#allocation3 + $0x2e0] sm:$0xff]  }
 0x58a   : >> { %12380 = vmatprep.subr.bf16.mxu1 %v15582_v53 }
 0x58b   : >> { %12701 = vmatpush3.bf16.msra.mxu0 %v14859_v25  ;;  %v14903_v25 = vld [vmem:[#allocation3 + $0x6e0] sm:$0xff]  }
 0x58c   : >> { %12702 = vmatprep.subr.bf16.mxu0 %v15582_v53 }
 0x58d   : >> { %12381 = vmatpush3.bf16.msra.mxu1 %v14888_v15  ;;  %v14934_v15 = vld [vmem:[#allocation3 + $0x2e8] sm:$0xff]  }
 0x58e   : >> { %12382 = vmatprep.subr.bf16.mxu1 %v15582_v53 }
 0x58f   : >> { %12703 = vmatpush3.bf16.msra.mxu0 %v14861_v32  ;;  %v14926_v32 = vld [vmem:[#allocation3 + $0x2c8] sm:$0xff]  }
 0x590   : >> { %12708 = vmatprep.subr.bf16.mxu0 %v15582_v53 }
 0x591   : >> { %12383 = vmatpush3.bf16.msra.mxu1 %v14890_v58  ;;  %v14938_v58 = vld [vmem:[#allocation3 + $0x2f8] sm:$0xff]  }
 0x592   : >> { %12705 = vmatmul.mubr.bf16.vlgmr.msra.gmra.mrb[0].mxu0 %v5265_v31  ;;  %12388 = vmatprep.subr.bf16.mxu1 %v15582_v53  ;;  %v14930_v31 = vld [vmem:[#allocation3 + $0x2d8] sm:$0xff]  }
 0x593   : >> { %12709 = vmatpush3.bf16.msra.mxu0 %v14863_v2  ;;  %12724 = vmatprep.mubr.msk.bf16.mxu0 %vm15583_vm0, %v15582_v53  ;;  %v14909_v2 = vld [vmem:[#allocation3 + $0x6f8] sm:$0xff]  }
 0x594   : >> { %12710 = vmatprep.subr.bf16.mxu0 %v15582_v53  ;;  %12385 = vmatmul.mubr.bf16.vlgmr.msra.gmra.mrb[0].mxu1 %v3502_v3  ;;  %v3829_v3 = vrot.slane %v16958_v37, 2 }
 0x595   : >> { %12389 = vmatpush3.bf16.msra.mxu1 %v14892_v48  ;;  %12404 = vmatprep.mubr.msk.bf16.mxu1 %vm15583_vm0, %v15582_v53  ;;  %v14940_v48 = vld [vmem:[#allocation3 + $0x300] sm:$0xff]  }
 0x596   : >> { %12390 = vmatprep.subr.bf16.mxu1 %v15582_v53 }
 0x597   : >> { %12711 = vmatpush3.bf16.msra.mxu0 %v14865_v50  ;;  %v14911_v50 = vld [vmem:[#allocation3 + $0x700] sm:$0xff]  }
 0x598   : >> { %12712 = vmatprep.subr.bf16.mxu0 %v15582_v53 }
 0x599   : >> { %12391 = vmatpush3.bf16.msra.mxu1 %v14894_v29  ;;  %v14942_v29 = vld [vmem:[#allocation3 + $0x308] sm:$0xff]  }
 0x59a   : >> { %12392 = vmatprep.subr.bf16.mxu1 %v15582_v53 }
 0x59b   : >> { %12713 = vmatpush3.bf16.msra.mxu0 %v14867_v10  ;;  %v14913_v10 = vld [vmem:[#allocation3 + $0x708] sm:$0xff]  }
 0x59c   : >> { %12714 = vmatprep.subr.bf16.mxu0 %v15582_v53 }
 0x59d   : >> { %12393 = vmatpush3.bf16.msra.mxu1 %v14896_v33  ;;  %v14944_v33 = vld [vmem:[#allocation3 + $0x310] sm:$0xff]  }
 0x59e   : >> { %12394 = vmatprep.subr.bf16.mxu1 %v15582_v53 }
 0x59f   : >> { %12715 = vmatpush3.bf16.msra.mxu0 %v14869_v49  ;;  %v14917_v49 = vld [vmem:[#allocation3 + $0x718] sm:$0xff]  }
 0x5a0   : >> { %12716 = vmatprep.subr.bf16.mxu0 %v15582_v53 }
 0x5a1   : >> { %12395 = vmatpush3.bf16.msra.mxu1 %v14898_v4  ;;  %v10456_v4 = vld [vmem:[%s16738_s28 + $0x40] sm:$0xff] }
 0x5a2   : >> { %12396 = vmatprep.subr.bf16.mxu1 %v15582_v53 }
 0x5a3   : >> { %12717 = vmatpush3.bf16.msra.mxu0 %v14871_v20  ;;  %v14919_v20 = vld [vmem:[#allocation3 + $0x720] sm:$0xff]  }
 0x5a4   : >> { %12718 = vmatprep.subr.bf16.mxu0 %v15582_v53 }
 0x5a5   : >> { %12397 = vmatpush3.bf16.msra.mxu1 %v14900_v13  ;;  %v14927_v13 = vld [vmem:[#allocation3 + $0x740] sm:$0xff]  }
 0x5a6   : >> { %12398 = vmatprep.subr.bf16.mxu1 %v15582_v53 }
 0x5a7   : >> { %12719 = vmatpush3.bf16.msra.mxu0 %v14873_v63  ;;  %v14921_v63 = vld [vmem:[#allocation3 + $0x728] sm:$0xff]  }
 0x5a8   : >> { %12720 = vmatprep.subr.bf16.mxu0 %v15582_v53 }
 0x5a9   : >> { %12399 = vmatpush3.bf16.msra.mxu1 %v14902_v26  ;;  %v14929_v26 = vld [vmem:[#allocation3 + $0x748] sm:$0xff]  }
 0x5aa   : >> { %12400 = vmatprep.subr.bf16.mxu1 %v15582_v53 }
 0x5ab   : >> { %12721 = vmatpush3.bf16.msra.mxu0 %v14875_v30  ;;  %v14923_v30 = vld [vmem:[#allocation3 + $0x730] sm:$0xff]  }
 0x5ac   : >> { %12722 = vmatprep.subr.bf16.mxu0 %v15582_v53 }
 0x5ad   : >> { %12401 = vmatpush3.bf16.msra.mxu1 %v14904_v45  ;;  %v14931_v45 = vld [vmem:[#allocation3 + $0x750] sm:$0xff]  }
 0x5ae   : >> { %12402 = vmatprep.subr.bf16.mxu1 %v15582_v53 }
 0x5af   : >> { %12723 = vmatpush3.bf16.msra.mxu0 %v14877_v34  ;;  %v14925_v34 = vld [vmem:[#allocation3 + $0x738] sm:$0xff]  }
 0x5b0   : >> { %12728 = vmatprep.subr.bf16.mxu0 %v15582_v53 }
 0x5b1   : >> { %12403 = vmatpush3.bf16.msra.mxu1 %v14906_v19  ;;  %v14933_v19 = vld [vmem:[#allocation3 + $0x758] sm:$0xff]  }
 0x5b2   : >> { %12725 = vmatmul.mubr.bf16.vlgmr.msra.gmra.mrb[0].mxu0 %v5373_v47  ;;  %12408 = vmatprep.subr.bf16.mxu1 %v15582_v53  ;;  %v14946_v47 = vld [vmem:[#allocation3 + $0x318] sm:$0xff]  }
 0x5b3   : >> { %12729 = vmatpush3.bf16.msra.mxu0 %v14879_v0  ;;  %12744 = vmatprep.mubr.msk.bf16.mxu0 %vm15583_vm0, %v15582_v53  ;;  %v5687_v0 = vpack.c.bf16 %v10456_v4, %v10456_v4 }
 0x5b4   : >> { %12730 = vmatprep.subr.bf16.mxu0 %v15582_v53  ;;  %12405 = vmatmul.mubr.bf16.vlgmr.msra.gmra.mrb[0].mxu1 %v3611_v21  ;;  %v3937_v21 = vrot.slane %v16970_v16, 2  ;;  %v14958_v16 = vld [vmem:[#allocation3 + $0x348] sm:$0xff]  }
 0x5b5   : >> { %12409 = vmatpush3.bf16.msra.mxu1 %v14908_v8  ;;  %12424 = vmatprep.mubr.msk.bf16.mxu1 %vm15583_vm0, %v15582_v53  ;;  %v14954_v8 = vld [vmem:[#allocation3 + $0x338] sm:$0xff]  }
 0x5b6   : >> { %12410 = vmatprep.subr.bf16.mxu1 %v15582_v53 }
 0x5b7   : >> { %12731 = vmatpush3.bf16.msra.mxu0 %v14881_v38  ;;  %v14948_v38 = vld [vmem:[#allocation3 + $0x320] sm:$0xff]  }
 0x5b8   : >> { %12732 = vmatprep.subr.bf16.mxu0 %v15582_v53 }
 0x5b9   : >> { %12411 = vmatpush3.bf16.msra.mxu1 %v14910_v28  ;;  %v14935_v28 = vld [vmem:[#allocation3 + $0x760] sm:$0xff]  }
 0x5ba   : >> { %12412 = vmatprep.subr.bf16.mxu1 %v15582_v53 }
 0x5bb   : >> { %12733 = vmatpush3.bf16.msra.mxu0 %v14883_v17  ;;  %v14950_v17 = vld [vmem:[#allocation3 + $0x328] sm:$0xff]  }
 0x5bc   : >> { %12734 = vmatprep.subr.bf16.mxu0 %v15582_v53 }
 0x5bd   : >> { %12413 = vmatpush3.bf16.msra.mxu1 %v14912_v22  ;;  %v14956_v22 = vld [vmem:[#allocation3 + $0x340] sm:$0xff]  }
 0x5be   : >> { %12414 = vmatprep.subr.bf16.mxu1 %v15582_v53 }
 0x5bf   : >> { %12735 = vmatpush3.bf16.msra.mxu0 %v14885_v24  ;;  %v14952_v24 = vld [vmem:[#allocation3 + $0x330] sm:$0xff]  }
 0x5c0   : >> { %12736 = vmatprep.subr.bf16.mxu0 %v15582_v53 }
 0x5c1   : >> { %12415 = vmatpush3.bf16.msra.mxu1 %v14914_v11  ;;  %v14960_v11 = vld [vmem:[#allocation3 + $0x350] sm:$0xff]  }
 0x5c2   : >> { %12416 = vmatprep.subr.bf16.mxu1 %v15582_v53 }
 0x5c3   : >> { %12737 = vmatpush3.bf16.msra.mxu0 %v14887_v6  ;;  %v3938_v6 = vrot.slane %v16965_v5, 3  ;;  %v14937_v5 = vld [vmem:[#allocation3 + $0x768] sm:$0xff]  }
 0x5c4   : >> { %12738 = vmatprep.subr.bf16.mxu0 %v15582_v53 }
 0x5c5   : >> { %12417 = vmatpush3.bf16.msra.mxu1 %v14916_v52  ;;  %v14941_v52 = vld [vmem:[#allocation3 + $0x778] sm:$0xff]  }
 0x5c6   : >> { %12418 = vmatprep.subr.bf16.mxu1 %v15582_v53 }
 0x5c7   : >> { %12739 = vmatpush3.bf16.msra.mxu0 %v14889_v7  ;;  %v10457_v7 = vld [vmem:[%s16738_s28 + $0x48] sm:$0x3f] }
 0x5c8   : >> { %12740 = vmatprep.subr.bf16.mxu0 %v15582_v53 }
 0x5c9   : >> { %12419 = vmatpush3.bf16.msra.mxu1 %v14918_v57 }
 0x5ca   : >> { %12420 = vmatprep.subr.bf16.mxu1 %v15582_v53 }
 0x5cb   : >> { %12741 = vmatpush3.bf16.msra.mxu0 %v14891_v59  ;;  %v3939_v59 = vor.u32 %v3938_v6, %v3937_v21  ;;  %v14979_v21 = vld [vmem:[#allocation3 + $0x810] sm:$0xff]  }
 0x5cc   : >> { %12742 = vmatprep.subr.bf16.mxu0 %v15582_v53  ;;  %v15000_v6 = vld [vmem:[#allocation3 + $0x3f0] sm:$0xff]  }
 0x5cd   : >> { %12421 = vmatpush3.bf16.msra.mxu1 %v14920_v12  ;;  %v14964_v12 = vld [vmem:[#allocation3 + $0x360] sm:$0xff]  }
 0x5ce   : >> { %12422 = vmatprep.subr.bf16.mxu1 %v15582_v53 }
 0x5cf   : >> { %12743 = vmatpush3.bf16.msra.mxu0 %v14893_v43  ;;  %v17071_v43 = vpack.c.bf16 %v10457_v7, %v10456_v4  ;;  %v14992_v4 = vld [vmem:[#allocation3 + $0x3d0] sm:$0xff]   ;;  %v4273_v7 = vrot.slane %v16770_v27, 1 }
 0x5d0   : >> { %12748 = vmatprep.subr.bf16.mxu0 %v15582_v53  ;;  %v14987_v27 = vld [vmem:[#allocation3 + $0x830] sm:$0xff]  }
 0x5d1   : >> { %12423 = vmatpush3.bf16.msra.mxu1 %v14922_v9  ;;  %v17078_v23 = vshll.u32 %v17071_v43, 16  ;;  %v14968_v9 = vld [vmem:[#allocation3 + $0x370] sm:$0xff]  }
 0x5d2   : >> { %12745 = vmatmul.mubr.bf16.vlgmr.msra.gmra.mrb[0].mxu0 %v5483_v46  ;;  %12428 = vmatprep.subr.bf16.mxu1 %v15582_v53 }
 0x5d3   : >> { %12749 = vmatpush3.bf16.msra.mxu0 %v14895_v42  ;;  %12764 = vmatprep.mubr.msk.bf16.mxu0 %vm15583_vm0, %v15582_v53  ;;  %v17083_v42 = vshrl.u32 %v17071_v43, 16  ;;  %v5817_v46 = vrot.slane %v17078_v23, 1 }
 0x5d4   : >> { %12750 = vmatprep.subr.bf16.mxu0 %v15582_v53  ;;  %12425 = vmatmul.mubr.bf16.vlgmr.msra.gmra.mrb[0].mxu1 %v3721_v40  ;;  %v14970_v40 = vld [vmem:[#allocation3 + $0x378] sm:$0xff]  }
 0x5d5   : >> { %12429 = vmatpush3.bf16.msra.mxu1 %v14924_v51  ;;  %12444 = vmatprep.mubr.msk.bf16.mxu1 %vm15583_vm0, %v15582_v53  ;;  %v5818_v57 = vor.u32 %v5817_v46, %v17083_v42  ;;  %v14951_v51 = vld [vmem:[#allocation3 + $0x7a0] sm:$0xff]   ;;  %v14995_v46 = vld [vmem:[#allocation3 + $0x850] sm:$0xff]  }
 0x5d6   : >> { %12430 = vmatprep.subr.bf16.mxu1 %v15582_v53 }
 0x5d7   : >> { %12751 = vmatpush3.bf16.msra.mxu0 %v14897_v60  ;;  %v14962_v60 = vld [vmem:[#allocation3 + $0x358] sm:$0xff]  }
 0x5d8   : >> { %12752 = vmatprep.subr.bf16.mxu0 %v15582_v53 }
 0x5d9   : >> { %12431 = vmatpush3.bf16.msra.mxu1 %v14926_v32  ;;  %v14972_v32 = vld [vmem:[#allocation3 + $0x380] sm:$0xff]  }
 0x5da   : >> { %12432 = vmatprep.subr.bf16.mxu1 %v15582_v53 }
 0x5db   : >> { %12753 = vmatpush3.bf16.msra.mxu0 %v14899_v1  ;;  %v14943_v1 = vld [vmem:[#allocation3 + $0x780] sm:$0xff]  }
 0x5dc   : >> { %12754 = vmatprep.subr.bf16.mxu0 %v15582_v53 }
 0x5dd   : >> { %12433 = vmatpush3.bf16.msra.mxu1 %v14928_v18  ;;  %v14974_v18 = vld [vmem:[#allocation3 + $0x388] sm:$0xff]  }
 0x5de   : >> { %12434 = vmatprep.subr.bf16.mxu1 %v15582_v53 }
 0x5df   : >> { %12755 = vmatpush3.bf16.msra.mxu0 %v14901_v41  ;;  %v14947_v41 = vld [vmem:[#allocation3 + $0x790] sm:$0xff]  }
 0x5e0   : >> { %12756 = vmatprep.subr.bf16.mxu0 %v15582_v53 }
 0x5e1   : >> { %12435 = vmatpush3.bf16.msra.mxu1 %v14930_v31  ;;  %v14957_v31 = vld [vmem:[#allocation3 + $0x7b8] sm:$0xff]  }
 0x5e2   : >> { %12436 = vmatprep.subr.bf16.mxu1 %v15582_v53 }
 0x5e3   : >> { %12757 = vmatpush3.bf16.msra.mxu0 %v14903_v25  ;;  %v14949_v25 = vld [vmem:[#allocation3 + $0x798] sm:$0xff]  }
 0x5e4   : >> { %12758 = vmatprep.subr.bf16.mxu0 %v15582_v53 }
 0x5e5   : >> { %12437 = vmatpush3.bf16.msra.mxu1 %v14932_v56  ;;  %v14959_v56 = vld [vmem:[#allocation3 + $0x7c0] sm:$0xff]  }
 0x5e6   : >> { %12438 = vmatprep.subr.bf16.mxu1 %v15582_v53 }
 0x5e7   : >> { %12759 = vmatpush3.bf16.msra.mxu0 %v14905_v44  ;;  %v4047_v44 = vrot.slane %v16958_v37, 3  ;;  %v14955_v37 = vld [vmem:[#allocation3 + $0x7b0] sm:$0xff]  }
 0x5e8   : >> { %12760 = vmatprep.subr.bf16.mxu0 %v15582_v53 }
 0x5e9   : >> { %12439 = vmatpush3.bf16.msra.mxu1 %v14934_v15  ;;  %v14961_v15 = vld [vmem:[#allocation3 + $0x7c8] sm:$0xff]  }
 0x5ea   : >> { %12440 = vmatprep.subr.bf16.mxu1 %v15582_v53 }
 0x5eb   : >> { %12761 = vmatpush3.bf16.msra.mxu0 %v14907_v39  ;;  %v14953_v39 = vld [vmem:[#allocation3 + $0x7a8] sm:$0xff]  }
 0x5ec   : >> { %12762 = vmatprep.subr.bf16.mxu0 %v15582_v53 }
 0x5ed   : >> { %12441 = vmatpush3.bf16.msra.mxu1 %v14936_v61  ;;  %v14963_v61 = vld [vmem:[#allocation3 + $0x7d0] sm:$0xff]  }
 0x5ee   : >> { %12442 = vmatprep.subr.bf16.mxu1 %v15582_v53 }
 0x5ef   : >> { %12763 = vmatpush3.bf16.msra.mxu0 %v14909_v2  ;;  %v14976_v2 = vld [vmem:[#allocation3 + $0x390] sm:$0xff]  }
 0x5f0   : >> { %12768 = vmatprep.subr.bf16.mxu0 %v15582_v53 }
 0x5f1   : >> { %12443 = vmatpush3.bf16.msra.mxu1 %v14938_v58  ;;  %v14965_v58 = vld [vmem:[#allocation3 + $0x7d8] sm:$0xff]  }
 0x5f2   : >> { %12765 = vmatmul.mubr.bf16.vlgmr.msra.gmra.mrb[0].mxu0 %v5591_v54  ;;  %12448 = vmatprep.subr.bf16.mxu1 %v15582_v53  ;;  %v14978_v54 = vld [vmem:[#allocation3 + $0x398] sm:$0xff]  }
 0x5f3   : >> { %12769 = vmatpush3.bf16.msra.mxu0 %v14911_v50  ;;  %12784 = vmatprep.mubr.msk.bf16.mxu0 %vm15583_vm0, %v15582_v53  ;;  %v5927_v50 = vrot.slane %v17071_v43, 1 }
 0x5f4   : >> { %12770 = vmatprep.subr.bf16.mxu0 %v15582_v53  ;;  %12445 = vmatmul.mubr.bf16.vlgmr.msra.gmra.mrb[0].mxu1 %v3829_v3  ;;  %v14967_v3 = vld [vmem:[#allocation3 + $0x7e0] sm:$0xff]  }
 0x5f5   : >> { %12449 = vmatpush3.bf16.msra.mxu1 %v14940_v48  ;;  %12464 = vmatprep.mubr.msk.bf16.mxu1 %vm15583_vm0, %v15582_v53  ;;  %v15215_v48 = vld [vmem:[%s16738_s28 + $0x20] sm:$0xff] }
 0x5f6   : >> { %12450 = vmatprep.subr.bf16.mxu1 %v15582_v53 }
 0x5f7   : >> { %12771 = vmatpush3.bf16.msra.mxu0 %v14913_v10  ;;  %v14980_v10 = vld [vmem:[#allocation3 + $0x3a0] sm:$0xff]  }
 0x5f8   : >> { %12772 = vmatprep.subr.bf16.mxu0 %v15582_v53 }
 0x5f9   : >> { %12451 = vmatpush3.bf16.msra.mxu1 %v14942_v29  ;;  %v14988_v29 = vld [vmem:[#allocation3 + $0x3c0] sm:$0xff]  }
 0x5fa   : >> { %12452 = vmatprep.subr.bf16.mxu1 %v15582_v53 }
 0x5fb   : >> { %12773 = vmatpush3.bf16.msra.mxu0 %v14915_v35  ;;  %v14982_v35 = vld [vmem:[#allocation3 + $0x3a8] sm:$0xff]  }
 0x5fc   : >> { %12774 = vmatprep.subr.bf16.mxu0 %v15582_v53 }
 0x5fd   : >> { %12453 = vmatpush3.bf16.msra.mxu1 %v14944_v33  ;;  %v14990_v33 = vld [vmem:[#allocation3 + $0x3c8] sm:$0xff]  }
 0x5fe   : >> { %12454 = vmatprep.subr.bf16.mxu1 %v15582_v53 }
 0x5ff   : >> { %12775 = vmatpush3.bf16.msra.mxu0 %v14917_v49  ;;  %v14984_v49 = vld [vmem:[#allocation3 + $0x3b0] sm:$0xff]  }
 0x600   : >> { %12776 = vmatprep.subr.bf16.mxu0 %v15582_v53 }
 0x601   : >> { %12455 = vmatpush3.bf16.msra.mxu1 %v14946_v47  ;;  %v6035_v47 = vrot.slane %v17083_v42, 1 }
 0x602   : >> { %12456 = vmatprep.subr.bf16.mxu1 %v15582_v53 }
 0x603   : >> { %12777 = vmatpush3.bf16.msra.mxu0 %v14919_v20  ;;  %v14986_v20 = vld [vmem:[#allocation3 + $0x3b8] sm:$0xff]  }
 0x604   : >> { %12778 = vmatprep.subr.bf16.mxu0 %v15582_v53 }
 0x605   : >> { %12457 = vmatpush3.bf16.msra.mxu1 %v14948_v38  ;;  %v14994_v38 = vld [vmem:[#allocation3 + $0x3d8] sm:$0xff]  }
 0x606   : >> { %12458 = vmatprep.subr.bf16.mxu1 %v15582_v53 }
 0x607   : >> { %12779 = vmatpush3.bf16.msra.mxu0 %v14921_v63  ;;  %v4143_v63 = vpack.c.bf16 %v15215_v48, %v15215_v48 }
 0x608   : >> { %12780 = vmatprep.subr.bf16.mxu0 %v15582_v53 }
 0x609   : >> { %12459 = vmatpush3.bf16.msra.mxu1 %v14950_v17  ;;  %v14975_v17 = vld [vmem:[#allocation3 + $0x800] sm:$0xff]  }
 0x60a   : >> { %12460 = vmatprep.subr.bf16.mxu1 %v15582_v53 }
 0x60b   : >> { %12781 = vmatpush3.bf16.msra.mxu0 %v14923_v30  ;;  %v14969_v30 = vld [vmem:[#allocation3 + $0x7e8] sm:$0xff]  }
 0x60c   : >> { %12782 = vmatprep.subr.bf16.mxu0 %v15582_v53 }
 0x60d   : >> { %12461 = vmatpush3.bf16.msra.mxu1 %v14952_v24  ;;  %v14977_v24 = vld [vmem:[#allocation3 + $0x808] sm:$0xff]  }
 0x60e   : >> { %12462 = vmatprep.subr.bf16.mxu1 %v15582_v53 }
 0x60f   : >> { %12783 = vmatpush3.bf16.msra.mxu0 %v14925_v34  ;;  %v14971_v34 = vld [vmem:[#allocation3 + $0x7f0] sm:$0xff]  }
 0x610   : >> { %12788 = vmatprep.subr.bf16.mxu0 %v15582_v53 }
 0x611   : >> { %12463 = vmatpush3.bf16.msra.mxu1 %v14954_v8  ;;  %v14981_v8 = vld [vmem:[#allocation3 + $0x818] sm:$0xff]  }
 0x612   : >> { %12785 = vmatmul.mubr.bf16.vlgmr.msra.gmra.mrb[0].mxu0 %v5687_v0  ;;  %12468 = vmatprep.subr.bf16.mxu1 %v15582_v53  ;;  %v6036_v0 = vrot.slane %v17078_v23, 2 }
 0x613   : >> { %12789 = vmatpush3.bf16.msra.mxu0 %v14927_v13  ;;  %12804 = vmatprep.mubr.msk.bf16.mxu0 %vm15583_vm0, %v15582_v53  ;;  %v14973_v13 = vld [vmem:[#allocation3 + $0x7f8] sm:$0xff]  }
 0x614   : >> { %12790 = vmatprep.subr.bf16.mxu0 %v15582_v53  ;;  %12465 = vmatmul.mubr.bf16.vlgmr.msra.gmra.mrb[0].mxu1 %v3939_v59  ;;  %v14983_v59 = vld [vmem:[#allocation3 + $0x820] sm:$0xff]  }
 0x615   : >> { %12469 = vmatpush3.bf16.msra.mxu1 %v14956_v22  ;;  %12484 = vmatprep.mubr.msk.bf16.mxu1 %vm15583_vm0, %v15582_v53  ;;  %v4274_v22 = vor.u32 %v4273_v7, %v16767_v36  ;;  %v6145_v36 = vrot.slane %v17071_v43, 2  ;;  %v15039_v7 = vld [vmem:[#allocation3 + $0x990] sm:$0xff]  }
 0x616   : >> { %12470 = vmatprep.subr.bf16.mxu1 %v15582_v53 }
 0x617   : >> { %12791 = vmatpush3.bf16.msra.mxu0 %v14929_v26  ;;  %v6037_v26 = vor.u32 %v6036_v0, %v6035_v47  ;;  %v15029_v0 = vld [vmem:[#allocation3 + $0x940] sm:$0xff]  }
 0x618   : >> { %12792 = vmatprep.subr.bf16.mxu0 %v15582_v53 }
 0x619   : >> { %12471 = vmatpush3.bf16.msra.mxu1 %v14958_v16  ;;  %v14989_v16 = vld [vmem:[#allocation3 + $0x838] sm:$0xff]  }
 0x61a   : >> { %12472 = vmatprep.subr.bf16.mxu1 %v15582_v53 }
 0x61b   : >> { %12793 = vmatpush3.bf16.msra.mxu0 %v14931_v45  ;;  %v14996_v45 = vld [vmem:[#allocation3 + $0x3e0] sm:$0xff]  }
 0x61c   : >> { %12794 = vmatprep.subr.bf16.mxu0 %v15582_v53 }
 0x61d   : >> { %12473 = vmatpush3.bf16.msra.mxu1 %v14960_v11  ;;  %v14993_v11 = vld [vmem:[#allocation3 + $0x848] sm:$0xff]  }
 0x61e   : >> { %12474 = vmatprep.subr.bf16.mxu1 %v15582_v53 }
 0x61f   : >> { %12795 = vmatpush3.bf16.msra.mxu0 %v14933_v19  ;;  %v14998_v19 = vld [vmem:[#allocation3 + $0x3e8] sm:$0xff]  }
 0x620   : >> { %12796 = vmatprep.subr.bf16.mxu0 %v15582_v53 }
 0x621   : >> { %12475 = vmatpush3.bf16.msra.mxu1 %v14962_v60  ;;  %v14999_v60 = vld [vmem:[#allocation3 + $0x860] sm:$0xff]  }
 0x622   : >> { %12476 = vmatprep.subr.bf16.mxu1 %v15582_v53 }
 0x623   : >> { %12797 = vmatpush3.bf16.msra.mxu0 %v14935_v28  ;;  %v15002_v28 = vld [vmem:[#allocation3 + $0x3f8] sm:$0xff]  }
 0x624   : >> { %12798 = vmatprep.subr.bf16.mxu0 %v15582_v53 }
 0x625   : >> { %12477 = vmatpush3.bf16.msra.mxu1 %v14964_v12  ;;  %v6253_v12 = vrot.slane %v17083_v42, 2  ;;  %v15007_v42 = vld [vmem:[#allocation3 + $0x890] sm:$0xff]  }
 0x626   : >> { %12478 = vmatprep.subr.bf16.mxu1 %v15582_v53 }
 0x627   : >> { %12799 = vmatpush3.bf16.msra.mxu0 %v14937_v5  ;;  %v14985_v5 = vld [vmem:[#allocation3 + $0x828] sm:$0xff]  }
 0x628   : >> { %12800 = vmatprep.subr.bf16.mxu0 %v15582_v53 }
 0x629   : >> { %12479 = vmatpush3.bf16.msra.mxu1 %v14966_v62  ;;  %v15004_v62 = vld [vmem:[#allocation3 + $0x878] sm:$0xff]  }
 0x62a   : >> { %12480 = vmatprep.subr.bf16.mxu1 %v15582_v53 }
 0x62b   : >> { %12801 = vmatpush3.bf16.msra.mxu0 %v14939_v14  ;;  %v14991_v14 = vld [vmem:[#allocation3 + $0x840] sm:$0xff]  }
 0x62c   : >> { %12802 = vmatprep.subr.bf16.mxu0 %v15582_v53 }
 0x62d   : >> { %12481 = vmatpush3.bf16.msra.mxu1 %v14968_v9  ;;  %v15005_v9 = vld [vmem:[#allocation3 + $0x880] sm:$0xff]  }
 0x62e   : >> { %12482 = vmatprep.subr.bf16.mxu1 %v15582_v53 }
 0x62f   : >> { %12803 = vmatpush3.bf16.msra.mxu0 %v14941_v52  ;;  %v14997_v52 = vld [vmem:[#allocation3 + $0x858] sm:$0xff]  }
 0x630   : >> { %12808 = vmatprep.subr.bf16.mxu0 %v15582_v53 }
 0x631   : >> { %12483 = vmatpush3.bf16.msra.mxu1 %v14970_v40  ;;  %v15009_v40 = vld [vmem:[#allocation3 + $0x8a0] sm:$0xff]  }
 0x632   : >> { %12805 = vmatmul.mubr.bf16.vlgmr.msra.gmra.mrb[0].mxu0 %v5818_v57  ;;  %12488 = vmatprep.subr.bf16.mxu1 %v15582_v53  ;;  %v15001_v57 = vld [vmem:[#allocation3 + $0x868] sm:$0xff]  }
 0x633   : >> { %12809 = vmatpush3.bf16.msra.mxu0 %v14943_v1  ;;  %12824 = vmatprep.mubr.msk.bf16.mxu0 %vm15583_vm0, %v15582_v53  ;;  %v15003_v1 = vld [vmem:[#allocation3 + $0x870] sm:$0xff]  }
 0x634   : >> { %12810 = vmatprep.subr.bf16.mxu0 %v15582_v53  ;;  %12485 = vmatmul.mubr.bf16.vlgmr.msra.gmra.mrb[0].mxu1 %v4047_v44  ;;  %v15011_v44 = vld [vmem:[#allocation3 + $0x8b0] sm:$0xff]  }
 0x635   : >> { %12489 = vmatpush3.bf16.msra.mxu1 %v14972_v32  ;;  %12504 = vmatprep.mubr.msk.bf16.mxu1 %vm15583_vm0, %v15582_v53  ;;  %v15012_v32 = vld [vmem:[#allocation3 + $0x8b8] sm:$0xff]  }
 0x636   : >> { %12490 = vmatprep.subr.bf16.mxu1 %v15582_v53 }
 0x637   : >> { %12811 = vmatpush3.bf16.msra.mxu0 %v14945_v55  ;;  %v6254_v55 = vrot.slane %v17078_v23, 3  ;;  %v15008_v23 = vld [vmem:[#allocation3 + $0x898] sm:$0xff]  }
 0x638   : >> { %12812 = vmatprep.subr.bf16.mxu0 %v15582_v53 }
 0x639   : >> { %12491 = vmatpush3.bf16.msra.mxu1 %v14974_v18  ;;  %v15013_v18 = vld [vmem:[#allocation3 + $0x8c0] sm:$0xff]  }
 0x63a   : >> { %12492 = vmatprep.subr.bf16.mxu1 %v15582_v53 }
 0x63b   : >> { %12813 = vmatpush3.bf16.msra.mxu0 %v14947_v41  ;;  %v6255_v41 = vor.u32 %v6254_v55, %v6253_v12  ;;  %v15048_v55 = vld [vmem:[#allocation3 + $0x9d8] sm:$0xff]  }
 0x63c   : >> { %12814 = vmatprep.subr.bf16.mxu0 %v15582_v53 }
 0x63d   : >> { %12493 = vmatpush3.bf16.msra.mxu1 %v14976_v2  ;;  %v15015_v2 = vld [vmem:[#allocation3 + $0x8d0] sm:$0xff]  }
 0x63e   : >> { %12494 = vmatprep.subr.bf16.mxu1 %v15582_v53 }
 0x63f   : >> { %12815 = vmatpush3.bf16.msra.mxu0 %v14949_v25  ;;  %v15006_v25 = vld [vmem:[#allocation3 + $0x888] sm:$0xff]  }
 0x640   : >> { %12816 = vmatprep.subr.bf16.mxu0 %v15582_v53 }
 0x641   : >> { %12495 = vmatpush3.bf16.msra.mxu1 %v14978_v54  ;;  %v15018_v54 = vld [vmem:[#allocation3 + $0x8e8] sm:$0xff]  }
 0x642   : >> { %12496 = vmatprep.subr.bf16.mxu1 %v15582_v53 }
 0x643   : >> { %12817 = vmatpush3.bf16.msra.mxu0 %v14951_v51  ;;  %v15010_v51 = vld [vmem:[#allocation3 + $0x8a8] sm:$0xff]  }
 0x644   : >> { %12818 = vmatprep.subr.bf16.mxu0 %v15582_v53 }
 0x645   : >> { %12497 = vmatpush3.bf16.msra.mxu1 %v14980_v10  ;;  %v10515_v10 = vld [vmem:[%s16738_s28 + $0x50] sm:$0xff] }
 0x646   : >> { %12498 = vmatprep.subr.bf16.mxu1 %v15582_v53 }
 0x647   : >> { %12819 = vmatpush3.bf16.msra.mxu0 %v14953_v39  ;;  %v6363_v39 = vrot.slane %v17071_v43, 3  ;;  %v15017_v43 = vld [vmem:[#allocation3 + $0x8e0] sm:$0xff]  }
 0x648   : >> { %12820 = vmatprep.subr.bf16.mxu0 %v15582_v53 }
 0x649   : >> { %12499 = vmatpush3.bf16.msra.mxu1 %v14982_v35  ;;  %v15021_v35 = vld [vmem:[#allocation3 + $0x900] sm:$0xff]  }
 0x64a   : >> { %12500 = vmatprep.subr.bf16.mxu1 %v15582_v53 }
 0x64b   : >> { %12821 = vmatpush3.bf16.msra.mxu0 %v14955_v37  ;;  %v15014_v37 = vld [vmem:[#allocation3 + $0x8c8] sm:$0xff]  }
 0x64c   : >> { %12822 = vmatprep.subr.bf16.mxu0 %v15582_v53 }
 0x64d   : >> { %12501 = vmatpush3.bf16.msra.mxu1 %v14984_v49  ;;  %v15023_v49 = vld [vmem:[#allocation3 + $0x910] sm:$0xff]  }
 0x64e   : >> { %12502 = vmatprep.subr.bf16.mxu1 %v15582_v53 }
 0x64f   : >> { %12823 = vmatpush3.bf16.msra.mxu0 %v14957_v31  ;;  %v15016_v31 = vld [vmem:[#allocation3 + $0x8d8] sm:$0xff]  }
 0x650   : >> { %12828 = vmatprep.subr.bf16.mxu0 %v15582_v53 }
 0x651   : >> { %12503 = vmatpush3.bf16.msra.mxu1 %v14986_v20  ;;  %v10516_v20 = vld [vmem:[%s16738_s28 + $0x58] sm:$0x3f] }
 0x652   : >> { %12825 = vmatmul.mubr.bf16.vlgmr.msra.gmra.mrb[0].mxu0 %v5927_v50  ;;  %12508 = vmatprep.subr.bf16.mxu1 %v15582_v53  ;;  %v15019_v50 = vld [vmem:[#allocation3 + $0x8f0] sm:$0xff]   ;;  %v17195_v48 = vpack.c.bf16 %v10516_v20, %v10515_v10  ;;  %v15069_v20 = vld [vmem:[#allocation3 + $0xa80] sm:$0xff]  }
 0x653   : >> { %12829 = vmatpush3.bf16.msra.mxu0 %v14959_v56  ;;  %12844 = vmatprep.mubr.msk.bf16.mxu0 %vm15583_vm0, %v15582_v53  ;;  %v15020_v56 = vld [vmem:[#allocation3 + $0x8f8] sm:$0xff]  }
 0x654   : >> { %12830 = vmatprep.subr.bf16.mxu0 %v15582_v53  ;;  %12505 = vmatmul.mubr.bf16.vlgmr.msra.gmra.mrb[0].mxu1 %v4143_v63  ;;  %v15026_v63 = vld [vmem:[#allocation3 + $0x928] sm:$0xff]  }
 0x655   : >> { %12509 = vmatpush3.bf16.msra.mxu1 %v14988_v29  ;;  %12524 = vmatprep.mubr.msk.bf16.mxu1 %vm15583_vm0, %v15582_v53  ;;  %v17199_v29 = vshll.u32 %v17195_v48, 16 }
 0x656   : >> { %12510 = vmatprep.subr.bf16.mxu1 %v15582_v53 }
 0x657   : >> { %12831 = vmatpush3.bf16.msra.mxu0 %v14961_v15  ;;  %v6459_v15 = vpack.c.bf16 %v10515_v10, %v10515_v10  ;;  %v15064_v10 = vld [vmem:[#allocation3 + $0xa58] sm:$0xff]  }
 0x658   : >> { %12832 = vmatprep.subr.bf16.mxu0 %v15582_v53 }
 0x659   : >> { %12511 = vmatpush3.bf16.msra.mxu1 %v14990_v33  ;;  %v17203_v33 = vshrl.u32 %v17195_v48, 16 }
 0x65a   : >> { %12512 = vmatprep.subr.bf16.mxu1 %v15582_v53 }
 0x65b   : >> { %12833 = vmatpush3.bf16.msra.mxu0 %v14963_v61  ;;  %v15022_v61 = vld [vmem:[#allocation3 + $0x908] sm:$0xff]  }
 0x65c   : >> { %12834 = vmatprep.subr.bf16.mxu0 %v15582_v53 }
 0x65d   : >> { %12513 = vmatpush3.bf16.msra.mxu1 %v14992_v4  ;;  %v15028_v4 = vld [vmem:[#allocation3 + $0x938] sm:$0xff]  }
 0x65e   : >> { %12514 = vmatprep.subr.bf16.mxu1 %v15582_v53 }
 0x65f   : >> { %12835 = vmatpush3.bf16.msra.mxu0 %v14965_v58  ;;  %v15024_v58 = vld [vmem:[#allocation3 + $0x918] sm:$0xff]  }
 0x660   : >> { %12836 = vmatprep.subr.bf16.mxu0 %v15582_v53 }
 0x661   : >> { %12515 = vmatpush3.bf16.msra.mxu1 %v14994_v38  ;;  %v15031_v38 = vld [vmem:[#allocation3 + $0x950] sm:$0xff]  }
 0x662   : >> { %12516 = vmatprep.subr.bf16.mxu1 %v15582_v53 }
 0x663   : >> { %12837 = vmatpush3.bf16.msra.mxu0 %v14967_v3  ;;  %v15025_v3 = vld [vmem:[#allocation3 + $0x920] sm:$0xff]  }
 0x664   : >> { %12838 = vmatprep.subr.bf16.mxu0 %v15582_v53 }
 0x665   : >> { %12517 = vmatpush3.bf16.msra.mxu1 %v14996_v45  ;;  %v15034_v45 = vld [vmem:[#allocation3 + $0x968] sm:$0xff]  }
 0x666   : >> { %12518 = vmatprep.subr.bf16.mxu1 %v15582_v53 }
 0x667   : >> { %12839 = vmatpush3.bf16.msra.mxu0 %v14969_v30  ;;  %v15027_v30 = vld [vmem:[#allocation3 + $0x930] sm:$0xff]  }
 0x668   : >> { %12840 = vmatprep.subr.bf16.mxu0 %v15582_v53 }
 0x669   : >> { %12519 = vmatpush3.bf16.msra.mxu1 %v14998_v19  ;;  %v15036_v19 = vld [vmem:[#allocation3 + $0x978] sm:$0xff]  }
 0x66a   : >> { %12520 = vmatprep.subr.bf16.mxu1 %v15582_v53 }
 0x66b   : >> { %12841 = vmatpush3.bf16.msra.mxu0 %v14971_v34  ;;  %v6589_v34 = vrot.slane %v17199_v29, 1 }
 0x66c   : >> { %12842 = vmatprep.subr.bf16.mxu0 %v15582_v53 }
 0x66d   : >> { %12521 = vmatpush3.bf16.msra.mxu1 %v15000_v6  ;;  %v6590_v47 = vor.u32 %v6589_v34, %v17203_v33  ;;  %v15037_v6 = vld [vmem:[#allocation3 + $0x980] sm:$0xff]   ;;  %v15076_v34 = vld [vmem:[#allocation3 + $0xab8] sm:$0xff]  }
 0x66e   : >> { %12522 = vmatprep.subr.bf16.mxu1 %v15582_v53 }
 0x66f   : >> { %12843 = vmatpush3.bf16.msra.mxu0 %v14973_v13  ;;  %v15030_v13 = vld [vmem:[#allocation3 + $0x948] sm:$0xff]  }
 0x670   : >> { %12848 = vmatprep.subr.bf16.mxu0 %v15582_v53 }
 0x671   : >> { %12523 = vmatpush3.bf16.msra.mxu1 %v15002_v28  ;;  %v15040_v28 = vld [vmem:[#allocation3 + $0x998] sm:$0xff]  }
 0x672   : >> { %12845 = vmatmul.mubr.bf16.vlgmr.msra.gmra.mrb[0].mxu0 %v6037_v26  ;;  %v15032_v26 = vld [vmem:[#allocation3 + $0x958] sm:$0xff]  }
 0x673   : >> { %12849 = vmatpush3.bf16.msra.mxu0 %v14975_v17  ;;  %12864 = vmatprep.mubr.msk.bf16.mxu0 %vm15583_vm0, %v15582_v53  ;;  %v15033_v17 = vld [vmem:[#allocation3 + $0x960] sm:$0xff]  }
 0x674   : >> { %12850 = vmatprep.subr.bf16.mxu0 %v15582_v53  ;;  %12525 = vmatmul.mubr.bf16.vlgmr.msra.gmra.mrb[0].mxu1 %v4274_v22  ;;  %v15042_v22 = vld [vmem:[#allocation3 + $0x9a8] sm:$0xff]  }
 0x675   : >> { %13220 = vmatprep.mubr.msk.f32.mxu1 %vm15583_vm0, %v15582_v53 }
 0x677   : >> { %12851 = vmatpush3.bf16.msra.mxu0 %v14977_v24  ;;  %v15035_v24 = vld [vmem:[#allocation3 + $0x970] sm:$0xff]  }
 0x678   : >> { %12852 = vmatprep.subr.bf16.mxu0 %v15582_v53 }
 0x67b   : >> { %12853 = vmatpush3.bf16.msra.mxu0 %v14979_v21  ;;  %v6699_v21 = vrot.slane %v17195_v48, 1 }
 0x67c   : >> { %12854 = vmatprep.subr.bf16.mxu0 %v15582_v53 }
 0x67f   : >> { %12855 = vmatpush3.bf16.msra.mxu0 %v14981_v8  ;;  %v15038_v8 = vld [vmem:[#allocation3 + $0x988] sm:$0xff]  }
 0x680   : >> { %12856 = vmatprep.subr.bf16.mxu0 %v15582_v53 }
 0x683   : >> { %12857 = vmatpush3.bf16.msra.mxu0 %v14983_v59  ;;  %v15041_v59 = vld [vmem:[#allocation3 + $0x9a0] sm:$0xff]  }
 0x684   : >> { %12858 = vmatprep.subr.bf16.mxu0 %v15582_v53 }
 0x687   : >> { %12859 = vmatpush3.bf16.msra.mxu0 %v14985_v5  ;;  %v15043_v5 = vld [vmem:[#allocation3 + $0x9b0] sm:$0xff]  }
 0x688   : >> { %12860 = vmatprep.subr.bf16.mxu0 %v15582_v53 }
 0x68b   : >> { %12861 = vmatpush3.bf16.msra.mxu0 %v14987_v27  ;;  %v6807_v27 = vrot.slane %v17203_v33, 1 }
 0x68c   : >> { %12862 = vmatprep.subr.bf16.mxu0 %v15582_v53 }
 0x68f   : >> { %12863 = vmatpush3.bf16.msra.mxu0 %v14989_v16  ;;  %v6808_v16 = vrot.slane %v17199_v29, 2 }
 0x690   : >> { %12868 = vmatprep.subr.bf16.mxu0 %v15582_v53 }
 0x692   : >> { %12865 = vmatmul.mubr.bf16.vlgmr.msra.gmra.mrb[0].mxu0 %v6145_v36  ;;  %v15044_v36 = vld [vmem:[#allocation3 + $0x9b8] sm:$0xff]  }
 0x693   : >> { %12869 = vmatpush3.bf16.msra.mxu0 %v14991_v14  ;;  %12884 = vmatprep.mubr.msk.bf16.mxu0 %vm15583_vm0, %v15582_v53  ;;  %v6809_v14 = vor.u32 %v6808_v16, %v6807_v27  ;;  %v15087_v27 = vld [vmem:[#allocation3 + $0xb10] sm:$0xff]   ;;  %v15088_v16 = vld [vmem:[#allocation3 + $0xb18] sm:$0xff]  }
 0x694   : >> { %12870 = vmatprep.subr.bf16.mxu0 %v15582_v53 }
 0x697   : >> { %12871 = vmatpush3.bf16.msra.mxu0 %v14993_v11  ;;  %v15045_v11 = vld [vmem:[#allocation3 + $0x9c0] sm:$0xff]  }
 0x698   : >> { %12872 = vmatprep.subr.bf16.mxu0 %v15582_v53 }
 0x69b   : >> { %12873 = vmatpush3.bf16.msra.mxu0 %v14995_v46  ;;  %v15046_v46 = vld [vmem:[#allocation3 + $0x9c8] sm:$0xff]  }
 0x69c   : >> { %12874 = vmatprep.subr.bf16.mxu0 %v15582_v53 }
 0x69f   : >> { %12875 = vmatpush3.bf16.msra.mxu0 %v14997_v52 }
 0x6a0   : >> { %12876 = vmatprep.subr.bf16.mxu0 %v15582_v53 }
 0x6a3   : >> { %12877 = vmatpush3.bf16.msra.mxu0 %v14999_v60  ;;  %v15047_v60 = vld [vmem:[#allocation3 + $0x9d0] sm:$0xff]  }
 0x6a4   : >> { %12878 = vmatprep.subr.bf16.mxu0 %v15582_v53 }
 0x6a7   : >> { %12879 = vmatpush3.bf16.msra.mxu0 %v15001_v57 }
 0x6a8   : >> { %12880 = vmatprep.subr.bf16.mxu0 %v15582_v53 }
 0x6ab   : >> { %12881 = vmatpush3.bf16.msra.mxu0 %v15003_v1 }
 0x6ac   : >> { %12882 = vmatprep.subr.bf16.mxu0 %v15582_v53 }
 0x6af   : >> { %12883 = vmatpush3.bf16.msra.mxu0 %v15004_v62  ;;  %v15049_v62 = vld [vmem:[#allocation3 + $0x9e0] sm:$0xff]  }
 0x6b0   : >> { %12888 = vmatprep.subr.bf16.mxu0 %v15582_v53 }
 0x6b2   : >> { %12885 = vmatmul.mubr.bf16.vlgmr.msra.gmra.mrb[0].mxu0 %v6255_v41  ;;  %v15050_v41 = vld [vmem:[#allocation3 + $0x9e8] sm:$0xff]  }
 0x6b3   : >> { %12889 = vmatpush3.bf16.msra.mxu0 %v15005_v9  ;;  %12904 = vmatprep.mubr.msk.bf16.mxu0 %vm15583_vm0, %v15582_v53  ;;  %v15051_v9 = vld [vmem:[#allocation3 + $0x9f0] sm:$0xff]  }
 0x6b4   : >> { %12890 = vmatprep.subr.bf16.mxu0 %v15582_v53 }
 0x6b7   : >> { %12891 = vmatpush3.bf16.msra.mxu0 %v15006_v25  ;;  %v15052_v25 = vld [vmem:[#allocation3 + $0x9f8] sm:$0xff]  }
 0x6b8   : >> { %12892 = vmatprep.subr.bf16.mxu0 %v15582_v53 }
 0x6bb   : >> { %12893 = vmatpush3.bf16.msra.mxu0 %v15007_v42  ;;  %v6917_v42 = vrot.slane %v17195_v48, 2 }
 0x6bc   : >> { %12894 = vmatprep.subr.bf16.mxu0 %v15582_v53 }
 0x6bf   : >> { %12895 = vmatpush3.bf16.msra.mxu0 %v15008_v23  ;;  %v15053_v23 = vld [vmem:[#allocation3 + $0xa00] sm:$0xff]  }
 0x6c0   : >> { %12896 = vmatprep.subr.bf16.mxu0 %v15582_v53 }
 0x6c3   : >> { %12897 = vmatpush3.bf16.msra.mxu0 %v15009_v40  ;;  %v15054_v40 = vld [vmem:[#allocation3 + $0xa08] sm:$0xff]  }
 0x6c4   : >> { %12898 = vmatprep.subr.bf16.mxu0 %v15582_v53 }
 0x6c7   : >> { %12899 = vmatpush3.bf16.msra.mxu0 %v15010_v51  ;;  %v15055_v51 = vld [vmem:[#allocation3 + $0xa10] sm:$0xff]  }
 0x6c8   : >> { %12900 = vmatprep.subr.bf16.mxu0 %v15582_v53 }
 0x6cb   : >> { %12901 = vmatpush3.bf16.msra.mxu0 %v15011_v44  ;;  %v15056_v44 = vld [vmem:[#allocation3 + $0xa18] sm:$0xff]  }
 0x6cc   : >> { %12902 = vmatprep.subr.bf16.mxu0 %v15582_v53 }
 0x6cf   : >> { %12903 = vmatpush3.bf16.msra.mxu0 %v15012_v32  ;;  %v15057_v32 = vld [vmem:[#allocation3 + $0xa20] sm:$0xff]  }
 0x6d0   : >> { %12908 = vmatprep.subr.bf16.mxu0 %v15582_v53 }
 0x6d2   : >> { %12905 = vmatmul.mubr.bf16.vlgmr.msra.gmra.mrb[0].mxu0 %v6363_v39  ;;  %v15058_v39 = vld [vmem:[#allocation3 + $0xa28] sm:$0xff]  }
 0x6d3   : >> { %12909 = vmatpush3.bf16.msra.mxu0 %v15013_v18  ;;  %12924 = vmatprep.mubr.msk.bf16.mxu0 %vm15583_vm0, %v15582_v53  ;;  %v15059_v18 = vld [vmem:[#allocation3 + $0xa30] sm:$0xff]  }
 0x6d4   : >> { %12910 = vmatprep.subr.bf16.mxu0 %v15582_v53 }
 0x6d7   : >> { %12911 = vmatpush3.bf16.msra.mxu0 %v15014_v37  ;;  %v7025_v37 = vrot.slane %v17203_v33, 2  ;;  %v15075_v33 = vld [vmem:[#allocation3 + $0xab0] sm:$0xff]  }
 0x6d8   : >> { %12912 = vmatprep.subr.bf16.mxu0 %v15582_v53 }
 0x6db   : >> { %12913 = vmatpush3.bf16.msra.mxu0 %v15015_v2  ;;  %v7026_v2 = vrot.slane %v17199_v29, 3  ;;  %v15072_v29 = vld [vmem:[#allocation3 + $0xa98] sm:$0xff]  }
 0x6dc   : >> { %12914 = vmatprep.subr.bf16.mxu0 %v15582_v53 }
 0x6df   : >> { %12915 = vmatpush3.bf16.msra.mxu0 %v15016_v31  ;;  %v15060_v31 = vld [vmem:[#allocation3 + $0xa38] sm:$0xff]  }
 0x6e0   : >> { %12916 = vmatprep.subr.bf16.mxu0 %v15582_v53 }
 0x6e3   : >> { %12917 = vmatpush3.bf16.msra.mxu0 %v15017_v43  ;;  %v7027_v43 = vor.u32 %v7026_v2, %v7025_v37 }
 0x6e4   : >> { %12918 = vmatprep.subr.bf16.mxu0 %v15582_v53 }
 0x6e7   : >> { %12919 = vmatpush3.bf16.msra.mxu0 %v15018_v54  ;;  %v15061_v54 = vld [vmem:[#allocation3 + $0xa40] sm:$0xff]  }
 0x6e8   : >> { %12920 = vmatprep.subr.bf16.mxu0 %v15582_v53 }
 0x6eb   : >> { %12921 = vmatpush3.bf16.msra.mxu0 %v15019_v50  ;;  %v15062_v50 = vld [vmem:[#allocation3 + $0xa48] sm:$0xff]  }
 0x6ec   : >> { %12922 = vmatprep.subr.bf16.mxu0 %v15582_v53 }
 0x6ef   : >> { %12923 = vmatpush3.bf16.msra.mxu0 %v15020_v56  ;;  %v15063_v56 = vld [vmem:[#allocation3 + $0xa50] sm:$0xff]  }
 0x6f0   : >> { %12928 = vmatprep.subr.bf16.mxu0 %v15582_v53 }
 0x6f2   : >> { %12925 = vmatmul.mubr.bf16.vlgmr.msra.gmra.mrb[0].mxu0 %v6459_v15  ;;  %v15065_v15 = vld [vmem:[#allocation3 + $0xa60] sm:$0xff]  }
 0x6f3   : >> { %12929 = vmatpush3.bf16.msra.mxu0 %v15021_v35  ;;  %12944 = vmatprep.mubr.msk.bf16.mxu0 %vm15583_vm0, %v15582_v53  ;;  %v15066_v35 = vld [vmem:[#allocation3 + $0xa68] sm:$0xff]  }
 0x6f4   : >> { %12930 = vmatprep.subr.bf16.mxu0 %v15582_v53 }
 0x6f7   : >> { %12931 = vmatpush3.bf16.msra.mxu0 %v15022_v61  ;;  %v15067_v61 = vld [vmem:[#allocation3 + $0xa70] sm:$0xff]  }
 0x6f8   : >> { %12932 = vmatprep.subr.bf16.mxu0 %v15582_v53 }
 0x6fb   : >> { %12933 = vmatpush3.bf16.msra.mxu0 %v15023_v49  ;;  %v15068_v49 = vld [vmem:[#allocation3 + $0xa78] sm:$0xff]  }
 0x6fc   : >> { %12934 = vmatprep.subr.bf16.mxu0 %v15582_v53 }
 0x6ff   : >> { %12935 = vmatpush3.bf16.msra.mxu0 %v15024_v58  ;;  %v7135_v58 = vrot.slane %v17195_v48, 3  ;;  %v15073_v48 = vld [vmem:[#allocation3 + $0xaa0] sm:$0xff]  }
 0x700   : >> { %12936 = vmatprep.subr.bf16.mxu0 %v15582_v53 }
 0x703   : >> { %12937 = vmatpush3.bf16.msra.mxu0 %v15025_v3  ;;  %v15070_v3 = vld [vmem:[#allocation3 + $0xa88] sm:$0xff]  }
 0x704   : >> { %12938 = vmatprep.subr.bf16.mxu0 %v15582_v53 }
 0x707   : >> { %12939 = vmatpush3.bf16.msra.mxu0 %v15026_v63  ;;  %v15071_v63 = vld [vmem:[#allocation3 + $0xa90] sm:$0xff]  }
 0x708   : >> { %12940 = vmatprep.subr.bf16.mxu0 %v15582_v53 }
 0x70b   : >> { %12941 = vmatpush3.bf16.msra.mxu0 %v15027_v30  ;;  %v15074_v30 = vld [vmem:[#allocation3 + $0xaa8] sm:$0xff]  }
 0x70c   : >> { %12942 = vmatprep.subr.bf16.mxu0 %v15582_v53 }
 0x70f   : >> { %12943 = vmatpush3.bf16.msra.mxu0 %v15028_v4  ;;  %v10574_v4 = vld [vmem:[%s16738_s28 + $0x60] sm:$0xff] }
 0x710   : >> { %12948 = vmatprep.subr.bf16.mxu0 %v15582_v53 }
 0x712   : >> { %12945 = vmatmul.mubr.bf16.vlgmr.msra.gmra.mrb[0].mxu0 %v6590_v47  ;;  %v7231_v47 = vpack.c.bf16 %v10574_v4, %v10574_v4 }
 0x713   : >> { %12949 = vmatpush3.bf16.msra.mxu0 %v15029_v0  ;;  %12964 = vmatprep.mubr.msk.bf16.mxu0 %vm15583_vm0, %v15582_v53  ;;  %v15077_v0 = vld [vmem:[#allocation3 + $0xac0] sm:$0xff]  }
 0x714   : >> { %12950 = vmatprep.subr.bf16.mxu0 %v15582_v53 }
 0x717   : >> { %12951 = vmatpush3.bf16.msra.mxu0 %v15030_v13  ;;  %v15078_v13 = vld [vmem:[#allocation3 + $0xac8] sm:$0xff]  }
 0x718   : >> { %12952 = vmatprep.subr.bf16.mxu0 %v15582_v53 }
 0x71b   : >> { %12953 = vmatpush3.bf16.msra.mxu0 %v15031_v38  ;;  %v15079_v38 = vld [vmem:[#allocation3 + $0xad0] sm:$0xff]  }
 0x71c   : >> { %12954 = vmatprep.subr.bf16.mxu0 %v15582_v53 }
 0x71f   : >> { %12955 = vmatpush3.bf16.msra.mxu0 %v15032_v26  ;;  %v15080_v26 = vld [vmem:[#allocation3 + $0xad8] sm:$0xff]  }
 0x720   : >> { %12956 = vmatprep.subr.bf16.mxu0 %v15582_v53 }
 0x723   : >> { %12957 = vmatpush3.bf16.msra.mxu0 %v15033_v17  ;;  %v10575_v17 = vld [vmem:[%s16738_s28 + $0x68] sm:$0x3f] }
 0x724   : >> { %12958 = vmatprep.subr.bf16.mxu0 %v15582_v53 }
 0x727   : >> { %12959 = vmatpush3.bf16.msra.mxu0 %v15034_v45  ;;  %v15081_v45 = vld [vmem:[#allocation3 + $0xae0] sm:$0xff]  }
 0x728   : >> { %12960 = vmatprep.subr.bf16.mxu0 %v15582_v53 }
 0x72b   : >> { %12961 = vmatpush3.bf16.msra.mxu0 %v15035_v24  ;;  %v17286_v24 = vpack.c.bf16 %v10575_v17, %v10574_v4  ;;  %v15101_v4 = vld [vmem:[#allocation3 + $0xb80] sm:$0xff]   ;;  %v15107_v17 = vld [vmem:[#allocation3 + $0xbb0] sm:$0xff]  }
 0x72c   : >> { %12962 = vmatprep.subr.bf16.mxu0 %v15582_v53 }
 0x72f   : >> { %12963 = vmatpush3.bf16.msra.mxu0 %v15036_v19  ;;  %v15082_v19 = vld [vmem:[#allocation3 + $0xae8] sm:$0xff]  }
 0x730   : >> { %12968 = vmatprep.subr.bf16.mxu0 %v15582_v53 }
 0x732   : >> { %12965 = vmatmul.mubr.bf16.vlgmr.msra.gmra.mrb[0].mxu0 %v6699_v21  ;;  %v17290_v21 = vshll.u32 %v17286_v24, 16 }
 0x733   : >> { %12969 = vmatpush3.bf16.msra.mxu0 %v15037_v6  ;;  %12984 = vmatprep.mubr.msk.bf16.mxu0 %vm15583_vm0, %v15582_v53  ;;  %v15083_v6 = vld [vmem:[#allocation3 + $0xaf0] sm:$0xff]  }
 0x734   : >> { %12970 = vmatprep.subr.bf16.mxu0 %v15582_v53 }
 0x737   : >> { %12971 = vmatpush3.bf16.msra.mxu0 %v15038_v8  ;;  %v17294_v8 = vshrl.u32 %v17286_v24, 16 }
 0x738   : >> { %12972 = vmatprep.subr.bf16.mxu0 %v15582_v53 }
 0x73b   : >> { %12973 = vmatpush3.bf16.msra.mxu0 %v15039_v7  ;;  %v7361_v7 = vrot.slane %v17290_v21, 1 }
 0x73c   : >> { %12974 = vmatprep.subr.bf16.mxu0 %v15582_v53 }
 0x73f   : >> { %12975 = vmatpush3.bf16.msra.mxu0 %v15040_v28  ;;  %v15084_v28 = vld [vmem:[#allocation3 + $0xaf8] sm:$0xff]  }
 0x740   : >> { %12976 = vmatprep.subr.bf16.mxu0 %v15582_v53 }
 0x743   : >> { %12977 = vmatpush3.bf16.msra.mxu0 %v15041_v59  ;;  %v7362_v59 = vor.u32 %v7361_v7, %v17294_v8  ;;  %v15110_v7 = vld [vmem:[#allocation3 + $0xbc8] sm:$0xff]  }
 0x744   : >> { %12978 = vmatprep.subr.bf16.mxu0 %v15582_v53 }
 0x747   : >> { %12979 = vmatpush3.bf16.msra.mxu0 %v15042_v22  ;;  %v17235_v52 = vpop.f32.mrb[0].mxu1  ;;  %v15085_v22 = vld [vmem:[#allocation3 + $0xb00] sm:$0xff]  }
 0x748   : >> { %12980 = vmatprep.subr.bf16.mxu0 %v15582_v53  ;;  %v12526_v57 = vpop.f32.mrb[1].mxu1 }
 0x749   : >> { %v4361_v1 = vpop.f32.mrb[2].mxu1  ;;  %v15093_v57 = vld [vmem:[#allocation3 + $0xb40] sm:$0xff]  }
 0x74a   : >> { %v12527_v12 = vpop.f32.mrb[3].mxu1  ;;  %v17311_v1 = vld [vmem:[#allocation13] sm:$0xff] }
 0x74b   : >> { %12981 = vmatpush3.bf16.msra.mxu0 %v15043_v5  ;;  %v15086_v5 = vld [vmem:[#allocation3 + $0xb08] sm:$0xff]   ;;  %v17313_v12 = vld [vmem:[#allocation13 + $0x8] sm:$0xff] }
 0x74c   : >> { %12982 = vmatprep.subr.bf16.mxu0 %v15582_v53 }
 0x74f   : >> { %12983 = vmatpush3.bf16.msra.mxu0 %v15044_v36  ;;  %v15089_v36 = vld [vmem:[#allocation3 + $0xb20] sm:$0xff]  }
 0x750   : >> { %12988 = vmatprep.subr.bf16.mxu0 %v15582_v53 }
 0x752   : >> { %12985 = vmatmul.mubr.bf16.vlgmr.msra.gmra.mrb[0].mxu0 %v6809_v14  ;;  %v15090_v14 = vld [vmem:[#allocation3 + $0xb28] sm:$0xff]  }
 0x753   : >> { %12989 = vmatpush3.bf16.msra.mxu0 %v15045_v11  ;;  %13004 = vmatprep.mubr.msk.bf16.mxu0 %vm15583_vm0, %v15582_v53  ;;  %v15091_v11 = vld [vmem:[#allocation3 + $0xb30] sm:$0xff]  }
 0x754   : >> { %12990 = vmatprep.subr.bf16.mxu0 %v15582_v53 }
 0x757   : >> { %12991 = vmatpush3.bf16.msra.mxu0 %v15046_v46  ;;  %v15092_v46 = vld [vmem:[#allocation3 + $0xb38] sm:$0xff]  }
 0x758   : >> { %12992 = vmatprep.subr.bf16.mxu0 %v15582_v53 }
 0x75b   : >> { %12993 = vmatpush3.bf16.msra.mxu0 %v15047_v60  ;;  %v7471_v60 = vrot.slane %v17286_v24, 1 }
 0x75c   : >> { %12994 = vmatprep.subr.bf16.mxu0 %v15582_v53 }
 0x75f   : >> { %12995 = vmatpush3.bf16.msra.mxu0 %v15048_v55  ;;  %v17315_v55 = vld [vmem:[#allocation13 + $0x10] sm:$0xff] }
 0x760   : >> { %12996 = vmatprep.subr.bf16.mxu0 %v15582_v53 }
 0x763   : >> { %12997 = vmatpush3.bf16.msra.mxu0 %v15049_v62  ;;  %v15094_v62 = vld [vmem:[#allocation3 + $0xb48] sm:$0xff]  }
 0x764   : >> { %12998 = vmatprep.subr.bf16.mxu0 %v15582_v53 }
 0x767   : >> { %12999 = vmatpush3.bf16.msra.mxu0 %v15050_v41  ;;  %v8015_v41 = vand.u32 4294901760, %v17311_v1 }
 0x768   : >> { %13000 = vmatprep.subr.bf16.mxu0 %v15582_v53 }
 0x76b   : >> { %13001 = vmatpush3.bf16.msra.mxu0 %v15051_v9  ;;  %v8018_v9 = vand.u32 4294901760, %v17313_v12 }
 0x76c   : >> { %13002 = vmatprep.subr.bf16.mxu0 %v15582_v53 }
 0x76f   : >> { %13003 = vmatpush3.bf16.msra.mxu0 %v15052_v25  ;;  %v17321_v25 = vld [vmem:[#allocation13 + $0x18] sm:$0xff] }
 0x770   : >> { %13008 = vmatprep.subr.bf16.mxu0 %v15582_v53 }
 0x772   : >> { %13005 = vmatmul.mubr.bf16.vlgmr.msra.gmra.mrb[0].mxu0 %v6917_v42  ;;  %v8021_v42 = vand.u32 4294901760, %v17315_v55 }
 0x773   : >> { %13009 = vmatpush3.bf16.msra.mxu0 %v15053_v23  ;;  %13024 = vmatprep.mubr.msk.bf16.mxu0 %vm15583_vm0, %v15582_v53  ;;  %v15584_v23 = vmov 0.0|0.0  }
 0x774   : >> { %13010 = vmatprep.subr.bf16.mxu0 %v15582_v53  ;;  %13992 = vmatprep.subr.bf16.mxu1 %v15584_v23 }
 0x777   : >> { %13011 = vmatpush3.bf16.msra.mxu0 %v15054_v40  ;;  %v8024_v40 = vand.u32 4294901760, %v17321_v25 }
 0x778   : >> { %13012 = vmatprep.subr.bf16.mxu0 %v15582_v53 }
 0x77b   : >> { %13013 = vmatpush3.bf16.msra.mxu0 %v15055_v51  ;;  %v17327_v51 = vld [vmem:[#allocation13 + $0x20] sm:$0xff] }
 0x77c   : >> { %13014 = vmatprep.subr.bf16.mxu0 %v15582_v53  ;;  %v8027_v37 = vand.u32 4294901760, %v17327_v51 }
 0x77f   : >> { %13015 = vmatpush3.bf16.msra.mxu0 %v15056_v44  ;;  %v17329_v44 = vld [vmem:[#allocation13 + $0x28] sm:$0xff] }
 0x780   : >> { %13016 = vmatprep.subr.bf16.mxu0 %v15582_v53  ;;  %v8030_v2 = vand.u32 4294901760, %v17329_v44 }
 0x783   : >> { %13017 = vmatpush3.bf16.msra.mxu0 %v15057_v32  ;;  %v17335_v32 = vpack.c.bf16 %v8018_v9, %v8015_v41 }
 0x784   : >> { %13018 = vmatprep.subr.bf16.mxu0 %v15582_v53 }
 0x785   : >> { %13994 = vmatpush3.bf16.msra.mxu1 %v17335_v32 }
 0x786   : >> { %13995 = vmatprep.subr.bf16.mxu1 %v15584_v23 }
 0x787   : >> { %13019 = vmatpush3.bf16.msra.mxu0 %v15058_v39  ;;  %v15095_v39 = vld [vmem:[#allocation3 + $0xb50] sm:$0xff]  }
 0x788   : >> { %13020 = vmatprep.subr.bf16.mxu0 %v15582_v53 }
 0x78b   : >> { %13021 = vmatpush3.bf16.msra.mxu0 %v15059_v18  ;;  %v17342_v18 = vpack.c.bf16 %v8024_v40, %v8021_v42 }
 0x78c   : >> { %13022 = vmatprep.subr.bf16.mxu0 %v15582_v53 }
 0x78d   : >> { %13997 = vmatpush3.bf16.msra.mxu1 %v17342_v18 }
 0x78e   : >> { %13998 = vmatprep.subr.bf16.mxu1 %v15584_v23 }
 0x78f   : >> { %13023 = vmatpush3.bf16.msra.mxu0 %v15060_v31  ;;  %v17348_v31 = vld [vmem:[#allocation13 + $0x30] sm:$0xff] }
 0x790   : >> { %13028 = vmatprep.subr.bf16.mxu0 %v15582_v53 }
 0x792   : >> { %13025 = vmatmul.mubr.bf16.vlgmr.msra.gmra.mrb[0].mxu0 %v7027_v43  ;;  %v17350_v43 = vld [vmem:[#allocation13 + $0x38] sm:$0xff] }
 0x793   : >> { %13029 = vmatpush3.bf16.msra.mxu0 %v15061_v54  ;;  %13044 = vmatprep.mubr.msk.bf16.mxu0 %vm15583_vm0, %v15582_v53  ;;  %v15096_v54 = vld [vmem:[#allocation3 + $0xb58] sm:$0xff]  }
 0x794   : >> { %13030 = vmatprep.subr.bf16.mxu0 %v15582_v53 }
 0x797   : >> { %13031 = vmatpush3.bf16.msra.mxu0 %v15062_v50  ;;  %v17357_v50 = vpack.c.bf16 %v8030_v2, %v8027_v37 }
 0x798   : >> { %13032 = vmatprep.subr.bf16.mxu0 %v15582_v53 }
 0x799   : >> { %14000 = vmatpush3.bf16.msra.mxu1 %v17357_v50 }
 0x79a   : >> { %14001 = vmatprep.subr.bf16.mxu1 %v15584_v23 }
 0x79b   : >> { %13033 = vmatpush3.bf16.msra.mxu0 %v15063_v56  ;;  %v8033_v56 = vand.u32 4294901760, %v17348_v31 }
 0x79c   : >> { %13034 = vmatprep.subr.bf16.mxu0 %v15582_v53 }
 0x79f   : >> { %13035 = vmatpush3.bf16.msra.mxu0 %v15064_v10  ;;  %v8036_v10 = vand.u32 4294901760, %v17350_v43 }
 0x7a0   : >> { %13036 = vmatprep.subr.bf16.mxu0 %v15582_v53 }
 0x7a3   : >> { %13037 = vmatpush3.bf16.msra.mxu0 %v15065_v15  ;;  %v17363_v15 = vld [vmem:[#allocation13 + $0x40] sm:$0xff] }
 0x7a4   : >> { %13038 = vmatprep.subr.bf16.mxu0 %v15582_v53 }
 0x7a7   : >> { %13039 = vmatpush3.bf16.msra.mxu0 %v15066_v35  ;;  %v17365_v35 = vld [vmem:[#allocation13 + $0x48] sm:$0xff] }
 0x7a8   : >> { %13040 = vmatprep.subr.bf16.mxu0 %v15582_v53 }
 0x7ab   : >> { %13041 = vmatpush3.bf16.msra.mxu0 %v15067_v61  ;;  %v15097_v61 = vld [vmem:[#allocation3 + $0xb60] sm:$0xff]  }
 0x7ac   : >> { %13042 = vmatprep.subr.bf16.mxu0 %v15582_v53 }
 0x7af   : >> { %13043 = vmatpush3.bf16.msra.mxu0 %v15068_v49  ;;  %v17372_v49 = vpack.c.bf16 %v8036_v10, %v8033_v56 }
 0x7b0   : >> { %13048 = vmatprep.subr.bf16.mxu0 %v15582_v53 }
 0x7b1   : >> { %14003 = vmatpush3.bf16.msra.mxu1 %v17372_v49 }
 0x7b2   : >> { %13045 = vmatmul.mubr.bf16.vlgmr.msra.gmra.mrb[0].mxu0 %v7135_v58  ;;  %v8039_v58 = vand.u32 4294901760, %v17363_v15  ;;  %14004 = vmatprep.subr.bf16.mxu1 %v15584_v23 }
 0x7b3   : >> { %13049 = vmatpush3.bf16.msra.mxu0 %v15069_v20  ;;  %13064 = vmatprep.mubr.msk.bf16.mxu0 %vm15583_vm0, %v15582_v53  ;;  %v8042_v20 = vand.u32 4294901760, %v17365_v35 }
 0x7b4   : >> { %13050 = vmatprep.subr.bf16.mxu0 %v15582_v53 }
 0x7b7   : >> { %13051 = vmatpush3.bf16.msra.mxu0 %v15070_v3  ;;  %v15098_v3 = vld [vmem:[#allocation3 + $0xb68] sm:$0xff]  }
 0x7b8   : >> { %13052 = vmatprep.subr.bf16.mxu0 %v15582_v53 }
 0x7bb   : >> { %13053 = vmatpush3.bf16.msra.mxu0 %v15071_v63  ;;  %v17383_v63 = vpack.c.bf16 %v8042_v20, %v8039_v58 }
 0x7bc   : >> { %13054 = vmatprep.subr.bf16.mxu0 %v15582_v53 }
 0x7bd   : >> { %14006 = vmatpush3.bf16.msra.mxu1 %v17383_v63 }
 0x7be   : >> { %14007 = vmatprep.subr.bf16.mxu1 %v15584_v23 }
 0x7bf   : >> { %13055 = vmatpush3.bf16.msra.mxu0 %v15072_v29  ;;  %v15099_v29 = vld [vmem:[#allocation3 + $0xb70] sm:$0xff]  }
 0x7c0   : >> { %13056 = vmatprep.subr.bf16.mxu0 %v15582_v53 }
 0x7c3   : >> { %13057 = vmatpush3.bf16.msra.mxu0 %v15073_v48  ;;  %v7579_v48 = vrot.slane %v17294_v8, 1 }
 0x7c4   : >> { %13058 = vmatprep.subr.bf16.mxu0 %v15582_v53 }
 0x7c7   : >> { %13059 = vmatpush3.bf16.msra.mxu0 %v15074_v30  ;;  %v7580_v30 = vrot.slane %v17290_v21, 2 }
 0x7c8   : >> { %13060 = vmatprep.subr.bf16.mxu0 %v15582_v53 }
 0x7cb   : >> { %13061 = vmatpush3.bf16.msra.mxu0 %v15075_v33  ;;  %v15100_v33 = vld [vmem:[#allocation3 + $0xb78] sm:$0xff]  }
 0x7cc   : >> { %13062 = vmatprep.subr.bf16.mxu0 %v15582_v53 }
 0x7cf   : >> { %13063 = vmatpush3.bf16.msra.mxu0 %v15076_v34  ;;  %v7581_v34 = vor.u32 %v7580_v30, %v7579_v48 }
 0x7d0   : >> { %13068 = vmatprep.subr.bf16.mxu0 %v15582_v53 }
 0x7d2   : >> { %13065 = vmatmul.mubr.bf16.vlgmr.msra.gmra.mrb[0].mxu0 %v7231_v47  ;;  %v15102_v47 = vld [vmem:[#allocation3 + $0xb88] sm:$0xff]  }
 0x7d3   : >> { %13069 = vmatpush3.bf16.msra.mxu0 %v15077_v0  ;;  %13084 = vmatprep.mubr.msk.bf16.mxu0 %vm15583_vm0, %v15582_v53  ;;  %v15103_v0 = vld [vmem:[#allocation3 + $0xb90] sm:$0xff]  }
 0x7d4   : >> { %13070 = vmatprep.subr.bf16.mxu0 %v15582_v53 }
 0x7d7   : >> { %13071 = vmatpush3.bf16.msra.mxu0 %v15078_v13  ;;  %v15104_v13 = vld [vmem:[#allocation3 + $0xb98] sm:$0xff]  }
 0x7d8   : >> { %13072 = vmatprep.subr.bf16.mxu0 %v15582_v53 }
 0x7db   : >> { %13073 = vmatpush3.bf16.msra.mxu0 %v15079_v38  ;;  %v15105_v38 = vld [vmem:[#allocation3 + $0xba0] sm:$0xff]  }
 0x7dc   : >> { %13074 = vmatprep.subr.bf16.mxu0 %v15582_v53 }
 0x7df   : >> { %13075 = vmatpush3.bf16.msra.mxu0 %v15080_v26  ;;  %v15106_v26 = vld [vmem:[#allocation3 + $0xba8] sm:$0xff]  }
 0x7e0   : >> { %13076 = vmatprep.subr.bf16.mxu0 %v15582_v53 }
 0x7e3   : >> { %13077 = vmatpush3.bf16.msra.mxu0 %v15081_v45  ;;  %v15108_v45 = vld [vmem:[#allocation3 + $0xbb8] sm:$0xff]  }
 0x7e4   : >> { %13078 = vmatprep.subr.bf16.mxu0 %v15582_v53 }
 0x7e7   : >> { %13079 = vmatpush3.bf16.msra.mxu0 %v15082_v19  ;;  %v7689_v19 = vrot.slane %v17286_v24, 2 }
 0x7e8   : >> { %13080 = vmatprep.subr.bf16.mxu0 %v15582_v53 }
 0x7eb   : >> { %13081 = vmatpush3.bf16.msra.mxu0 %v15083_v6  ;;  %v15109_v6 = vld [vmem:[#allocation3 + $0xbc0] sm:$0xff]  }
 0x7ec   : >> { %13082 = vmatprep.subr.bf16.mxu0 %v15582_v53 }
 0x7ef   : >> { %13083 = vmatpush3.bf16.msra.mxu0 %v15084_v28  ;;  %v15111_v28 = vld [vmem:[#allocation3 + $0xbd0] sm:$0xff]  }
 0x7f0   : >> { %13088 = vmatprep.subr.bf16.mxu0 %v15582_v53 }
 0x7f2   : >> { %13085 = vmatmul.mubr.bf16.vlgmr.msra.gmra.mrb[0].mxu0 %v7362_v59  ;;  %v15112_v59 = vld [vmem:[#allocation3 + $0xbd8] sm:$0xff]  }
 0x7f3   : >> { %13089 = vmatpush3.bf16.msra.mxu0 %v15085_v22  ;;  %13104 = vmatprep.mubr.msk.bf16.mxu0 %vm15583_vm0, %v15582_v53  ;;  %v15113_v22 = vld [vmem:[#allocation3 + $0xbe0] sm:$0xff]  }
 0x7f4   : >> { %13090 = vmatprep.subr.bf16.mxu0 %v15582_v53 }
 0x7f7   : >> { %13091 = vmatpush3.bf16.msra.mxu0 %v15086_v5  ;;  %v15114_v5 = vld [vmem:[#allocation3 + $0xbe8] sm:$0xff]  }
 0x7f8   : >> { %13092 = vmatprep.subr.bf16.mxu0 %v15582_v53 }
 0x7fb   : >> { %13093 = vmatpush3.bf16.msra.mxu0 %v15087_v27  ;;  %v15115_v27 = vld [vmem:[#allocation3 + $0xbf0] sm:$0xff]  }
 0x7fc   : >> { %13094 = vmatprep.subr.bf16.mxu0 %v15582_v53 }
 0x7ff   : >> { %13095 = vmatpush3.bf16.msra.mxu0 %v15088_v16  ;;  %v7797_v16 = vrot.slane %v17294_v8, 2  ;;  %v15119_v8 = vld [vmem:[#allocation3 + $0xc10] sm:$0xff]  }
 0x800   : >> { %13096 = vmatprep.subr.bf16.mxu0 %v15582_v53 }
 0x803   : >> { %13097 = vmatpush3.bf16.msra.mxu0 %v15089_v36  ;;  %v7798_v36 = vrot.slane %v17290_v21, 3  ;;  %v15120_v21 = vld [vmem:[#allocation3 + $0xc18] sm:$0xff]  }
 0x804   : >> { %13098 = vmatprep.subr.bf16.mxu0 %v15582_v53 }
 0x807   : >> { %13099 = vmatpush3.bf16.msra.mxu0 %v15090_v14  ;;  %v15116_v14 = vld [vmem:[#allocation3 + $0xbf8] sm:$0xff]  }
 0x808   : >> { %13100 = vmatprep.subr.bf16.mxu0 %v15582_v53 }
 0x80b   : >> { %13101 = vmatpush3.bf16.msra.mxu0 %v15091_v11  ;;  %v7799_v11 = vor.u32 %v7798_v36, %v7797_v16 }
 0x80c   : >> { %13102 = vmatprep.subr.bf16.mxu0 %v15582_v53 }
 0x80f   : >> { %13103 = vmatpush3.bf16.msra.mxu0 %v15092_v46  ;;  %v15117_v46 = vld [vmem:[#allocation3 + $0xc00] sm:$0xff]  }
 0x810   : >> { %13108 = vmatprep.subr.bf16.mxu0 %v15582_v53 }
 0x812   : >> { %13105 = vmatmul.mubr.bf16.vlgmr.msra.gmra.mrb[0].mxu0 %v7471_v60  ;;  %v15118_v60 = vld [vmem:[#allocation3 + $0xc08] sm:$0xff]  }
 0x813   : >> { %13109 = vmatpush3.bf16.msra.mxu0 %v15093_v57  ;;  %13124 = vmatprep.mubr.msk.bf16.mxu0 %vm15583_vm0, %v15582_v53  ;;  %v15121_v57 = vld [vmem:[#allocation3 + $0xc20] sm:$0xff]  }
 0x814   : >> { %13110 = vmatprep.subr.bf16.mxu0 %v15582_v53 }
 0x817   : >> { %13111 = vmatpush3.bf16.msra.mxu0 %v15094_v62  ;;  %v15122_v62 = vld [vmem:[#allocation3 + $0xc28] sm:$0xff]  }
 0x818   : >> { %13112 = vmatprep.subr.bf16.mxu0 %v15582_v53 }
 0x81b   : >> { %13113 = vmatpush3.bf16.msra.mxu0 %v15095_v39  ;;  %v15123_v39 = vld [vmem:[#allocation3 + $0xc30] sm:$0xff]  }
 0x81c   : >> { %13114 = vmatprep.subr.bf16.mxu0 %v15582_v53 }
 0x81f   : >> { %13115 = vmatpush3.bf16.msra.mxu0 %v15096_v54  ;;  %v15124_v54 = vld [vmem:[#allocation3 + $0xc38] sm:$0xff]  }
 0x820   : >> { %13116 = vmatprep.subr.bf16.mxu0 %v15582_v53 }
 0x823   : >> { %13117 = vmatpush3.bf16.msra.mxu0 %v15097_v61  ;;  %v7907_v61 = vrot.slane %v17286_v24, 3  ;;  %v8013_v24 = vld [vmem:[#allocation13 + $0x78] sm:$0xff] }
 0x824   : >> { %13118 = vmatprep.subr.bf16.mxu0 %v15582_v53 }
 0x827   : >> { %13119 = vmatpush3.bf16.msra.mxu0 %v15098_v3  ;;  %v8008_v3 = vld [vmem:[#allocation13 + $0x50] sm:$0xff] }
 0x828   : >> { %13120 = vmatprep.subr.bf16.mxu0 %v15582_v53  ;;  %v8045_v48 = vand.u32 4294901760, %v8008_v3 }
 0x82b   : >> { %13121 = vmatpush3.bf16.msra.mxu0 %v15099_v29  ;;  %v8009_v29 = vld [vmem:[#allocation13 + $0x58] sm:$0xff] }
 0x82c   : >> { %13122 = vmatprep.subr.bf16.mxu0 %v15582_v53  ;;  %v8048_v30 = vand.u32 4294901760, %v8009_v29 }
 0x82f   : >> { %13123 = vmatpush3.bf16.msra.mxu0 %v15100_v33  ;;  %v17427_v33 = vpack.c.bf16 %v8048_v30, %v8045_v48 }
 0x830   : >> { %13128 = vmatprep.subr.bf16.mxu0 %v15582_v53 }
 0x831   : >> { %14009 = vmatpush3.bf16.msra.mxu1 %v17427_v33 }
 0x832   : >> { %13125 = vmatmul.mubr.bf16.vlgmr.msra.gmra.mrb[0].mxu0 %v7581_v34  ;;  %v8010_v34 = vld [vmem:[#allocation13 + $0x60] sm:$0xff]  ;;  %14010 = vmatprep.subr.bf16.mxu1 %v15584_v23 }
 0x833   : >> { %13129 = vmatpush3.bf16.msra.mxu0 %v15101_v4  ;;  %13144 = vmatprep.mubr.msk.bf16.mxu0 %vm15583_vm0, %v15582_v53  ;;  %v8011_v4 = vld [vmem:[#allocation13 + $0x68] sm:$0xff] }
 0x834   : >> { %13130 = vmatprep.subr.bf16.mxu0 %v15582_v53 }
 0x837   : >> { %13131 = vmatpush3.bf16.msra.mxu0 %v15102_v47  ;;  %v8051_v47 = vand.u32 4294901760, %v8010_v34 }
 0x838   : >> { %13132 = vmatprep.subr.bf16.mxu0 %v15582_v53 }
 0x83b   : >> { %13133 = vmatpush3.bf16.msra.mxu0 %v15103_v0  ;;  %v8054_v0 = vand.u32 4294901760, %v8011_v4 }
 0x83c   : >> { %13134 = vmatprep.subr.bf16.mxu0 %v15582_v53 }
 0x83f   : >> { %13135 = vmatpush3.bf16.msra.mxu0 %v15104_v13  ;;  %v17431_v13 = vpack.c.bf16 %v8054_v0, %v8051_v47 }
 0x840   : >> { %13136 = vmatprep.subr.bf16.mxu0 %v15582_v53 }
 0x841   : >> { %14012 = vmatpush3.bf16.msra.mxu1 %v17431_v13 }
 0x842   : >> { %14013 = vmatprep.subr.bf16.mxu1 %v15584_v23 }
 0x843   : >> { %13137 = vmatpush3.bf16.msra.mxu0 %v15105_v38  ;;  %v8012_v38 = vld [vmem:[#allocation13 + $0x70] sm:$0xff] }
 0x844   : >> { %13138 = vmatprep.subr.bf16.mxu0 %v15582_v53 }
 0x847   : >> { %13139 = vmatpush3.bf16.msra.mxu0 %v15106_v26  ;;  %v8057_v26 = vand.u32 4294901760, %v8012_v38 }
 0x848   : >> { %13140 = vmatprep.subr.bf16.mxu0 %v15582_v53 }
 0x84b   : >> { %13141 = vmatpush3.bf16.msra.mxu0 %v15107_v17  ;;  %v8060_v17 = vand.u32 4294901760, %v8013_v24 }
 0x84c   : >> { %13142 = vmatprep.subr.bf16.mxu0 %v15582_v53 }
 0x84f   : >> { %13143 = vmatpush3.bf16.msra.mxu0 %v15108_v45  ;;  %v17435_v45 = vpack.c.bf16 %v8060_v17, %v8057_v26 }
 0x850   : >> { %13148 = vmatprep.subr.bf16.mxu0 %v15582_v53 }
 0x851   : >> { %14015 = vmatpush3.bf16.msra.mxu1 %v17435_v45 }
 0x852   : >> { %13145 = vmatmul.mubr.bf16.vlgmr.msra.gmra.mrb[0].mxu0 %v7689_v19  ;;  %14016 = vmatprep.subr.bf16.mxu1 %v15584_v23  ;;  %v17439_v19 = vsub.f32 %v8008_v3, %v8045_v48 }
 0x853   : >> { %13149 = vmatpush3.bf16.msra.mxu0 %v15109_v6  ;;  %13164 = vmatprep.mubr.msk.bf16.mxu0 %vm15583_vm0, %v15582_v53  ;;  %v17441_v6 = vsub.f32 %v8009_v29, %v8048_v30 }
 0x854   : >> { %13150 = vmatprep.subr.bf16.mxu0 %v15582_v53 }
 0x857   : >> { %13151 = vmatpush3.bf16.msra.mxu0 %v15110_v7  ;;  %v8178_v7 = vand.u32 4294901760, %v17439_v19 }
 0x858   : >> { %13152 = vmatprep.subr.bf16.mxu0 %v15582_v53 }
 0x85b   : >> { %13153 = vmatpush3.bf16.msra.mxu0 %v15111_v28  ;;  %v8185_v28 = vand.u32 4294901760, %v17441_v6 }
 0x85c   : >> { %13154 = vmatprep.subr.bf16.mxu0 %v15582_v53 }
 0x85f   : >> { %13155 = vmatpush3.bf16.msra.mxu0 %v15112_v59  ;;  %v8179_v59 = vsub.f32 %v17439_v19, %v8178_v7 }
 0x860   : >> { %13156 = vmatprep.subr.bf16.mxu0 %v15582_v53 }
 0x861   : >> { %v8180_v16 = vand.u32 4294901760, %v8179_v59  ;;  %v18071_v59 = vld [vmem:[#allocation26_spill] sm:$0xff] }
 0x863   : >> { %13157 = vmatpush3.bf16.msra.mxu0 %v15113_v22  ;;  %v8186_v22 = vsub.f32 %v17441_v6, %v8185_v28 }
 0x864   : >> { %13158 = vmatprep.subr.bf16.mxu0 %v15582_v53 }
 0x865   : >> { %v8187_v36 = vand.u32 4294901760, %v8186_v22 }
 0x867   : >> { %13159 = vmatpush3.bf16.msra.mxu0 %v15114_v5  ;;  %v17451_v5 = vsub.f32 %v8010_v34, %v8051_v47  ;;  %v17483_v47 = vpack.c.bf16 %v17441_v6, %v17439_v19 }
 0x868   : >> { %13160 = vmatprep.subr.bf16.mxu0 %v15582_v53 }
 0x86b   : >> { %13161 = vmatpush3.bf16.msra.mxu0 %v15115_v27  ;;  %v17453_v27 = vsub.f32 %v8011_v4, %v8054_v0 }
 0x86c   : >> { %13162 = vmatprep.subr.bf16.mxu0 %v15582_v53 }
 0x86d   : >> { %v17487_v0 = vpack.c.bf16 %v17453_v27, %v17451_v5 }
 0x86f   : >> { %13163 = vmatpush3.bf16.msra.mxu0 %v15116_v14  ;;  %v8192_v14 = vand.u32 4294901760, %v17451_v5 }
 0x870   : >> { %13168 = vmatprep.subr.bf16.mxu0 %v15582_v53 }
 0x872   : >> { %13165 = vmatmul.mubr.bf16.vlgmr.msra.gmra.mrb[0].mxu0 %v7799_v11  ;;  %v8199_v11 = vand.u32 4294901760, %v17453_v27 }
 0x873   : >> { %13169 = vmatpush3.bf16.msra.mxu0 %v15117_v46  ;;  %13184 = vmatprep.mubr.msk.bf16.mxu0 %vm15583_vm0, %v15582_v53  ;;  %v17457_v46 = vpack.c.bf16 %v8187_v36, %v8180_v16 }
 0x874   : >> { %13170 = vmatprep.subr.bf16.mxu0 %v15582_v53 }
 0x877   : >> { %13171 = vmatpush3.bf16.msra.mxu0 %v15118_v60  ;;  %v8193_v60 = vsub.f32 %v17451_v5, %v8192_v14 }
 0x878   : >> { %13172 = vmatprep.subr.bf16.mxu0 %v15582_v53 }
 0x87b   : >> { %13173 = vmatpush3.bf16.msra.mxu0 %v15119_v8  ;;  %v17462_v8 = vsub.f32 %v8012_v38, %v8057_v26  ;;  %v17500_v26 = vsub.f32 %v17311_v1, %v8015_v41  ;;  %v17518_v1 = vsub.f32 %v17321_v25, %v8024_v40  ;;  %v17539_v25 = vsub.f32 %v17329_v44, %v8030_v2 }
 0x87c   : >> { %13174 = vmatprep.subr.bf16.mxu0 %v15582_v53 }
 0x87d   : >> { %v8108_v16 = vand.u32 4294901760, %v17500_v26  ;;  %v8143_v2 = vand.u32 4294901760, %v17539_v25 }
 0x87f   : >> { %13175 = vmatpush3.bf16.msra.mxu0 %v15120_v21  ;;  %v17464_v21 = vsub.f32 %v8013_v24, %v8060_v17  ;;  %v2588_v24 = vld [vmem:[%s2587_s13] sm:$0xff]  ;;  %v17505_v17 = vsub.f32 %v17313_v12, %v8018_v9  ;;  %v8109_v9 = vsub.f32 %v17500_v26, %v8108_v16 }
 0x880   : >> { %13176 = vmatprep.subr.bf16.mxu0 %v15582_v53  ;;  %v2595_v22 = vadd.f32 %v18071_v59, %v2588_v24  ;;  %v17559_v59 = vsub.f32 %v17348_v31, %v8033_v56  ;;  %v8144_v56 = vsub.f32 %v17539_v25, %v8143_v2 }
 0x881   : >> { %v17491_v38 = vpack.c.bf16 %v17464_v21, %v17462_v8  ;;  %v8115_v36 = vand.u32 4294901760, %v17505_v17  ;;  %v18072_v19 = vand.u32 4294901760, %v17464_v21 }
 0x882   : >> { %v14368_v41 = vadd.f32 %v17235_v52, %v2595_v22  ;;  %v17534_v52 = vsub.f32 %v17327_v51, %v8027_v37  ;;  %v17564_v22 = vsub.f32 %v17350_v43, %v8036_v10  ;;  %v8150_v43 = vand.u32 4294901760, %v17559_v59 }
 0x883   : >> { %13177 = vmatpush3.bf16.msra.mxu0 %v15121_v57  ;;  %v8200_v57 = vsub.f32 %v17453_v27, %v8199_v11 }
 0x884   : >> { %13178 = vmatprep.subr.bf16.mxu0 %v15582_v53  ;;  %v8136_v37 = vand.u32 4294901760, %v17534_v52  ;;  %v8157_v10 = vand.u32 4294901760, %v17564_v22 }
 0x886   : >> { %v8137_v31 = vsub.f32 %v17534_v52, %v8136_v37 }
 0x887   : >> { %13179 = vmatpush3.bf16.msra.mxu0 %v15122_v62  ;;  %v8194_v62 = vand.u32 4294901760, %v8193_v60  ;;  %v17513_v60 = vsub.f32 %v17315_v55, %v8021_v42 }
 0x888   : >> { %13180 = vmatprep.subr.bf16.mxu0 %v15582_v53 }
 0x88b   : >> { %13181 = vmatpush3.bf16.msra.mxu0 %v15123_v39  ;;  %v8206_v39 = vand.u32 4294901760, %v17462_v8 }
 0x88c   : >> { %13182 = vmatprep.subr.bf16.mxu0 %v15582_v53 }
 0x88d   : >> { %v8207_v3 = vsub.f32 %v17462_v8, %v8206_v39  ;;  %v17751_v6 = vpack.c.bf16 %v18072_v19, %v8206_v39  ;;  %v15182_v19 = vld [vmem:[#allocation17 + $0x20] sm:$0xff]  }
 0x88f   : >> { %13183 = vmatpush3.bf16.msra.mxu0 %v15124_v54  ;;  %v17972_v54 = vand.u32 4294901760, %v17464_v21  ;;  %v8208_v30 = vand.u32 4294901760, %v8207_v3 }
 0x891   : >> { %v8214_v29 = vsub.f32 %v17464_v21, %v17972_v54  ;;  %v8151_v54 = vsub.f32 %v17559_v59, %v8150_v43 }
 0x892   : >> { %13185 = vmatmul.mubr.bf16.vlgmr.msra.gmra.mrb[0].mxu0 %v7907_v61  ;;  %v8201_v61 = vand.u32 4294901760, %v8200_v57  ;;  %v8116_v57 = vsub.f32 %v17505_v17, %v8115_v36 }
 0x893   : >> { %v8215_v34 = vand.u32 4294901760, %v8214_v29 }
 0x894   : >> { %v17477_v48 = vpack.c.bf16 %v8201_v61, %v8194_v62  ;;  %v8122_v62 = vand.u32 4294901760, %v17513_v60  ;;  %v8129_v61 = vand.u32 4294901760, %v17518_v1 }
 0x895   : >> { %v17479_v4 = vpack.c.bf16 %v8215_v34, %v8208_v30  ;;  %v8110_v30 = vand.u32 4294901760, %v8109_v9  ;;  %v8117_v34 = vand.u32 4294901760, %v8116_v57 }
 0x896   : >> { %v8123_v24 = vsub.f32 %v17513_v60, %v8122_v62  ;;  %v8130_v44 = vsub.f32 %v17518_v1, %v8129_v61 }
 0x898   : >> { %v8124_v9 = vand.u32 4294901760, %v8123_v24  ;;  %v8138_v24 = vand.u32 4294901760, %v8137_v31 }
 0x965   : >> { %v7991_v12 = vpop.f32.mrb[0].mxu0 }
 0x966   : >> { %v17528_v55 = vadd.f32 %v14368_v41, %v7991_v12  ;;  %v13186_v42 = vpop.f32.mrb[1].mxu0  ;;  %v17567_v12 = vpack.c.bf16 %v8117_v34, %v8110_v30 }
 0x967   : >> { %v7994_v40 = vpop.f32.mrb[2].mxu0  ;;  %v8131_v42 = vand.u32 4294901760, %v8130_v44  ;;  %v8145_v44 = vand.u32 4294901760, %v8144_v56 }
 0x968   : >> { %v17542_v3 = vand.u32 4294901760, %v17528_v55  ;;  %v13187_v29 = vpop.f32.mrb[3].mxu0  ;;  %v17583_v40 = vsub.f32 %v17363_v15, %v8039_v58  ;;  %v8158_v15 = vsub.f32 %v17564_v22, %v8157_v10 }
 0x969   : >> { %v17588_v29 = vsub.f32 %v17365_v35, %v8042_v20  ;;  %v17590_v34 = vpack.c.bf16 %v8131_v42, %v8124_v9  ;;  %v17604_v20 = vpack.c.bf16 %v8145_v44, %v8138_v24  ;;  %v8152_v9 = vand.u32 4294901760, %v8151_v54 }
 0x96a   : >> { %v17549_v51 = vsub.f32 %v17528_v55, %v17542_v3  ;;  %v8164_v58 = vand.u32 4294901760, %v17583_v40  ;;  %v17631_v44 = vpack.c.bf16 %v17505_v17, %v17500_v26  ;;  %v17711_v26 = vpack.c.bf16 %v8143_v2, %v8136_v37  ;;  %v18073_v37 = vld [vmem:[#allocation27_spill] sm:$0xff] }
 0x96b   : >> { %v8171_v35 = vand.u32 4294901760, %v17588_v29  ;;  %v17719_v17 = vpack.c.bf16 %v8157_v10, %v8150_v43  ;;  %v15154_v43 = vld [vmem:[#allocation14 + $0x2c] ss:$16 sps:$4 sm:$0xff]   ;;  %v15152_v10 = vld [vmem:[#allocation14 + $0x28] ss:$16 sps:$4 sm:$0xff]  }
 0x96c   : >> { %v8097_v41 = vand.u32 4294901760, %v17549_v51  ;;  %v8165_v42 = vsub.f32 %v17583_v40, %v8164_v58 }
 0x96d   : >> { %v8172_v31 = vsub.f32 %v17588_v29, %v8171_v35 }
 0x96e   : >> { %v8098_v57 = vsub.f32 %v17549_v51, %v8097_v41 }
 0x96f   : >> { %v8173_v24 = vand.u32 4294901760, %v8172_v31  ;;  %v17691_v31 = vpack.c.bf16 %v8115_v36, %v8108_v16  ;;  %v17727_v16 = vpack.c.bf16 %v8171_v35, %v8164_v58  ;;  %v17735_v36 = vpack.c.bf16 %v8185_v28, %v8178_v7  ;;  %v15158_v58 = vld [vmem:[#allocation14 + $0x68] ss:$16 sps:$4 sm:$0xff]   ;;  %v15163_v35 = vld [vmem:[#allocation14 + $0x8c] ss:$16 sps:$4 sm:$0xff]  }
 0x970   : >> { %v8099_v30 = vand.u32 4294901760, %v8098_v57  ;;  %v8159_v57 = vand.u32 4294901760, %v8158_v15  ;;  %v17638_v15 = vpack.c.bf16 %v17518_v1, %v17513_v60  ;;  %v17743_v60 = vpack.c.bf16 %v8199_v11, %v8192_v14  ;;  %v15146_v1 = vld [vmem:[#allocation14 + $0xe0] ss:$16 sps:$4 sm:$0xff]  }
 0x972   : >> { %13221 = vmatmul.mubr.f32.vlgmr.msra.gmra.mrb[4].mxu1 %v8099_v30  ;;  %v17615_v56 = vpack.c.bf16 %v8159_v57, %v8152_v9  ;;  %v8166_v30 = vand.u32 4294901760, %v8165_v42  ;;  %v17646_v9 = vpack.c.bf16 %v17539_v25, %v17534_v52  ;;  %v17652_v57 = vpack.c.bf16 %v17564_v22, %v17559_v59  ;;  %v18074_v59 = vld [vmem:[#allocation28_spill] sm:$0xff] }
 0x973   : >> { %14018 = vmatpush3.bf16.msra.mxu1 %v17567_v12  ;;  %13255 = vmatprep.mubr.msk.f32.mxu1 %vm15583_vm0, %v15582_v53  ;;  %v17658_v42 = vpack.c.bf16 %v17588_v29, %v17583_v40  ;;  %v15157_v40 = vld [vmem:[#allocation14 + $0x4c] ss:$16 sps:$4 sm:$0xff]   ;;  %v15155_v29 = vld [vmem:[#allocation14 + $0x48] ss:$16 sps:$4 sm:$0xff]  }
 0x974   : >> { %14019 = vmatprep.subr.bf16.mxu1 %v15584_v23  ;;  %v17619_v54 = vpack.c.bf16 %v8173_v24, %v8166_v30  ;;  %v17701_v30 = vpack.c.bf16 %v8129_v61, %v8122_v62  ;;  %v15151_v62 = vld [vmem:[#allocation14 + $0xc] ss:$16 sps:$4 sm:$0xff]   ;;  %v15164_v24 = vld [vmem:[#allocation14 + $0xa8] ss:$16 sps:$4 sm:$0xff]  }
 0x977   : >> { %14021 = vmatpush3.bf16.msra.mxu1 %v17590_v34 }
 0x978   : >> { %14022 = vmatprep.subr.bf16.mxu1 %v15584_v23 }
 0x97b   : >> { %14024 = vmatpush3.bf16.msra.mxu1 %v17604_v20 }
 0x97c   : >> { %14025 = vmatprep.subr.bf16.mxu1 %v15584_v23 }
 0x97f   : >> { %14027 = vmatpush3.bf16.msra.mxu1 %v17615_v56 }
 0x980   : >> { %14028 = vmatprep.subr.bf16.mxu1 %v15584_v23 }
 0x983   : >> { %14030 = vmatpush3.bf16.msra.mxu1 %v17619_v54 }
 0x984   : >> { %14031 = vmatprep.subr.bf16.mxu1 %v15584_v23 }
 0x987   : >> { %14033 = vmatpush3.bf16.msra.mxu1 %v17457_v46 }
 0x988   : >> { %14034 = vmatprep.subr.bf16.mxu1 %v15584_v23 }
 0x98b   : >> { %14036 = vmatpush3.bf16.msra.mxu1 %v17477_v48 }
 0x98c   : >> { %14037 = vmatprep.subr.bf16.mxu1 %v15584_v23 }
 0x98f   : >> { %14039 = vmatpush3.bf16.msra.mxu1 %v17479_v4 }
 0x990   : >> { %14040 = vmatprep.subr.bf16.mxu1 %v15584_v23 }
 0x992   : >> { %13256 = vmatmul.mubr.f32.vlgmr.msra.gmra.mrb[4].mxu1 %v17542_v3 }
 0x993   : >> { %14042 = vmatpush3.bf16.msra.mxu1 %v17631_v44  ;;  %13290 = vmatprep.mubr.msk.f32.mxu1 %vm15583_vm0, %v15582_v53 }
 0x994   : >> { %14043 = vmatprep.subr.bf16.mxu1 %v15584_v23 }
 0x997   : >> { %14045 = vmatpush3.bf16.msra.mxu1 %v17638_v15 }
 0x998   : >> { %14046 = vmatprep.subr.bf16.mxu1 %v15584_v23 }
 0x99b   : >> { %14048 = vmatpush3.bf16.msra.mxu1 %v17646_v9 }
 0x99c   : >> { %14049 = vmatprep.subr.bf16.mxu1 %v15584_v23 }
 0x99f   : >> { %14051 = vmatpush3.bf16.msra.mxu1 %v17652_v57 }
 0x9a0   : >> { %14052 = vmatprep.subr.bf16.mxu1 %v15584_v23 }
 0x9a3   : >> { %14054 = vmatpush3.bf16.msra.mxu1 %v17658_v42 }
 0x9a4   : >> { %14055 = vmatprep.subr.bf16.mxu1 %v15584_v23 }
 0x9a7   : >> { %14057 = vmatpush3.bf16.msra.mxu1 %v17483_v47 }
 0x9a8   : >> { %14058 = vmatprep.subr.bf16.mxu1 %v15584_v23 }
 0x9ab   : >> { %14060 = vmatpush3.bf16.msra.mxu1 %v17487_v0 }
 0x9ac   : >> { %14061 = vmatprep.subr.bf16.mxu1 %v15584_v23 }
 0x9af   : >> { %14063 = vmatpush3.bf16.msra.mxu1 %v17491_v38 }
 0x9b0   : >> { %14064 = vmatprep.subr.bf16.mxu1 %v15584_v23 }
 0x9b2   : >> { %13291 = vmatmul.mubr.f32.vlgmr.msra.gmra.mrb[4].mxu1 %v17549_v51 }
 0x9b3   : >> { %14066 = vmatpush3.bf16.msra.mxu1 %v17335_v32  ;;  %13325 = vmatprep.mubr.msk.f32.mxu1 %vm15583_vm0, %v15582_v53 }
 0x9b4   : >> { %14067 = vmatprep.subr.bf16.mxu1 %v15584_v23 }
 0x9b7   : >> { %14069 = vmatpush3.bf16.msra.mxu1 %v17342_v18 }
 0x9b8   : >> { %14070 = vmatprep.subr.bf16.mxu1 %v15584_v23 }
 0x9bb   : >> { %14072 = vmatpush3.bf16.msra.mxu1 %v17357_v50 }
 0x9bc   : >> { %14073 = vmatprep.subr.bf16.mxu1 %v15584_v23 }
 0x9bf   : >> { %14075 = vmatpush3.bf16.msra.mxu1 %v17372_v49 }
 0x9c0   : >> { %14076 = vmatprep.subr.bf16.mxu1 %v15584_v23 }
 0x9c3   : >> { %14078 = vmatpush3.bf16.msra.mxu1 %v17383_v63 }
 0x9c4   : >> { %14079 = vmatprep.subr.bf16.mxu1 %v15584_v23 }
 0x9c7   : >> { %14081 = vmatpush3.bf16.msra.mxu1 %v17427_v33 }
 0x9c8   : >> { %14082 = vmatprep.subr.bf16.mxu1 %v15584_v23 }
 0x9cb   : >> { %14084 = vmatpush3.bf16.msra.mxu1 %v17431_v13 }
 0x9cc   : >> { %14085 = vmatprep.subr.bf16.mxu1 %v15584_v23 }
 0x9cf   : >> { %14087 = vmatpush3.bf16.msra.mxu1 %v17435_v45 }
 0x9d0   : >> { %14088 = vmatprep.subr.bf16.mxu1 %v15584_v23 }
 0x9d2   : >> { %13326 = vmatmul.mubr.f32.vlgmr.msra.gmra.mrb[4].mxu1 %v8097_v41  ;;  %v15149_v41 = vld [vmem:[#allocation14 + $0x8] ss:$16 sps:$4 sm:$0xff]  }
 0x9d3   : >> { %14090 = vmatpush3.bf16.msra.mxu1 %v17691_v31  ;;  %13360 = vmatprep.mubr.msk.f32.mxu1 %vm15583_vm0, %v15582_v53 }
 0x9d4   : >> { %14091 = vmatprep.subr.bf16.mxu1 %v15584_v23 }
 0x9d7   : >> { %14093 = vmatpush3.bf16.msra.mxu1 %v17701_v30 }
 0x9d8   : >> { %14094 = vmatprep.subr.bf16.mxu1 %v15584_v23 }
 0x9db   : >> { %14096 = vmatpush3.bf16.msra.mxu1 %v17711_v26 }
 0x9dc   : >> { %14097 = vmatprep.subr.bf16.mxu1 %v15584_v23 }
 0x9df   : >> { %14099 = vmatpush3.bf16.msra.mxu1 %v17719_v17 }
 0x9e0   : >> { %14100 = vmatprep.subr.bf16.mxu1 %v15584_v23 }
 0x9e3   : >> { %14102 = vmatpush3.bf16.msra.mxu1 %v17727_v16 }
 0x9e4   : >> { %14103 = vmatprep.subr.bf16.mxu1 %v15584_v23 }
 0x9e7   : >> { %14105 = vmatpush3.bf16.msra.mxu1 %v17735_v36 }
 0x9e8   : >> { %14106 = vmatprep.subr.bf16.mxu1 %v15584_v23 }
 0x9eb   : >> { %14108 = vmatpush3.bf16.msra.mxu1 %v17743_v60 }
 0x9ec   : >> { %14109 = vmatprep.subr.bf16.mxu1 %v15584_v23 }
 0x9ef   : >> { %14111 = vmatpush3.bf16.msra.mxu1 %v17751_v6 }
 0x9f0   : >> { %14112 = vmatprep.subr.bf16.mxu1 %v15584_v23 }
 0x9f2   : >> { %13361 = vmatmul.mubr.f32.vlgmr.msra.gmra.mrb[4].mxu1 %v17542_v3 }
 0x9f3   : >> { %14114 = vmatpush3.bf16.msra.mxu1 %v17335_v32  ;;  %13395 = vmatprep.mubr.msk.f32.mxu1 %vm15583_vm0, %v15582_v53 }
 0x9f4   : >> { %14115 = vmatprep.subr.bf16.mxu1 %v15584_v23 }
 0x9f7   : >> { %14117 = vmatpush3.bf16.msra.mxu1 %v17342_v18 }
 0x9f8   : >> { %14118 = vmatprep.subr.bf16.mxu1 %v15584_v23 }
 0x9fb   : >> { %14120 = vmatpush3.bf16.msra.mxu1 %v17357_v50 }
 0x9fc   : >> { %14121 = vmatprep.subr.bf16.mxu1 %v15584_v23 }
 0x9ff   : >> { %14123 = vmatpush3.bf16.msra.mxu1 %v17372_v49 }
 0xa00   : >> { %14124 = vmatprep.subr.bf16.mxu1 %v15584_v23 }
 0xa03   : >> { %14126 = vmatpush3.bf16.msra.mxu1 %v17383_v63 }
 0xa04   : >> { %14127 = vmatprep.subr.bf16.mxu1 %v15584_v23 }
 0xa07   : >> { %14129 = vmatpush3.bf16.msra.mxu1 %v17427_v33 }
 0xa08   : >> { %14130 = vmatprep.subr.bf16.mxu1 %v15584_v23 }
 0xa0b   : >> { %14132 = vmatpush3.bf16.msra.mxu1 %v17431_v13 }
 0xa0c   : >> { %14133 = vmatprep.subr.bf16.mxu1 %v15584_v23 }
 0xa0f   : >> { %14135 = vmatpush3.bf16.msra.mxu1 %v17435_v45 }
 0xa10   : >> { %14136 = vmatprep.subr.bf16.mxu1 %v15584_v23 }
 0xa12   : >> { %13396 = vmatmul.mubr.f32.vlgmr.msra.gmra.mrb[4].mxu1 %v17542_v3 }
 0xa13   : >> { %14138 = vmatpush3.bf16.msra.mxu1 %v17335_v32  ;;  %13430 = vmatprep.mubr.msk.f32.mxu1 %vm15583_vm0, %v15582_v53 }
 0xa14   : >> { %14139 = vmatprep.subr.bf16.mxu1 %v15584_v23 }
 0xa17   : >> { %14141 = vmatpush3.bf16.msra.mxu1 %v17342_v18 }
 0xa18   : >> { %14142 = vmatprep.subr.bf16.mxu1 %v15584_v23 }
 0xa1b   : >> { %14144 = vmatpush3.bf16.msra.mxu1 %v17357_v50 }
 0xa1c   : >> { %14145 = vmatprep.subr.bf16.mxu1 %v15584_v23 }
 0xa1f   : >> { %14147 = vmatpush3.bf16.msra.mxu1 %v17372_v49 }
 0xa20   : >> { %14148 = vmatprep.subr.bf16.mxu1 %v15584_v23 }
 0xa23   : >> { %14150 = vmatpush3.bf16.msra.mxu1 %v17383_v63 }
 0xa24   : >> { %14151 = vmatprep.subr.bf16.mxu1 %v15584_v23 }
 0xa27   : >> { %14153 = vmatpush3.bf16.msra.mxu1 %v17427_v33 }
 0xa28   : >> { %14154 = vmatprep.subr.bf16.mxu1 %v15584_v23 }
 0xa2b   : >> { %14156 = vmatpush3.bf16.msra.mxu1 %v17431_v13 }
 0xa2c   : >> { %14157 = vmatprep.subr.bf16.mxu1 %v15584_v23 }
 0xa2f   : >> { %14159 = vmatpush3.bf16.msra.mxu1 %v17435_v45 }
 0xa30   : >> { %14160 = vmatprep.subr.bf16.mxu1 %v15584_v23 }
 0xae5   : >> { %v8651_v7 = vpop.f32.mrb[4].mxu1 }
 0xae6   : >> { %v17795_v28 = vsub.f32 %v17528_v55, %v8651_v7  ;;  %v13397_v5 = vpop.f32.mrb[5].mxu1  ;;  %v15184_v7 = vld [vmem:[#allocation17 + $0x28] sm:$0xff]  }
 0xae7   : >> { %v15186_v5 = vld [vmem:[#allocation17 + $0x30] sm:$0xff]  }
 0xae8   : >> { %v8656_v27 = vmul.f32 %v17795_v28, %v17795_v28 }
 0xaea   : >> { %v17799_v14 = vand.u32 4294901760, %v8656_v27 }
 0xaec   : >> { %v8739_v11 = vsub.f32 %v8656_v27, %v17799_v14  ;;  %v15187_v27 = vld [vmem:[#allocation17 + $0x78] sm:$0xff]  }
 0xaee   : >> { %v8740_v8 = vand.u32 4294901760, %v8739_v11 }
 0xaf0   : >> { %v8741_v21 = vsub.f32 %v8739_v11, %v8740_v8 }
 0xaf2   : >> { %v8742_v39 = vand.u32 4294901760, %v8741_v21 }
 0xaf4   : >> { %13431 = vmatmul.mubr.f32.vlgmr.msra.gmra.mrb[6].mxu1 %v8742_v39 }
 0xaf5   : >> { %14162 = vmatpush3.bf16.msra.mxu1 %v17567_v12  ;;  %13465 = vmatprep.mubr.msk.f32.mxu1 %vm15583_vm0, %v15582_v53 }
 0xaf6   : >> { %14163 = vmatprep.subr.bf16.mxu1 %v15584_v23 }
 0xaf9   : >> { %14165 = vmatpush3.bf16.msra.mxu1 %v17590_v34  ;;  %v15160_v34 = vld [vmem:[#allocation14 + $0x6c] ss:$16 sps:$4 sm:$0xff]  }
 0xafa   : >> { %14166 = vmatprep.subr.bf16.mxu1 %v15584_v23 }
 0xafd   : >> { %14168 = vmatpush3.bf16.msra.mxu1 %v17604_v20  ;;  %v15161_v20 = vld [vmem:[#allocation14 + $0x88] ss:$16 sps:$4 sm:$0xff]  }
 0xafe   : >> { %14169 = vmatprep.subr.bf16.mxu1 %v15584_v23 }
 0xb01   : >> { %14171 = vmatpush3.bf16.msra.mxu1 %v17615_v56  ;;  %v15166_v56 = vld [vmem:[#allocation14 + $0xac] ss:$16 sps:$4 sm:$0xff]  }
 0xb02   : >> { %14172 = vmatprep.subr.bf16.mxu1 %v15584_v23 }
 0xb05   : >> { %14174 = vmatpush3.bf16.msra.mxu1 %v17619_v54  ;;  %v15169_v54 = vld [vmem:[#allocation14 + $0xcc] ss:$16 sps:$4 sm:$0xff]  }
 0xb06   : >> { %14175 = vmatprep.subr.bf16.mxu1 %v15584_v23 }
 0xb09   : >> { %14177 = vmatpush3.bf16.msra.mxu1 %v17457_v46  ;;  %v15139_v46 = vld [vmem:[#allocation14 + $0x84] ss:$16 sps:$4 sm:$0xff]  }
 0xb0a   : >> { %14178 = vmatprep.subr.bf16.mxu1 %v15584_v23 }
 0xb0d   : >> { %14180 = vmatpush3.bf16.msra.mxu1 %v17477_v48  ;;  %v15140_v48 = vld [vmem:[#allocation14 + $0xa0] ss:$16 sps:$4 sm:$0xff]  }
 0xb0e   : >> { %14181 = vmatprep.subr.bf16.mxu1 %v15584_v23 }
 0xb11   : >> { %14183 = vmatpush3.bf16.msra.mxu1 %v17479_v4  ;;  %v15585_v4 = vmov 0  }
 0xb12   : >> { %14184 = vmatprep.subr.bf16.mxu1 %v15584_v23 }
 0xb14   : >> { %13466 = vmatmul.mubr.f32.vlgmr.msra.gmra.mrb[6].mxu1 %v17799_v14 }
 0xb15   : >> { %14186 = vmatpush3.bf16.msra.mxu1 %v17631_v44  ;;  %13500 = vmatprep.mubr.msk.f32.mxu1 %vm15583_vm0, %v15582_v53  ;;  %v15167_v44 = vld [vmem:[#allocation14 + $0xc8] ss:$16 sps:$4 sm:$0xff]  }
 0xb16   : >> { %14187 = vmatprep.subr.bf16.mxu1 %v15584_v23 }
 0xb19   : >> { %14189 = vmatpush3.bf16.msra.mxu1 %v17638_v15  ;;  %v15172_v15 = vld [vmem:[#allocation14 + $0xec] ss:$16 sps:$4 sm:$0xff]  }
 0xb1a   : >> { %14190 = vmatprep.subr.bf16.mxu1 %v15584_v23 }
 0xb1d   : >> { %14192 = vmatpush3.bf16.msra.mxu1 %v17646_v9  ;;  %v15170_v9 = vld [vmem:[#allocation14 + $0xe8] ss:$16 sps:$4 sm:$0xff]  }
 0xb1e   : >> { %14193 = vmatprep.subr.bf16.mxu1 %v15584_v23 }
 0xb21   : >> { %14195 = vmatpush3.bf16.msra.mxu1 %v17652_v57  ;;  %v15173_v57 = vld [vmem:[#allocation17 + $0x40] sm:$0xff]  }
 0xb22   : >> { %14196 = vmatprep.subr.bf16.mxu1 %v15584_v23 }
 0xb25   : >> { %14198 = vmatpush3.bf16.msra.mxu1 %v17658_v42  ;;  %v15174_v42 = vld [vmem:[#allocation17] sm:$0xff]  }
 0xb26   : >> { %14199 = vmatprep.subr.bf16.mxu1 %v15584_v23 }
 0xb29   : >> { %14201 = vmatpush3.bf16.msra.mxu1 %v17483_v47  ;;  %v15145_v47 = vld [vmem:[#allocation14 + $0xc4] ss:$16 sps:$4 sm:$0xff]  }
 0xb2a   : >> { %14202 = vmatprep.subr.bf16.mxu1 %v15584_v23 }
 0xb2d   : >> { %14204 = vmatpush3.bf16.msra.mxu1 %v17487_v0  ;;  %v15143_v0 = vld [vmem:[#allocation14 + $0xc0] ss:$16 sps:$4 sm:$0xff]  }
 0xb2e   : >> { %14205 = vmatprep.subr.bf16.mxu1 %v15584_v23 }
 0xb31   : >> { %14207 = vmatpush3.bf16.msra.mxu1 %v17491_v38  ;;  %v15148_v38 = vld [vmem:[#allocation14 + $0xe4] ss:$16 sps:$4 sm:$0xff]  }
 0xb32   : >> { %14208 = vmatprep.subr.bf16.mxu1 %v15584_v23 }
 0xb34   : >> { %13501 = vmatmul.mubr.f32.vlgmr.msra.gmra.mrb[6].mxu1 %v8739_v11  ;;  %v15189_v11 = vld [vmem:[#allocation17 + $0xc0] sm:$0xff]  }
 0xb35   : >> { %14210 = vmatpush3.bf16.msra.mxu1 %v17335_v32  ;;  %13535 = vmatprep.mubr.msk.f32.mxu1 %vm15583_vm0, %v15582_v53 }
 0xb36   : >> { %14211 = vmatprep.subr.bf16.mxu1 %v15584_v23 }
 0xb39   : >> { %14213 = vmatpush3.bf16.msra.mxu1 %v17342_v18 }
 0xb3a   : >> { %14214 = vmatprep.subr.bf16.mxu1 %v15584_v23 }
 0xb3d   : >> { %14216 = vmatpush3.bf16.msra.mxu1 %v17357_v50 }
 0xb3e   : >> { %14217 = vmatprep.subr.bf16.mxu1 %v15584_v23 }
 0xb41   : >> { %14219 = vmatpush3.bf16.msra.mxu1 %v17372_v49 }
 0xb42   : >> { %14220 = vmatprep.subr.bf16.mxu1 %v15584_v23 }
 0xb45   : >> { %14222 = vmatpush3.bf16.msra.mxu1 %v17383_v63 }
 0xb46   : >> { %14223 = vmatprep.subr.bf16.mxu1 %v15584_v23 }
 0xb49   : >> { %14225 = vmatpush3.bf16.msra.mxu1 %v17427_v33 }
 0xb4a   : >> { %14226 = vmatprep.subr.bf16.mxu1 %v15584_v23 }
 0xb4d   : >> { %14228 = vmatpush3.bf16.msra.mxu1 %v17431_v13 }
 0xb4e   : >> { %14229 = vmatprep.subr.bf16.mxu1 %v15584_v23 }
 0xb51   : >> { %14231 = vmatpush3.bf16.msra.mxu1 %v17435_v45 }
 0xb52   : >> { %14232 = vmatprep.subr.bf16.mxu1 %v15584_v23 }
 0xb54   : >> { %13536 = vmatmul.mubr.f32.vlgmr.msra.gmra.mrb[6].mxu1 %v8740_v8  ;;  %v9348_v8 = vlaneseq }
 0xb55   : >> { %14234 = vmatpush3.bf16.msra.mxu1 %v17691_v31  ;;  %13570 = vmatprep.mubr.msk.f32.mxu1 %vm15583_vm0, %v15582_v53  ;;  %v15175_v31 = vld [vmem:[#allocation17 + $0x48] sm:$0xff]  }
 0xb56   : >> { %14235 = vmatprep.subr.bf16.mxu1 %v15584_v23  ;;  %v9349_v21 = vshrl.u32 %v9348_v8, 7  ;;  %v15200_v8 = vld [vmem:[#allocation17 + $0xa8] sm:$0xff]  }
 0xb58   : >> { %v9350_v39 = vsub.s32 0, %v9349_v21 }
 0xb59   : >> { %14237 = vmatpush3.bf16.msra.mxu1 %v17701_v30  ;;  %v15176_v30 = vld [vmem:[#allocation17 + $0x8] sm:$0xff]  }
 0xb5a   : >> { %14238 = vmatprep.subr.bf16.mxu1 %v15584_v23 }
 0xb5d   : >> { %14240 = vmatpush3.bf16.msra.mxu1 %v17711_v26  ;;  %v15177_v26 = vld [vmem:[#allocation17 + $0x50] sm:$0xff]  }
 0xb5e   : >> { %14241 = vmatprep.subr.bf16.mxu1 %v15584_v23 }
 0xb61   : >> { %14243 = vmatpush3.bf16.msra.mxu1 %v17719_v17  ;;  %v15178_v17 = vld [vmem:[#allocation17 + $0x10] sm:$0xff]  }
 0xb62   : >> { %14244 = vmatprep.subr.bf16.mxu1 %v15584_v23 }
 0xb65   : >> { %14246 = vmatpush3.bf16.msra.mxu1 %v17727_v16  ;;  %v15179_v16 = vld [vmem:[#allocation17 + $0x58] sm:$0xff]  }
 0xb66   : >> { %14247 = vmatprep.subr.bf16.mxu1 %v15584_v23 }
 0xb69   : >> { %14249 = vmatpush3.bf16.msra.mxu1 %v17735_v36  ;;  %v15180_v36 = vld [vmem:[#allocation17 + $0x18] sm:$0xff]  }
 0xb6a   : >> { %14250 = vmatprep.subr.bf16.mxu1 %v15584_v23 }
 0xb6d   : >> { %14252 = vmatpush3.bf16.msra.mxu1 %v17743_v60  ;;  %v15181_v60 = vld [vmem:[#allocation17 + $0x60] sm:$0xff]  }
 0xb6e   : >> { %14253 = vmatprep.subr.bf16.mxu1 %v15584_v23 }
 0xb71   : >> { %14255 = vmatpush3.bf16.msra.mxu1 %v17751_v6  ;;  %v15183_v6 = vld [vmem:[#allocation17 + $0x68] sm:$0xff]  }
 0xb72   : >> { %14256 = vmatprep.subr.bf16.mxu1 %v15584_v23 }
 0xb74   : >> { %13571 = vmatmul.mubr.f32.vlgmr.msra.gmra.mrb[6].mxu1 %v17799_v14 }
 0xb75   : >> { %14258 = vmatpush3.bf16.msra.mxu1 %v17335_v32  ;;  %13605 = vmatprep.mubr.msk.f32.mxu1 %vm15583_vm0, %v15582_v53  ;;  %v15127_v53 = vld [vmem:[#allocation14 + $0x4] ss:$16 sps:$4 sm:$0xff]   ;;  %v15125_v32 = vld [vmem:[#allocation14] ss:$16 sps:$4 sm:$0xff]  }
 0xb76   : >> { %14259 = vmatprep.subr.bf16.mxu1 %v15584_v23 }
 0xb79   : >> { %14261 = vmatpush3.bf16.msra.mxu1 %v17342_v18  ;;  %v15130_v18 = vld [vmem:[#allocation14 + $0x24] ss:$16 sps:$4 sm:$0xff]  }
 0xb7a   : >> { %14262 = vmatprep.subr.bf16.mxu1 %v15584_v23 }
 0xb7d   : >> { %14264 = vmatpush3.bf16.msra.mxu1 %v17357_v50  ;;  %v15128_v50 = vld [vmem:[#allocation14 + $0x20] ss:$16 sps:$4 sm:$0xff]  }
 0xb7e   : >> { %14265 = vmatprep.subr.bf16.mxu1 %v15584_v23 }
 0xb81   : >> { %14267 = vmatpush3.bf16.msra.mxu1 %v17372_v49  ;;  %v15133_v49 = vld [vmem:[#allocation14 + $0x44] ss:$16 sps:$4 sm:$0xff]  }
 0xb82   : >> { %14268 = vmatprep.subr.bf16.mxu1 %v15584_v23 }
 0xb85   : >> { %14270 = vmatpush3.bf16.msra.mxu1 %v17383_v63  ;;  %v15131_v63 = vld [vmem:[#allocation14 + $0x40] ss:$16 sps:$4 sm:$0xff]  }
 0xb86   : >> { %14271 = vmatprep.subr.bf16.mxu1 %v15584_v23 }
 0xb89   : >> { %14273 = vmatpush3.bf16.msra.mxu1 %v17427_v33  ;;  %v15136_v33 = vld [vmem:[#allocation14 + $0x64] ss:$16 sps:$4 sm:$0xff]  }
 0xb8a   : >> { %14274 = vmatprep.subr.bf16.mxu1 %v15584_v23 }
 0xb8d   : >> { %14276 = vmatpush3.bf16.msra.mxu1 %v17431_v13  ;;  %v15134_v13 = vld [vmem:[#allocation14 + $0x60] ss:$16 sps:$4 sm:$0xff]  }
 0xb8e   : >> { %14277 = vmatprep.subr.bf16.mxu1 %v15584_v23  ;;  %v15137_v23 = vld [vmem:[#allocation14 + $0x80] ss:$16 sps:$4 sm:$0xff]  }
 0xb91   : >> { %14279 = vmatpush3.bf16.msra.mxu1 %v17435_v45  ;;  %v15142_v45 = vld [vmem:[#allocation14 + $0xa4] ss:$16 sps:$4 sm:$0xff]  }
 0xb92   : >> { %9528 = vmatprep.subr.bf16.mxu1 %v15127_v53  ;;  %v9354_v53 = vsub.s32 1, %v9349_v21 }
 0xb94   : >> { %13606 = vmatmul.mubr.f32.vlgmr.msra.gmra.mrb[6].mxu1 %v17799_v14  ;;  %v15188_v14 = vld [vmem:[#allocation17 + $0x38] sm:$0xff]  }
 0xb95   : >> { %9529 = vmatpush1.bf16.msra.mxu1 %v15125_v32  ;;  %9560 = vmatprep.mubr.bf16.mxu1 %v15585_v4  ;;  %v18075_v32 = vld [vmem:[#allocation29_spill] sm:$0xff] }
 0xb96   : >> { %9530 = vmatprep.subr.bf16.mxu1 %v15130_v18  ;;  %v9351_v18 = vrot.slane %v18075_v32, %v9350_v39 }
 0xb99   : >> { %9531 = vmatpush1.bf16.msra.mxu1 %v15128_v50  ;;  %v9355_v50 = vrot.slane %v18075_v32, %v9354_v53  ;;  %v15202_v53 = vld [vmem:[#allocation17 + $0xb0] sm:$0xff]  }
 0xb9a   : >> { %9532 = vmatprep.subr.bf16.mxu1 %v15133_v49 }
 0xb9d   : >> { %9533 = vmatpush1.bf16.msra.mxu1 %v15131_v63 }
 0xb9e   : >> { %9534 = vmatprep.subr.bf16.mxu1 %v15136_v33 }
 0xba1   : >> { %9535 = vmatpush1.bf16.msra.mxu1 %v15134_v13 }
 0xba2   : >> { %9536 = vmatprep.subr.bf16.mxu1 %v15139_v46 }
 0xba5   : >> { %9537 = vmatpush1.bf16.msra.mxu1 %v15137_v23 }
 0xba6   : >> { %9538 = vmatprep.subr.bf16.mxu1 %v15142_v45 }
 0xba9   : >> { %9539 = vmatpush1.bf16.msra.mxu1 %v15140_v48 }
 0xbaa   : >> { %9540 = vmatprep.subr.bf16.mxu1 %v15145_v47 }
 0xbad   : >> { %9541 = vmatpush1.bf16.msra.mxu1 %v15143_v0 }
 0xbae   : >> { %9542 = vmatprep.subr.bf16.mxu1 %v15148_v38 }
 0xbb1   : >> { %9543 = vmatpush1.bf16.msra.mxu1 %v15146_v1 }
 0xbb2   : >> { %9569 = vmatprep.subr.bf16.mxu1 %v15151_v62 }
 0xc67   : >> { %v9294_v61 = vpop.f32.mrb[6].mxu1 }
 0xc68   : >> { %v14370_v52 = vadd.f32 1e-05, %v9294_v61  ;;  %v13607_v25 = vpop.f32.mrb[7].mxu1 }
 0xc6a   : >> { %15205 = vrsqrt.f32 %v14370_v52 }
 0xc74   : >> { %v15206_v3 = vpop.eup %15205 }
 0xc75   : >> { %v9299_v51 = vmul.f32 %v15206_v3, %v17795_v28  ;;  %v15185_v28 = vld [vmem:[#allocation17 + $0x70] sm:$0xff]  }
 0xc77   : >> { %v9306_v2 = vmul.f32 %v18073_v37, %v9299_v51  ;;  %v9358_v37 = vsub.s32 2, %v9349_v21 }
 0xc79   : >> { %v9313_v22 = vadd.f32 %v18074_v59, %v9306_v2  ;;  %v9362_v59 = vsub.s32 3, %v9349_v21  ;;  %v15201_v21 = vld [vmem:[#allocation17 + $0xf0] sm:$0xff]  }
 0xc7b   : >> { %v9314_v12 = vpack.c.bf16 %v9313_v22, %v9313_v22 }
 0xc7d   : >> { %9561 = vmatmul.mubr.bf16.vlgmr.msra.gmra.mrb[8].mxu1 %v9314_v12 }
 0xc7e   : >> { %9570 = vmatpush1.bf16.msra.mxu1 %v15149_v41  ;;  %9601 = vmatprep.mubr.bf16.mxu1 %v15585_v4 }
 0xc7f   : >> { %9571 = vmatprep.subr.bf16.mxu1 %v15154_v43  ;;  %v9359_v43 = vrot.slane %v18075_v32, %v9358_v37 }
 0xc82   : >> { %9572 = vmatpush1.bf16.msra.mxu1 %v15152_v10 }
 0xc83   : >> { %9573 = vmatprep.subr.bf16.mxu1 %v15157_v40  ;;  %v9363_v40 = vrot.slane %v18075_v32, %v9362_v59 }
 0xc86   : >> { %9574 = vmatpush1.bf16.msra.mxu1 %v15155_v29 }
 0xc87   : >> { %9575 = vmatprep.subr.bf16.mxu1 %v15160_v34  ;;  %v15190_v34 = vld [vmem:[#allocation17 + $0x80] sm:$0xff]  }
 0xc8a   : >> { %9576 = vmatpush1.bf16.msra.mxu1 %v15158_v58 }
 0xc8b   : >> { %9577 = vmatprep.subr.bf16.mxu1 %v15163_v35 }
 0xc8e   : >> { %9578 = vmatpush1.bf16.msra.mxu1 %v15161_v20  ;;  %v15191_v20 = vld [vmem:[#allocation17 + $0xc8] sm:$0xff]  }
 0xc8f   : >> { %9579 = vmatprep.subr.bf16.mxu1 %v15166_v56 }
 0xc92   : >> { %9580 = vmatpush1.bf16.msra.mxu1 %v15164_v24 }
 0xc93   : >> { %9581 = vmatprep.subr.bf16.mxu1 %v15169_v54 }
 0xc96   : >> { %9582 = vmatpush1.bf16.msra.mxu1 %v15167_v44 }
 0xc97   : >> { %9583 = vmatprep.subr.bf16.mxu1 %v15172_v15 }
 0xc9a   : >> { %9584 = vmatpush1.bf16.msra.mxu1 %v15170_v9 }
 0xc9b   : >> { %11636 = vmatprep.subr.bf16.mxu1 %v15173_v57  ;;  %v15192_v57 = vld [vmem:[#allocation17 + $0x88] sm:$0xff]  }
 0xc9d   : >> { %9602 = vmatmul.mubr.bf16.vlgmr.msra.gmra.mrb[12].mxu1 %v9314_v12 }
 0xc9e   : >> { %11637 = vmatpush3.bf16.msra.mxu1 %v15174_v42 }
 0xc9f   : >> { %11638 = vmatprep.subr.bf16.mxu1 %v15175_v31  ;;  %v15193_v31 = vld [vmem:[#allocation17 + $0xd0] sm:$0xff]  }
 0xca2   : >> { %11639 = vmatpush3.bf16.msra.mxu1 %v15176_v30 }
 0xca3   : >> { %11640 = vmatprep.subr.bf16.mxu1 %v15177_v26 }
 0xca6   : >> { %11641 = vmatpush3.bf16.msra.mxu1 %v15178_v17 }
 0xca7   : >> { %11642 = vmatprep.subr.bf16.mxu1 %v15179_v16  ;;  %v15194_v16 = vld [vmem:[#allocation17 + $0x90] sm:$0xff]  }
 0xcaa   : >> { %11643 = vmatpush3.bf16.msra.mxu1 %v15180_v36 }
 0xcab   : >> { %11644 = vmatprep.subr.bf16.mxu1 %v15181_v60  ;;  %v15195_v60 = vld [vmem:[#allocation17 + $0xd8] sm:$0xff]  }
 0xcae   : >> { %11645 = vmatpush3.bf16.msra.mxu1 %v15182_v19 }
 0xcaf   : >> { %11646 = vmatprep.subr.bf16.mxu1 %v15183_v6 }
 0xcb2   : >> { %11647 = vmatpush3.bf16.msra.mxu1 %v15184_v7 }
 0xcb3   : >> { %11648 = vmatprep.subr.bf16.mxu1 %v15185_v28  ;;  %v15196_v28 = vld [vmem:[#allocation17 + $0x98] sm:$0xff]  }
 0xcb6   : >> { %11649 = vmatpush3.bf16.msra.mxu1 %v15186_v5 }
 0xcb7   : >> { %11650 = vmatprep.subr.bf16.mxu1 %v15187_v27  ;;  %v15197_v27 = vld [vmem:[#allocation17 + $0xe0] sm:$0xff]  }
 0xcba   : >> { %11651 = vmatpush3.bf16.msra.mxu1 %v15188_v14  ;;  %v15198_v14 = vld [vmem:[#allocation17 + $0xa0] sm:$0xff]  }
 0xcbb   : >> { %11658 = vmatprep.subr.bf16.mxu1 %v15189_v11  ;;  %v15199_v11 = vld [vmem:[#allocation17 + $0xe8] sm:$0xff]  }
 0xd50   : >> { %v9562_v49 = vpop.f32.mrb[8].mxu1 }
 0xd51   : >> { %v9563_v63 = vadd.f32 %v9562_v49, %v9351_v18  ;;  %v9564_v33 = vpop.f32.mrb[9].mxu1 }
 0xd52   : >> { %v9565_v13 = vadd.f32 %v9564_v33, %v9355_v50  ;;  %v9566_v23 = vpop.f32.mrb[10].mxu1  ;;  %v15203_v50 = vld [vmem:[#allocation17 + $0xf8] sm:$0xff]  }
 0xd53   : >> { %v9610_v46 = vmul.f32 %v9563_v63, %v9563_v63  ;;  %v9567_v45 = vpop.f32.mrb[11].mxu1 }
 0xd54   : >> { %v9611_v48 = vmul.f32 %v9565_v13, %v9565_v13 }
 0xd55   : >> { %v9614_v4 = vmul.f32 %v9610_v46, %v9563_v63 }
 0xd56   : >> { %v9615_v47 = vmul.f32 %v9611_v48, %v9565_v13 }
 0xd57   : >> { %v9618_v0 = vmul.f32 0.044715, %v9614_v4 }
 0xd58   : >> { %v9619_v38 = vmul.f32 0.044715, %v9615_v47 }
 0xd59   : >> { %v9622_v1 = vadd.f32 %v9618_v0, %v9563_v63 }
 0xd5a   : >> { %v9623_v62 = vadd.f32 %v9619_v38, %v9565_v13 }
 0xd5b   : >> { %v9626_v61 = vmul.f32 0.7978846, %v9622_v1 }
 0xd5c   : >> { %v9627_v52 = vmul.f32 0.7978846, %v9623_v62 }
 0xd5d   : >> { %15207 = vtanh.f32 %v9626_v61 }
 0xd5e   : >> { %15209 = vtanh.f32 %v9627_v52 }
 0xd67   : >> { %v15208_v25 = vpop.eup %15207 }
 0xd68   : >> { %v15210_v3 = vpop.eup %15209  ;;  %v9634_v51 = vadd.f32 1.0, %v15208_v25  ;;  %v18076_v25 = vld [vmem:[#allocation30_spill] sm:$0xff] }
 0xd69   : >> { %v9635_v2 = vadd.f32 1.0, %v15210_v3 }
 0xd6a   : >> { %v9638_v22 = vmul.f32 0.5, %v9634_v51 }
 0xd6b   : >> { %v9639_v41 = vmul.f32 0.5, %v9635_v2 }
 0xd6c   : >> { %v9642_v12 = vmul.f32 %v9638_v22, %v9563_v63 }
 0xd6d   : >> { %v9643_v10 = vmul.f32 %v9639_v41, %v9565_v13  ;;  %v15204_v13 = vld [vmem:[#allocation17 + $0xb8] sm:$0xff]  }
 0xd6e   : >> { %v9646_v35 = vpack.c.bf16 %v9642_v12, %v9642_v12 }
 0xd6f   : >> { %v9647_v29 = vpack.c.bf16 %v9643_v10, %v9643_v10 }
 0xd70   : >> { %v9603_v58 = vpop.f32.mrb[12].mxu1 }
 0xd71   : >> { %v9604_v56 = vadd.f32 %v9603_v58, %v9359_v43  ;;  %v9605_v24 = vpop.f32.mrb[13].mxu1  ;;  %9944 = vmatprep.mubr.bf16.mxu1 %v9647_v29 }
 0xd72   : >> { %v9606_v54 = vadd.f32 %v9605_v24, %v9363_v40  ;;  %v9607_v44 = vpop.f32.mrb[14].mxu1  ;;  %9945 = vmatmul.mubr.bf16.vlgmr.msra.gmra.mrb[16].mxu1 %v9646_v35 }
 0xd73   : >> { %v9612_v15 = vmul.f32 %v9604_v56, %v9604_v56  ;;  %v9608_v9 = vpop.f32.mrb[15].mxu1  ;;  %11659 = vmatpush3.bf16.msra.mxu1 %v15190_v34 }
 0xd74   : >> { %v9613_v42 = vmul.f32 %v9606_v54, %v9606_v54  ;;  %11660 = vmatprep.subr.bf16.mxu1 %v15191_v20 }
 0xd75   : >> { %v9616_v30 = vmul.f32 %v9612_v15, %v9604_v56 }
 0xd76   : >> { %v9617_v26 = vmul.f32 %v9613_v42, %v9606_v54 }
 0xd77   : >> { %v9620_v17 = vmul.f32 0.044715, %v9616_v30  ;;  %11661 = vmatpush3.bf16.msra.mxu1 %v15192_v57 }
 0xd78   : >> { %v9621_v36 = vmul.f32 0.044715, %v9617_v26  ;;  %11662 = vmatprep.subr.bf16.mxu1 %v15193_v31 }
 0xd79   : >> { %v9624_v19 = vadd.f32 %v9620_v17, %v9604_v56 }
 0xd7a   : >> { %v9625_v6 = vadd.f32 %v9621_v36, %v9606_v54 }
 0xd7b   : >> { %v9628_v7 = vmul.f32 0.7978846, %v9624_v19  ;;  %11663 = vmatpush3.bf16.msra.mxu1 %v15194_v16 }
 0xd7c   : >> { %v9629_v5 = vmul.f32 0.7978846, %v9625_v6  ;;  %11664 = vmatprep.subr.bf16.mxu1 %v15195_v60 }
 0xd7d   : >> { %15211 = vtanh.f32 %v9628_v7 }
 0xd7e   : >> { %15213 = vtanh.f32 %v9629_v5 }
 0xd7f   : >> { %11665 = vmatpush3.bf16.msra.mxu1 %v15196_v28 }
 0xd80   : >> { %11666 = vmatprep.subr.bf16.mxu1 %v15197_v27 }
 0xd83   : >> { %11667 = vmatpush3.bf16.msra.mxu1 %v15198_v14 }
 0xd84   : >> { %11668 = vmatprep.subr.bf16.mxu1 %v15199_v11 }
 0xd87   : >> { %v15212_v39 = vpop.eup %15211  ;;  %11669 = vmatpush3.bf16.msra.mxu1 %v15200_v8 }
 0xd88   : >> { %v15214_v18 = vpop.eup %15213  ;;  %11670 = vmatprep.subr.bf16.mxu1 %v15201_v21  ;;  %v9636_v49 = vadd.f32 1.0, %v15212_v39 }
 0xd89   : >> { %v9637_v63 = vadd.f32 1.0, %v15214_v18 }
 0xd8a   : >> { %v9640_v33 = vmul.f32 0.5, %v9636_v49 }
 0xd8b   : >> { %11671 = vmatpush3.bf16.msra.mxu1 %v15202_v53  ;;  %v9641_v23 = vmul.f32 0.5, %v9637_v63 }
 0xd8c   : >> { %11672 = vmatprep.subr.bf16.mxu1 %v15203_v50  ;;  %v9644_v46 = vmul.f32 %v9640_v33, %v9604_v56 }
 0xd8d   : >> { %v9645_v45 = vmul.f32 %v9641_v23, %v9606_v54 }
 0xd8e   : >> { %v9648_v4 = vpack.c.bf16 %v9644_v46, %v9644_v46 }
 0xd8f   : >> { %11673 = vmatpush3.bf16.msra.mxu1 %v15204_v13  ;;  %v9649_v48 = vpack.c.bf16 %v9645_v45, %v9645_v45 }
 0xd91   : >> { %9984 = vmatprep.mubr.bf16.mxu1 %v9649_v48 }
 0xd92   : >> { %9985 = vmatmul.mubr.bf16.vlgmr.msra.gmra.mrb[20].mxu1 %v9648_v4 }
 0xe45   : >> { %v11652_v47 = vpop.f32.mrb[16].mxu1 }
 0xe46   : >> { %v11653_v0 = vpop.f32.mrb[17].mxu1 }
 0xe47   : >> { %v11654_v38 = vadd.f32 %v11653_v0, %v11652_v47  ;;  %v11655_v1 = vpop.f32.mrb[18].mxu1 }
 0xe48   : >> { %v11656_v62 = vpop.f32.mrb[19].mxu1 }
 0xe49   : >> { %v9947_v3 = vadd.f32 %v11654_v38, %v18076_v25 }
 0xe65   : >> { %v11674_v61 = vpop.f32.mrb[20].mxu1 }
 0xe66   : >> { %v11675_v52 = vpop.f32.mrb[21].mxu1 }
 0xe67   : >> { %v11676_v51 = vadd.f32 %v11675_v52, %v11674_v61  ;;  %v11677_v37 = vpop.f32.mrb[22].mxu1  ;;  %2584 = sbr.rel (!%p2582_p1) target bundleno = 1137 (0x471), region = 215 }
 0xe68   : >> { %v11678_v2 = vpop.f32.mrb[23].mxu1 }
 0xe69   : >> { %v9987_v59 = vadd.f32 %v11676_v51, %v9947_v3 }
 0xe6b   : >> { %v9992_v22 = vadd.f32 %v17528_v55, %v9987_v59 }
 0xe6d   : >> { %9994 = vst [vmem:[%s9993_s26] sm:$0xff] %v9992_v22 }
 0xe6e PF: > { %s28_s21 = sadd.s32 1, %s15558_s21  }
 0xe6f   : > { %p25_p7 = scmp.ge.s32.totalorder %s28_s21, 4  }
 0xe71   :  { %27 = sbr.rel (!%p25_p7) target bundleno = 10 (0xa), region = 226 }
 0xe78   :  { %10016 = vsyncpa [#allocation4], 1 }
 0xe79   :  { %10018 = vsyncpa [#allocation4 + $0x1], 1 }
 0xe7a   :  { %10019 = vsyncpa [#allocation6], 1 }
 0xe7b   :  { %10020 = vsyncpa [#allocation9], 1 }
 0xe7c   :  { %10021 = vsyncpa [#allocation12], 1 }
 0xe7d   :  { %10022 = vsyncpa [#allocation15], 1 }
 0xe7e   :  { %10023 = vsyncpa [#allocation18], 1 }

</bundles_post_ra>
